<compile_context>
chip_gen: v7x
topology: tpu7x:2x2x1
jax: 0.10.0
libtpu: 0.0.40
codegen_flags: <defaults>
</compile_context>

<pallas_src>
import numpy as np
import jax
import jax.numpy as jnp
from jax.experimental import pallas as pl
from jax.experimental.pallas import tpu as pltpu

LANE = 128


# ----------------------------------------------------------------------------
# Anchor utilities (pure numpy glue, identical semantics to the reference)
# ----------------------------------------------------------------------------
def generate_anchor_base(base_size=16, ratios=(0.5, 1, 2), anchor_scales=(8, 16, 32)):
    py = base_size / 2.0
    px = base_size / 2.0
    anchor_base = np.zeros((len(ratios) * len(anchor_scales), 4), dtype=np.float32)
    for i in range(len(ratios)):
        for j in range(len(anchor_scales)):
            h = base_size * anchor_scales[j] * np.sqrt(ratios[i])
            w = base_size * anchor_scales[j] * np.sqrt(1.0 / ratios[i])
            idx = i * len(anchor_scales) + j
            anchor_base[idx, 0] = py - h / 2.0
            anchor_base[idx, 1] = px - w / 2.0
            anchor_base[idx, 2] = py + h / 2.0
            anchor_base[idx, 3] = px + w / 2.0
    return anchor_base


def enumerate_shifted_anchor(anchor_base, feat_stride, height, width):
    shift_y = np.arange(0, height * feat_stride, feat_stride)
    shift_x = np.arange(0, width * feat_stride, feat_stride)
    shift_x, shift_y = np.meshgrid(shift_x, shift_y)
    shift = np.stack(
        (shift_y.ravel(), shift_x.ravel(), shift_y.ravel(), shift_x.ravel()), axis=1
    )
    A = anchor_base.shape[0]
    K = shift.shape[0]
    anchor = anchor_base.reshape((1, A, 4)) + shift.reshape((1, K, 4)).transpose((1, 0, 2))
    return anchor.reshape((K * A, 4)).astype(np.float32)


# ----------------------------------------------------------------------------
# Pallas kernel: row-blocked conv3x3 (9-tap matmul accumulation) + bias + ReLU
# + fused 1x1 heads, lane-dense bf16 output slab.
# ----------------------------------------------------------------------------
def _make_rpn_head_kernel(RB, W, Cin, Cmid_p, Cout_p, pad_rows):
    RBW = RB * W
    ext_len = 2 * pad_rows + 2 * W + RBW

    def kernel(x_ref, top_ref, bot_ref, w1_ref, b1_ref, wh_ref, bh_ref,
               out_ref, ext_ref):
        # x_ref:   (1, RB, W, Cin)   bf16  row block of the feature map
        # top_ref: (1, 1,  W, Cin)   bf16  image row above the block (zeros at top)
        # bot_ref: (1, 1,  W, Cin)   bf16  image row below the block (zeros at bottom)
        # w1_ref:  (9*Cin, Cmid_p)   bf16  conv3x3 weight, taps (ky,kx) row-major
        # b1_ref:  (1, Cmid_p)       f32
        # wh_ref:  (Cmid_p, Cout_p)  bf16  [loc | score | zero-pad] fused head weight
        # bh_ref:  (1, Cout_p)       f32
        # out_ref: (1, RB*W, Cout_p) bf16  lane-dense fused output slab
        # ext_ref: (ext_len, Cin)    bf16  persistent halo-extended scratch slab

        # Assemble [guard | halo-above | block | halo-below | guard] in VMEM scratch.
        # Guard rows keep every tap's static slice in-bounds; the only positions
        # that ever read a guard row are column-masked anyway, but we re-zero the
        # guards every step (trivial) so the scratch carries no state across the
        # (parallel) grid.
        zeros_guard = jnp.zeros((pad_rows, Cin), jnp.bfloat16)
        ext_ref[0:pad_rows, :] = zeros_guard
        ext_ref[ext_len - pad_rows:ext_len, :] = zeros_guard
        ext_ref[pad_rows:pad_rows + W, :] = top_ref[0, 0]
        ext_ref[pad_rows + W:pad_rows + W + RBW, :] = x_ref[0].reshape(RBW, Cin)
        ext_ref[pad_rows + W + RBW:pad_rows + W + RBW + W, :] = bot_ref[0, 0]

        # Two horizontal edge masks, hoisted out of the tap loop and reused for all
        # three ky values.  Vertical out-of-image is handled by the halo rows.
        col = jax.lax.broadcasted_iota(jnp.int32, (RBW, 1), 0) % W
        left_ok = col >= 1            # tap dx = -1 is invalid at column 0
        right_ok = col <= W - 2       # tap dx = +1 is invalid at column W-1
        zero = jnp.zeros((), jnp.bfloat16)

        # 3x3 conv as 9 tap-accumulated MXU matmuls (no materialized im2col patch).
        acc = None
        tap_idx = 0
        for ky in range(3):
            for kx in range(3):
                dx = kx - 1
                start = pad_rows + ky * W + dx            # static int >= pad_rows-1
                tap = ext_ref[start:start + RBW, :]       # (RB*W, Cin) bf16
                if dx == -1:
                    tap = jnp.where(left_ok, tap, zero)
                elif dx == 1:
                    tap = jnp.where(right_ok, tap, zero)
                w_tap = w1_ref[tap_idx * Cin:(tap_idx + 1) * Cin, :]
                part = jnp.dot(tap, w_tap, preferred_element_type=jnp.float32)
                acc = part if acc is None else acc + part
                tap_idx += 1

        # Bias + ReLU, then the fused (loc | score) 1x1 heads as one matmul.
        h = jnp.maximum(acc + b1_ref[...], 0.0).astype(jnp.bfloat16)
        out = jnp.dot(h, wh_ref[...], preferred_element_type=jnp.float32) + bh_ref[...]
        out_ref[0] = out.astype(out_ref.dtype)

    return kernel


def rpn_head_pallas(x_nhwc, w1, b1, wl, bl, ws, bs, row_block=8):
    n, hh, ww, cin = x_nhwc.shape
    cmid = w1.shape[-1]
    n_loc = wl.shape[-1]
    n_score = ws.shape[-1]
    n_out = n_loc + n_score
    hw = hh * ww

    # Row block (falls back to a full image if H is not divisible).
    rb = row_block if (row_block > 0 and hh % row_block == 0) else hh
    nb = hh // rb
    pad_rows = 8  # sublane-aligned guard so every tap slice start is >= 0

    cmid_p = ((cmid + LANE - 1) // LANE) * LANE
    cout_p = ((n_out + LANE - 1) // LANE) * LANE

    # Data path in bf16 (halves the dominant HBM read; accumulation stays f32).
    xb = x_nhwc.astype(jnp.bfloat16)

    # Per-row-block 1-row halos (zeros at the image top / bottom).  Keeping them in
    # small separate arrays keeps every BlockSpec non-overlapping & auto-pipelined.
    zero_row = jnp.zeros((n, 1, ww, cin), jnp.bfloat16)
    above = xb[:, rb - 1:hh - 1:rb]              # rows rb-1, 2rb-1, ...  (nb-1 rows)
    below = xb[:, rb:hh:rb]                      # rows rb, 2rb, ...      (nb-1 rows)
    top_halo = jnp.concatenate([zero_row, above], axis=1)   # (n, nb, W, Cin)
    bot_halo = jnp.concatenate([below, zero_row], axis=1)   # (n, nb, W, Cin)

    # Parameter repacking (in production this would be folded at init time):
    #  - conv1 weight as an im2col matrix, Cmid zero-padded to a full lane width.
    #  - loc/score head weights fused + zero-padded to a lane-dense output width.
    w1f = jnp.pad(w1.reshape(9 * cin, cmid),
                  ((0, 0), (0, cmid_p - cmid))).astype(jnp.bfloat16)
    b1p = jnp.pad(b1.reshape(1, cmid),
                  ((0, 0), (0, cmid_p - cmid))).astype(jnp.float32)
    wh = jnp.pad(jnp.concatenate([wl, ws], axis=1),
                 ((0, cmid_p - cmid), (0, cout_p - n_out))).astype(jnp.bfloat16)
    bh = jnp.pad(jnp.concatenate([bl.reshape(1, -1), bs.reshape(1, -1)], axis=1),
                 ((0, 0), (0, cout_p - n_out))).astype(jnp.float32)

    kernel = _make_rpn_head_kernel(rb, ww, cin, cmid_p, cout_p, pad_rows)

    # Explicit VMEM budget for the chosen row block: double-buffered I/O blocks,
    # weights (x2 in case single-buffering is unavailable), the halo scratch slab
    # and the f32 accumulator, with 2x headroom, capped below v7x physical VMEM.
    ext_rows = 2 * pad_rows + 2 * ww + rb * ww
    est_bytes = (2 * (rb * ww * cin * 2 + 2 * ww * cin * 2 + rb * ww * cout_p * 2)
                 + 2 * ((9 * cin * cmid_p + cmid_p * cout_p) * 2
                        + (cmid_p + cout_p) * 4)
                 + ext_rows * cin * 2
                 + rb * ww * cmid_p * 4)
    vmem_limit = int(min(max(2 * est_bytes, 16 << 20), 64 << 20))

    def build_call(single_buffer_weights):
        const_kwargs = (dict(pipeline_mode=pl.Buffered(buffer_count=1))
                        if single_buffer_weights else {})
        grid_spec = pltpu.PrefetchScalarGridSpec(
            num_scalar_prefetch=0,
            grid=(n, nb),
            in_specs=[
                pl.BlockSpec((1, rb, ww, cin), lambda b, j: (b, j, 0, 0)),
                pl.BlockSpec((1, 1, ww, cin), lambda b, j: (b, j, 0, 0)),
                pl.BlockSpec((1, 1, ww, cin), lambda b, j: (b, j, 0, 0)),
                pl.BlockSpec((9 * cin, cmid_p), lambda b, j: (0, 0), **const_kwargs),
                pl.BlockSpec((1, cmid_p), lambda b, j: (0, 0), **const_kwargs),
                pl.BlockSpec((cmid_p, cout_p), lambda b, j: (0, 0), **const_kwargs),
                pl.BlockSpec((1, cout_p), lambda b, j: (0, 0), **const_kwargs),
            ],
            out_specs=pl.BlockSpec((1, rb * ww, cout_p), lambda b, j: (b, j, 0)),
            scratch_shapes=[pltpu.VMEM((ext_rows, cin), jnp.bfloat16)],
        )
        return pl.pallas_call(
            kernel,
            out_shape=jax.ShapeDtypeStruct((n, hw, cout_p), jnp.bfloat16),
            grid_spec=grid_spec,
            compiler_params=pltpu.CompilerParams(
                dimension_semantics=("parallel", "parallel"),
                vmem_limit_bytes=vmem_limit),
        )

    try:
        out = build_call(True)(xb, top_halo, bot_halo, w1f, b1p, wh, bh)
        jax.block_until_ready(out)
    except Exception:
        # Fallback for jax versions without BlockSpec pipeline_mode / Buffered(1).
        out = build_call(False)(xb, top_halo, bot_halo, w1f, b1p, wh, bh)

    out = out[:, :, :n_out].astype(jnp.float32)
    loc = out[:, :, :n_loc].reshape(n, hh, ww, n_loc)
    score = out[:, :, n_loc:].reshape(n, hh, ww, n_score)
    return loc, score


# ----------------------------------------------------------------------------
# Module-level forward (glue in plain JAX / numpy)
# ----------------------------------------------------------------------------
def rpn_forward(x_nchw, params, anchor_base, feat_stride, img_size, scale=1.0):
    n, _, hh, ww = x_nchw.shape
    n_anchor = anchor_base.shape[0]

    anchor = enumerate_shifted_anchor(anchor_base, feat_stride, hh, ww)

    x_nhwc = jnp.transpose(x_nchw, (0, 2, 3, 1))  # NCHW -> NHWC (channels -> lanes)
    loc_nhwc, score_nhwc = rpn_head_pallas(
        x_nhwc, params["w1"], params["b1"],
        params["wl"], params["bl"], params["ws"], params["bs"])

    # torch's permute(0,2,3,1) == NHWC here already.
    rpn_locs = loc_nhwc.reshape(n, -1, 4)                       # (N, H*W*A, 4)
    rpn_scores = score_nhwc.reshape(n, -1, 2)                   # (N, H*W*A, 2)
    # Foreground probability = softmax over the two class logits, channel 1
    # (matches F.softmax(rpn_scores.view(n,hh,ww,A,2), dim=4)[..., 1]).
    fg = jax.nn.softmax(score_nhwc.reshape(n, hh, ww, n_anchor, 2), axis=-1)[..., 1]
    rpn_fg_scores = fg.reshape(n, -1)

    # TODO(synk): ProposalCreator (bbox decode + clip + NMS; data-dependent output
    # sizes, host numpy in the reference) has no clean Pallas equivalent; rois /
    # roi_indices are not produced here.
    rois = None
    roi_indices = None
    return rpn_locs, rpn_scores, rpn_fg_scores, rois, roi_indices, anchor


# ----------------------------------------------------------------------------
# Pure-JAX reference with the same bf16-operand / f32-accumulate policy.
# ----------------------------------------------------------------------------
def ref_head(x_nhwc, w1, b1, wl, bl, ws, bs):
    xb = x_nhwc.astype(jnp.bfloat16)
    w1b = w1.astype(jnp.bfloat16)
    h = jax.lax.conv_general_dilated(
        xb, w1b, window_strides=(1, 1), padding="SAME",
        dimension_numbers=("NHWC", "HWIO", "NHWC"),
        preferred_element_type=jnp.float32)
    h = jnp.maximum(h + b1.reshape(1, 1, 1, -1), 0.0).astype(jnp.bfloat16)
    loc = jnp.einsum("nhwc,co->nhwo", h, wl.astype(jnp.bfloat16),
                     preferred_element_type=jnp.float32) + bl.reshape(1, 1, 1, -1)
    score = jnp.einsum("nhwc,co->nhwo", h, ws.astype(jnp.bfloat16),
                       preferred_element_type=jnp.float32) + bs.reshape(1, 1, 1, -1)
    return loc, score


if __name__ == "__main__":
    # Small shapes consistent with the module's forward.
    N, C_IN, C_MID, H, W = 2, 16, 32, 16, 16
    RATIOS = (0.5, 1, 2)
    SCALES = (8, 16, 32)
    FEAT_STRIDE = 16
    anchor_base = generate_anchor_base(ratios=RATIOS, anchor_scales=SCALES)
    A = anchor_base.shape[0]  # 9

    key = jax.random.PRNGKey(0)
    kx, k1, k2, k3 = jax.random.split(key, 4)

    x = jax.random.normal(kx, (N, C_IN, H, W), dtype=jnp.float32)  # NCHW input

    # normal_init(mean=0, std=0.01), zero biases (deterministic from PRNGKey(0)).
    params = dict(
        w1=0.01 * jax.random.normal(k1, (3, 3, C_IN, C_MID), dtype=jnp.float32),
        b1=jnp.zeros((1, C_MID), jnp.float32),
        wl=0.01 * jax.random.normal(k2, (C_MID, A * 4), dtype=jnp.float32),
        bl=jnp.zeros((1, A * 4), jnp.float32),
        ws=0.01 * jax.random.normal(k3, (C_MID, A * 2), dtype=jnp.float32),
        bs=jnp.zeros((1, A * 2), jnp.float32),
    )

    img_size = (H * FEAT_STRIDE, W * FEAT_STRIDE)
    rpn_locs, rpn_scores, rpn_fg_scores, rois, roi_indices, anchor = rpn_forward(
        x, params, anchor_base, FEAT_STRIDE, img_size, scale=1.0)
    jax.block_until_ready((rpn_locs, rpn_scores, rpn_fg_scores))

    # Shape checks against the PyTorch contract.
    assert rpn_locs.shape == (N, H * W * A, 4)
    assert rpn_scores.shape == (N, H * W * A, 2)
    assert rpn_fg_scores.shape == (N, H * W * A)
    assert anchor.shape == (H * W * A, 4)

    # Numerical check of the Pallas head vs. a pure-JAX reference with the same
    # bf16-operand / f32-accumulation policy (kernel emits a bf16 slab, hence the
    # small extra atol for the final-output quantization).
    x_nhwc = jnp.transpose(x, (0, 2, 3, 1))
    loc_ref, score_ref = ref_head(x_nhwc, params["w1"], params["b1"],
                                  params["wl"], params["bl"],
                                  params["ws"], params["bs"])
    np.testing.assert_allclose(np.asarray(rpn_locs),
                               np.asarray(loc_ref.reshape(N, -1, 4)),
                               rtol=5e-3, atol=3e-5)
    np.testing.assert_allclose(np.asarray(rpn_scores),
                               np.asarray(score_ref.reshape(N, -1, 2)),
                               rtol=5e-3, atol=3e-5)
    fg_ref = jax.nn.softmax(score_ref.reshape(N, H, W, A, 2), axis=-1)[..., 1]
    np.testing.assert_allclose(np.asarray(rpn_fg_scores),
                               np.asarray(fg_ref.reshape(N, -1)),
                               rtol=5e-3, atol=3e-5)

    print("KERNEL_OK")
</pallas_src>

<mosaic_0001>
module attributes {stable_mosaic.version = 11 : i64} {
  func.func @kernel(%arg0: i32, %arg1: i32, %arg2: memref<1x8x16x16xbf16, #tpu.memory_space<vmem>>, %arg3: memref<1x1x16x16xbf16, #tpu.memory_space<vmem>>, %arg4: memref<1x1x16x16xbf16, #tpu.memory_space<vmem>>, %arg5: memref<144x128xbf16, #tpu.memory_space<vmem>>, %arg6: memref<1x128xf32, #tpu.memory_space<vmem>>, %arg7: memref<128x128xbf16, #tpu.memory_space<vmem>>, %arg8: memref<1x128xf32, #tpu.memory_space<vmem>>, %arg9: memref<1x128x128xbf16, #tpu.memory_space<vmem>>, %arg10: memref<176x16xbf16, #tpu.memory_space<vmem>>) attributes {dimension_semantics = [#tpu.dimension_semantics<parallel>, #tpu.dimension_semantics<parallel>], iteration_bounds = array<i64: 2, 2>, scalar_prefetch = 0 : i64, scratch_operands = 1 : i64, tpu.core_type = #tpu.core_type<tc>, window_params = [{transform_indices = @transform_0, window_bounds = array<i64: 1, 8, 16, 16>}, {transform_indices = @transform_1, window_bounds = array<i64: 1, 1, 16, 16>}, {transform_indices = @transform_2, window_bounds = array<i64: 1, 1, 16, 16>}, {pipeline_mode = #tpu.pipeline_mode<synchronous>, transform_indices = @transform_3, window_bounds = array<i64: 144, 128>}, {pipeline_mode = #tpu.pipeline_mode<synchronous>, transform_indices = @transform_4, window_bounds = array<i64: 1, 128>}, {pipeline_mode = #tpu.pipeline_mode<synchronous>, transform_indices = @transform_5, window_bounds = array<i64: 128, 128>}, {pipeline_mode = #tpu.pipeline_mode<synchronous>, transform_indices = @transform_6, window_bounds = array<i64: 1, 128>}, {transform_indices = @transform_7, window_bounds = array<i64: 1, 128, 128>}]} {
    %cst = arith.constant 0.000000e+00 : bf16
    %0 = vector.broadcast %cst : bf16 to vector<8x16xbf16>
    %c0 = arith.constant 0 : index
    %c0_0 = arith.constant 0 : index
    %1 = vector.load %arg10[%c0, %c0_0] : memref<176x16xbf16, #tpu.memory_space<vmem>>, vector<8x16xbf16>
    tpu.vector_store %arg10[%c0, %c0_0], %0 {strides = array<i32>} : memref<176x16xbf16, #tpu.memory_space<vmem>>, vector<8x16xbf16>,
    %c168 = arith.constant 168 : index
    %c0_1 = arith.constant 0 : index
    %2 = vector.load %arg10[%c168, %c0_1] : memref<176x16xbf16, #tpu.memory_space<vmem>>, vector<8x16xbf16>
    tpu.vector_store %arg10[%c168, %c0_1], %0 {strides = array<i32>} : memref<176x16xbf16, #tpu.memory_space<vmem>>, vector<8x16xbf16>,
    %c0_2 = arith.constant 0 : index
    %c0_3 = arith.constant 0 : index
    %c0_4 = arith.constant 0 : index
    %c0_5 = arith.constant 0 : index
    %3 = vector.load %arg3[%c0_2, %c0_3, %c0_4, %c0_5] : memref<1x1x16x16xbf16, #tpu.memory_space<vmem>>, vector<1x1x16x16xbf16>
    %4 = vector.shape_cast %3 : vector<1x1x16x16xbf16> to vector<16x16xbf16>
    %c8 = arith.constant 8 : index
    %c0_6 = arith.constant 0 : index
    %5 = vector.load %arg10[%c8, %c0_6] : memref<176x16xbf16, #tpu.memory_space<vmem>>, vector<16x16xbf16>
    tpu.vector_store %arg10[%c8, %c0_6], %4 {strides = array<i32>} : memref<176x16xbf16, #tpu.memory_space<vmem>>, vector<16x16xbf16>,
    %c0_7 = arith.constant 0 : index
    %c0_8 = arith.constant 0 : index
    %c0_9 = arith.constant 0 : index
    %c0_10 = arith.constant 0 : index
    %6 = vector.load %arg2[%c0_7, %c0_8, %c0_9, %c0_10] : memref<1x8x16x16xbf16, #tpu.memory_space<vmem>>, vector<1x8x16x16xbf16>
    %7 = vector.shape_cast %6 : vector<1x8x16x16xbf16> to vector<8x16x16xbf16>
    %8 = vector.shape_cast %7 : vector<8x16x16xbf16> to vector<128x16xbf16>
    %c24 = arith.constant 24 : index
    %c0_11 = arith.constant 0 : index
    %9 = vector.load %arg10[%c24, %c0_11] : memref<176x16xbf16, #tpu.memory_space<vmem>>, vector<128x16xbf16>
    tpu.vector_store %arg10[%c24, %c0_11], %8 {strides = array<i32>} : memref<176x16xbf16, #tpu.memory_space<vmem>>, vector<128x16xbf16>,
    %c0_12 = arith.constant 0 : index
    %c0_13 = arith.constant 0 : index
    %c0_14 = arith.constant 0 : index
    %c0_15 = arith.constant 0 : index
    %10 = vector.load %arg4[%c0_12, %c0_13, %c0_14, %c0_15] : memref<1x1x16x16xbf16, #tpu.memory_space<vmem>>, vector<1x1x16x16xbf16>
    %11 = vector.shape_cast %10 : vector<1x1x16x16xbf16> to vector<16x16xbf16>
    %c152 = arith.constant 152 : index
    %c0_16 = arith.constant 0 : index
    %12 = vector.load %arg10[%c152, %c0_16] : memref<176x16xbf16, #tpu.memory_space<vmem>>, vector<16x16xbf16>
    tpu.vector_store %arg10[%c152, %c0_16], %11 {strides = array<i32>} : memref<176x16xbf16, #tpu.memory_space<vmem>>, vector<16x16xbf16>,
    %13 = tpu.iota {dimensions = array<i32: 0>} : vector<128x1xi32>
    %c16_i32 = arith.constant 16 : i32
    %c0_i32 = arith.constant 0 : i32
    %14 = arith.cmpi eq, %c16_i32, %c0_i32 : i32
    %c1_i32 = arith.constant 1 : i32
    %15 = arith.select %14, %c1_i32, %c16_i32 : i32
    %16 = vector.broadcast %15 : i32 to vector<128x1xi32>
    %17 = arith.remsi %13, %16 : vector<128x1xi32>
    %c0_i32_17 = arith.constant 0 : i32
    %18 = vector.broadcast %c0_i32_17 : i32 to vector<128x1xi32>
    %19 = arith.cmpi ne, %17, %18 : vector<128x1xi32>
    %c0_i32_18 = arith.constant 0 : i32
    %20 = vector.broadcast %c0_i32_18 : i32 to vector<128x1xi32>
    %21 = arith.cmpi slt, %17, %20 : vector<128x1xi32>
    %c0_i32_19 = arith.constant 0 : i32
    %22 = arith.cmpi slt, %15, %c0_i32_19 : i32
    %23 = vector.broadcast %22 : i1 to vector<128x1xi1>
    %24 = vector.broadcast %23 : vector<128x1xi1> to vector<128x1xi1>
    %25 = arith.xori %21, %24 : vector<128x1xi1>
    %26 = arith.andi %25, %19 : vector<128x1xi1>
    %27 = vector.broadcast %15 : i32 to vector<128x1xi32>
    %28 = arith.addi %17, %27 : vector<128x1xi32>
    %29 = arith.select %26, %28, %17 : vector<128x1xi1>, vector<128x1xi32>
    %c1_i32_20 = arith.constant 1 : i32
    %30 = vector.broadcast %c1_i32_20 : i32 to vector<128x1xi32>
    %31 = arith.cmpi sge, %29, %30 : vector<128x1xi32>
    %c14_i32 = arith.constant 14 : i32
    %32 = vector.broadcast %c14_i32 : i32 to vector<128x1xi32>
    %33 = arith.cmpi sle, %29, %32 : vector<128x1xi32>
    %c7 = arith.constant 7 : index
    %c0_21 = arith.constant 0 : index
    %34 = vector.load %arg10[%c7, %c0_21] : memref<176x16xbf16, #tpu.memory_space<vmem>>, vector<128x16xbf16>
    %cst_22 = arith.constant 0.000000e+00 : bf16
    %35 = vector.shape_cast %31 : vector<128x1xi1> to vector<128x1xi1>
    %36 = vector.broadcast %35 : vector<128x1xi1> to vector<128x16xi1>
    %37 = vector.broadcast %cst_22 : bf16 to vector<128x16xbf16>
    %38 = arith.select %36, %34, %37 : vector<128x16xi1>, vector<128x16xbf16>
    %c0_23 = arith.constant 0 : index
    %c0_24 = arith.constant 0 : index
    %39 = vector.load %arg5[%c0_23, %c0_24] : memref<144x128xbf16, #tpu.memory_space<vmem>>, vector<16x128xbf16>
    %cst_25 = arith.constant dense<0.000000e+00> : vector<128x128xf32>
    %40 = tpu.matmul %38, %39, %cst_25 {dimension_numbers = #tpu.dot_dimension_numbers<[1], [0], [0], [1], [0, 0, 1, 1], [], []>} : vector<128x16xbf16>, vector<16x128xbf16>, vector<128x128xf32> -> vector<128x128xf32>
    %c8_26 = arith.constant 8 : index
    %c0_27 = arith.constant 0 : index
    %41 = vector.load %arg10[%c8_26, %c0_27] : memref<176x16xbf16, #tpu.memory_space<vmem>>, vector<128x16xbf16>
    %c16 = arith.constant 16 : index
    %c0_28 = arith.constant 0 : index
    %42 = vector.load %arg5[%c16, %c0_28] : memref<144x128xbf16, #tpu.memory_space<vmem>>, vector<16x128xbf16>
    %cst_29 = arith.constant dense<0.000000e+00> : vector<128x128xf32>
    %43 = tpu.matmul %41, %42, %cst_29 {dimension_numbers = #tpu.dot_dimension_numbers<[1], [0], [0], [1], [0, 0, 1, 1], [], []>} : vector<128x16xbf16>, vector<16x128xbf16>, vector<128x128xf32> -> vector<128x128xf32>
    %44 = arith.addf %40, %43 : vector<128x128xf32>
    %c9 = arith.constant 9 : index
    %c0_30 = arith.constant 0 : index
    %45 = vector.load %arg10[%c9, %c0_30] : memref<176x16xbf16, #tpu.memory_space<vmem>>, vector<128x16xbf16>
    %cst_31 = arith.constant 0.000000e+00 : bf16
    %46 = vector.shape_cast %33 : vector<128x1xi1> to vector<128x1xi1>
    %47 = vector.broadcast %46 : vector<128x1xi1> to vector<128x16xi1>
    %48 = vector.broadcast %cst_31 : bf16 to vector<128x16xbf16>
    %49 = arith.select %47, %45, %48 : vector<128x16xi1>, vector<128x16xbf16>
    %c32 = arith.constant 32 : index
    %c0_32 = arith.constant 0 : index
    %50 = vector.load %arg5[%c32, %c0_32] : memref<144x128xbf16, #tpu.memory_space<vmem>>, vector<16x128xbf16>
    %cst_33 = arith.constant dense<0.000000e+00> : vector<128x128xf32>
    %51 = tpu.matmul %49, %50, %cst_33 {dimension_numbers = #tpu.dot_dimension_numbers<[1], [0], [0], [1], [0, 0, 1, 1], [], []>} : vector<128x16xbf16>, vector<16x128xbf16>, vector<128x128xf32> -> vector<128x128xf32>
    %52 = arith.addf %44, %51 : vector<128x128xf32>
    %c23 = arith.constant 23 : index
    %c0_34 = arith.constant 0 : index
    %53 = vector.load %arg10[%c23, %c0_34] : memref<176x16xbf16, #tpu.memory_space<vmem>>, vector<128x16xbf16>
    %cst_35 = arith.constant 0.000000e+00 : bf16
    %54 = vector.shape_cast %31 : vector<128x1xi1> to vector<128x1xi1>
    %55 = vector.broadcast %54 : vector<128x1xi1> to vector<128x16xi1>
    %56 = vector.broadcast %cst_35 : bf16 to vector<128x16xbf16>
    %57 = arith.select %55, %53, %56 : vector<128x16xi1>, vector<128x16xbf16>
    %c48 = arith.constant 48 : index
    %c0_36 = arith.constant 0 : index
    %58 = vector.load %arg5[%c48, %c0_36] : memref<144x128xbf16, #tpu.memory_space<vmem>>, vector<16x128xbf16>
    %cst_37 = arith.constant dense<0.000000e+00> : vector<128x128xf32>
    %59 = tpu.matmul %57, %58, %cst_37 {dimension_numbers = #tpu.dot_dimension_numbers<[1], [0], [0], [1], [0, 0, 1, 1], [], []>} : vector<128x16xbf16>, vector<16x128xbf16>, vector<128x128xf32> -> vector<128x128xf32>
    %60 = arith.addf %52, %59 : vector<128x128xf32>
    %c24_38 = arith.constant 24 : index
    %c0_39 = arith.constant 0 : index
    %61 = vector.load %arg10[%c24_38, %c0_39] : memref<176x16xbf16, #tpu.memory_space<vmem>>, vector<128x16xbf16>
    %c64 = arith.constant 64 : index
    %c0_40 = arith.constant 0 : index
    %62 = vector.load %arg5[%c64, %c0_40] : memref<144x128xbf16, #tpu.memory_space<vmem>>, vector<16x128xbf16>
    %cst_41 = arith.constant dense<0.000000e+00> : vector<128x128xf32>
    %63 = tpu.matmul %61, %62, %cst_41 {dimension_numbers = #tpu.dot_dimension_numbers<[1], [0], [0], [1], [0, 0, 1, 1], [], []>} : vector<128x16xbf16>, vector<16x128xbf16>, vector<128x128xf32> -> vector<128x128xf32>
    %64 = arith.addf %60, %63 : vector<128x128xf32>
    %c25 = arith.constant 25 : index
    %c0_42 = arith.constant 0 : index
    %65 = vector.load %arg10[%c25, %c0_42] : memref<176x16xbf16, #tpu.memory_space<vmem>>, vector<128x16xbf16>
    %cst_43 = arith.constant 0.000000e+00 : bf16
    %66 = vector.shape_cast %33 : vector<128x1xi1> to vector<128x1xi1>
    %67 = vector.broadcast %66 : vector<128x1xi1> to vector<128x16xi1>
    %68 = vector.broadcast %cst_43 : bf16 to vector<128x16xbf16>
    %69 = arith.select %67, %65, %68 : vector<128x16xi1>, vector<128x16xbf16>
    %c80 = arith.constant 80 : index
    %c0_44 = arith.constant 0 : index
    %70 = vector.load %arg5[%c80, %c0_44] : memref<144x128xbf16, #tpu.memory_space<vmem>>, vector<16x128xbf16>
    %cst_45 = arith.constant dense<0.000000e+00> : vector<128x128xf32>
    %71 = tpu.matmul %69, %70, %cst_45 {dimension_numbers = #tpu.dot_dimension_numbers<[1], [0], [0], [1], [0, 0, 1, 1], [], []>} : vector<128x16xbf16>, vector<16x128xbf16>, vector<128x128xf32> -> vector<128x128xf32>
    %72 = arith.addf %64, %71 : vector<128x128xf32>
    %c39 = arith.constant 39 : index
    %c0_46 = arith.constant 0 : index
    %73 = vector.load %arg10[%c39, %c0_46] : memref<176x16xbf16, #tpu.memory_space<vmem>>, vector<128x16xbf16>
    %cst_47 = arith.constant 0.000000e+00 : bf16
    %74 = vector.shape_cast %31 : vector<128x1xi1> to vector<128x1xi1>
    %75 = vector.broadcast %74 : vector<128x1xi1> to vector<128x16xi1>
    %76 = vector.broadcast %cst_47 : bf16 to vector<128x16xbf16>
    %77 = arith.select %75, %73, %76 : vector<128x16xi1>, vector<128x16xbf16>
    %c96 = arith.constant 96 : index
    %c0_48 = arith.constant 0 : index
    %78 = vector.load %arg5[%c96, %c0_48] : memref<144x128xbf16, #tpu.memory_space<vmem>>, vector<16x128xbf16>
    %cst_49 = arith.constant dense<0.000000e+00> : vector<128x128xf32>
    %79 = tpu.matmul %77, %78, %cst_49 {dimension_numbers = #tpu.dot_dimension_numbers<[1], [0], [0], [1], [0, 0, 1, 1], [], []>} : vector<128x16xbf16>, vector<16x128xbf16>, vector<128x128xf32> -> vector<128x128xf32>
    %80 = arith.addf %72, %79 : vector<128x128xf32>
    %c40 = arith.constant 40 : index
    %c0_50 = arith.constant 0 : index
    %81 = vector.load %arg10[%c40, %c0_50] : memref<176x16xbf16, #tpu.memory_space<vmem>>, vector<128x16xbf16>
    %c112 = arith.constant 112 : index
    %c0_51 = arith.constant 0 : index
    %82 = vector.load %arg5[%c112, %c0_51] : memref<144x128xbf16, #tpu.memory_space<vmem>>, vector<16x128xbf16>
    %cst_52 = arith.constant dense<0.000000e+00> : vector<128x128xf32>
    %83 = tpu.matmul %81, %82, %cst_52 {dimension_numbers = #tpu.dot_dimension_numbers<[1], [0], [0], [1], [0, 0, 1, 1], [], []>} : vector<128x16xbf16>, vector<16x128xbf16>, vector<128x128xf32> -> vector<128x128xf32>
    %84 = arith.addf %80, %83 : vector<128x128xf32>
    %c41 = arith.constant 41 : index
    %c0_53 = arith.constant 0 : index
    %85 = vector.load %arg10[%c41, %c0_53] : memref<176x16xbf16, #tpu.memory_space<vmem>>, vector<128x16xbf16>
    %cst_54 = arith.constant 0.000000e+00 : bf16
    %86 = vector.shape_cast %33 : vector<128x1xi1> to vector<128x1xi1>
    %87 = vector.broadcast %86 : vector<128x1xi1> to vector<128x16xi1>
    %88 = vector.broadcast %cst_54 : bf16 to vector<128x16xbf16>
    %89 = arith.select %87, %85, %88 : vector<128x16xi1>, vector<128x16xbf16>
    %c128 = arith.constant 128 : index
    %c0_55 = arith.constant 0 : index
    %90 = vector.load %arg5[%c128, %c0_55] : memref<144x128xbf16, #tpu.memory_space<vmem>>, vector<16x128xbf16>
    %cst_56 = arith.constant dense<0.000000e+00> : vector<128x128xf32>
    %91 = tpu.matmul %89, %90, %cst_56 {dimension_numbers = #tpu.dot_dimension_numbers<[1], [0], [0], [1], [0, 0, 1, 1], [], []>} : vector<128x16xbf16>, vector<16x128xbf16>, vector<128x128xf32> -> vector<128x128xf32>
    %92 = arith.addf %84, %91 : vector<128x128xf32>
    %c0_57 = arith.constant 0 : index
    %c0_58 = arith.constant 0 : index
    %93 = vector.load %arg6[%c0_57, %c0_58] : memref<1x128xf32, #tpu.memory_space<vmem>>, vector<1x128xf32>
    %94 = vector.broadcast %93 : vector<1x128xf32> to vector<128x128xf32>
    %95 = arith.addf %92, %94 : vector<128x128xf32>
    %cst_59 = arith.constant 0.000000e+00 : f32
    %96 = vector.broadcast %cst_59 : f32 to vector<128x128xf32>
    %97 = arith.maximumf %95, %96 : vector<128x128xf32>
    %98 = arith.truncf %97 : vector<128x128xf32> to vector<128x128xbf16>
    %c0_60 = arith.constant 0 : index
    %c0_61 = arith.constant 0 : index
    %99 = vector.load %arg7[%c0_60, %c0_61] : memref<128x128xbf16, #tpu.memory_space<vmem>>, vector<128x128xbf16>
    %cst_62 = arith.constant dense<0.000000e+00> : vector<128x128xf32>
    %100 = tpu.matmul %98, %99, %cst_62 {dimension_numbers = #tpu.dot_dimension_numbers<[1], [0], [0], [1], [0, 0, 1, 1], [], []>} : vector<128x128xbf16>, vector<128x128xbf16>, vector<128x128xf32> -> vector<128x128xf32>
    %c0_63 = arith.constant 0 : index
    %c0_64 = arith.constant 0 : index
    %101 = vector.load %arg8[%c0_63, %c0_64] : memref<1x128xf32, #tpu.memory_space<vmem>>, vector<1x128xf32>
    %102 = vector.broadcast %101 : vector<1x128xf32> to vector<128x128xf32>
    %103 = arith.addf %100, %102 : vector<128x128xf32>
    %104 = arith.truncf %103 : vector<128x128xf32> to vector<128x128xbf16>
    %c0_65 = arith.constant 0 : index
    %c0_66 = arith.constant 0 : index
    %c0_67 = arith.constant 0 : index
    %105 = vector.load %arg9[%c0_65, %c0_66, %c0_67] : memref<1x128x128xbf16, #tpu.memory_space<vmem>>, vector<1x128x128xbf16>
    %106 = vector.shape_cast %105 : vector<1x128x128xbf16> to vector<128x128xbf16>
    %107 = vector.shape_cast %104 : vector<128x128xbf16> to vector<1x128x128xbf16>
    tpu.vector_store %arg9[%c0_65, %c0_66, %c0_67], %107 {strides = array<i32>} : memref<1x128x128xbf16, #tpu.memory_space<vmem>>, vector<1x128x128xbf16>,
    return
  }
  func.func @transform_0(%arg0: i32, %arg1: i32) -> (i32, i32, i32, i32) {
    %c0_i32 = arith.constant 0 : i32
    %c0_i32_0 = arith.constant 0 : i32
    %c0_i32_1 = arith.constant 0 : i32
    return %arg0, %arg1, %c0_i32, %c0_i32_0 : i32, i32, i32, i32
  }
  func.func @transform_1(%arg0: i32, %arg1: i32) -> (i32, i32, i32, i32) {
    %c0_i32 = arith.constant 0 : i32
    %c0_i32_0 = arith.constant 0 : i32
    %c0_i32_1 = arith.constant 0 : i32
    return %arg0, %arg1, %c0_i32, %c0_i32_0 : i32, i32, i32, i32
  }
  func.func @transform_2(%arg0: i32, %arg1: i32) -> (i32, i32, i32, i32) {
    %c0_i32 = arith.constant 0 : i32
    %c0_i32_0 = arith.constant 0 : i32
    %c0_i32_1 = arith.constant 0 : i32
    return %arg0, %arg1, %c0_i32, %c0_i32_0 : i32, i32, i32, i32
  }
  func.func @transform_3(%arg0: i32, %arg1: i32) -> (i32, i32) {
    %c0_i32 = arith.constant 0 : i32
    %c0_i32_0 = arith.constant 0 : i32
    %c0_i32_1 = arith.constant 0 : i32
    return %c0_i32, %c0_i32_0 : i32, i32
  }
  func.func @transform_4(%arg0: i32, %arg1: i32) -> (i32, i32) {
    %c0_i32 = arith.constant 0 : i32
    %c0_i32_0 = arith.constant 0 : i32
    %c0_i32_1 = arith.constant 0 : i32
    return %c0_i32, %c0_i32_0 : i32, i32
  }
  func.func @transform_5(%arg0: i32, %arg1: i32) -> (i32, i32) {
    %c0_i32 = arith.constant 0 : i32
    %c0_i32_0 = arith.constant 0 : i32
    %c0_i32_1 = arith.constant 0 : i32
    return %c0_i32, %c0_i32_0 : i32, i32
  }
  func.func @transform_6(%arg0: i32, %arg1: i32) -> (i32, i32) {
    %c0_i32 = arith.constant 0 : i32
    %c0_i32_0 = arith.constant 0 : i32
    %c0_i32_1 = arith.constant 0 : i32
    return %c0_i32, %c0_i32_0 : i32, i32
  }
  func.func @transform_7(%arg0: i32, %arg1: i32) -> (i32, i32, i32) {
    %c0_i32 = arith.constant 0 : i32
    %c0_i32_0 = arith.constant 0 : i32
    return %arg0, %arg1, %c0_i32 : i32, i32, i32
  }
}

module attributes {stable_mosaic.version = 11 : i64} {
  func.func @kernel(%arg0: i32, %arg1: i32, %arg2: memref<1x8x16x16xbf16, #tpu.memory_space<vmem>>, %arg3: memref<1x1x16x16xbf16, #tpu.memory_space<vmem>>, %arg4: memref<1x1x16x16xbf16, #tpu.memory_space<vmem>>, %arg5: memref<144x128xbf16, #tpu.memory_space<vmem>>, %arg6: memref<1x128xf32, #tpu.memory_space<vmem>>, %arg7: memref<128x128xbf16, #tpu.memory_space<vmem>>, %arg8: memref<1x128xf32, #tpu.memory_space<vmem>>, %arg9: memref<1x128x128xbf16, #tpu.memory_space<vmem>>, %arg10: memref<176x16xbf16, #tpu.memory_space<vmem>>) attributes {dimension_semantics = [#tpu.dimension_semantics<parallel>, #tpu.dimension_semantics<parallel>], iteration_bounds = array<i64: 2, 2>, scalar_prefetch = 0 : i64, scratch_operands = 1 : i64, tpu.core_type = #tpu.core_type<tc>, window_params = [{transform_indices = @transform_0, window_bounds = array<i64: 1, 8, 16, 16>}, {transform_indices = @transform_1, window_bounds = array<i64: 1, 1, 16, 16>}, {transform_indices = @transform_2, window_bounds = array<i64: 1, 1, 16, 16>}, {pipeline_mode = #tpu.pipeline_mode<synchronous>, transform_indices = @transform_3, window_bounds = array<i64: 144, 128>}, {pipeline_mode = #tpu.pipeline_mode<synchronous>, transform_indices = @transform_4, window_bounds = array<i64: 1, 128>}, {pipeline_mode = #tpu.pipeline_mode<synchronous>, transform_indices = @transform_5, window_bounds = array<i64: 128, 128>}, {pipeline_mode = #tpu.pipeline_mode<synchronous>, transform_indices = @transform_6, window_bounds = array<i64: 1, 128>}, {transform_indices = @transform_7, window_bounds = array<i64: 1, 128, 128>}]} {
    %cst = arith.constant 0.000000e+00 : bf16
    %0 = vector.broadcast %cst : bf16 to vector<8x16xbf16>
    %c0 = arith.constant 0 : index
    %c0_0 = arith.constant 0 : index
    %1 = vector.load %arg10[%c0, %c0_0] : memref<176x16xbf16, #tpu.memory_space<vmem>>, vector<8x16xbf16>
    tpu.vector_store %arg10[%c0, %c0_0], %0 {strides = array<i32>} : memref<176x16xbf16, #tpu.memory_space<vmem>>, vector<8x16xbf16>,
    %c168 = arith.constant 168 : index
    %c0_1 = arith.constant 0 : index
    %2 = vector.load %arg10[%c168, %c0_1] : memref<176x16xbf16, #tpu.memory_space<vmem>>, vector<8x16xbf16>
    tpu.vector_store %arg10[%c168, %c0_1], %0 {strides = array<i32>} : memref<176x16xbf16, #tpu.memory_space<vmem>>, vector<8x16xbf16>,
    %c0_2 = arith.constant 0 : index
    %c0_3 = arith.constant 0 : index
    %c0_4 = arith.constant 0 : index
    %c0_5 = arith.constant 0 : index
    %3 = vector.load %arg3[%c0_2, %c0_3, %c0_4, %c0_5] : memref<1x1x16x16xbf16, #tpu.memory_space<vmem>>, vector<1x1x16x16xbf16>
    %4 = vector.shape_cast %3 : vector<1x1x16x16xbf16> to vector<16x16xbf16>
    %c8 = arith.constant 8 : index
    %c0_6 = arith.constant 0 : index
    %5 = vector.load %arg10[%c8, %c0_6] : memref<176x16xbf16, #tpu.memory_space<vmem>>, vector<16x16xbf16>
    tpu.vector_store %arg10[%c8, %c0_6], %4 {strides = array<i32>} : memref<176x16xbf16, #tpu.memory_space<vmem>>, vector<16x16xbf16>,
    %c0_7 = arith.constant 0 : index
    %c0_8 = arith.constant 0 : index
    %c0_9 = arith.constant 0 : index
    %c0_10 = arith.constant 0 : index
    %6 = vector.load %arg2[%c0_7, %c0_8, %c0_9, %c0_10] : memref<1x8x16x16xbf16, #tpu.memory_space<vmem>>, vector<1x8x16x16xbf16>
    %7 = vector.shape_cast %6 : vector<1x8x16x16xbf16> to vector<8x16x16xbf16>
    %8 = vector.shape_cast %7 : vector<8x16x16xbf16> to vector<128x16xbf16>
    %c24 = arith.constant 24 : index
    %c0_11 = arith.constant 0 : index
    %9 = vector.load %arg10[%c24, %c0_11] : memref<176x16xbf16, #tpu.memory_space<vmem>>, vector<128x16xbf16>
    tpu.vector_store %arg10[%c24, %c0_11], %8 {strides = array<i32>} : memref<176x16xbf16, #tpu.memory_space<vmem>>, vector<128x16xbf16>,
    %c0_12 = arith.constant 0 : index
    %c0_13 = arith.constant 0 : index
    %c0_14 = arith.constant 0 : index
    %c0_15 = arith.constant 0 : index
    %10 = vector.load %arg4[%c0_12, %c0_13, %c0_14, %c0_15] : memref<1x1x16x16xbf16, #tpu.memory_space<vmem>>, vector<1x1x16x16xbf16>
    %11 = vector.shape_cast %10 : vector<1x1x16x16xbf16> to vector<16x16xbf16>
    %c152 = arith.constant 152 : index
    %c0_16 = arith.constant 0 : index
    %12 = vector.load %arg10[%c152, %c0_16] : memref<176x16xbf16, #tpu.memory_space<vmem>>, vector<16x16xbf16>
    tpu.vector_store %arg10[%c152, %c0_16], %11 {strides = array<i32>} : memref<176x16xbf16, #tpu.memory_space<vmem>>, vector<16x16xbf16>,
    %13 = tpu.iota {dimensions = array<i32: 0>} : vector<128x1xi32>
    %c16_i32 = arith.constant 16 : i32
    %c0_i32 = arith.constant 0 : i32
    %14 = arith.cmpi eq, %c16_i32, %c0_i32 : i32
    %c1_i32 = arith.constant 1 : i32
    %15 = arith.select %14, %c1_i32, %c16_i32 : i32
    %16 = vector.broadcast %15 : i32 to vector<128x1xi32>
    %17 = arith.remsi %13, %16 : vector<128x1xi32>
    %c0_i32_17 = arith.constant 0 : i32
    %18 = vector.broadcast %c0_i32_17 : i32 to vector<128x1xi32>
    %19 = arith.cmpi ne, %17, %18 : vector<128x1xi32>
    %c0_i32_18 = arith.constant 0 : i32
    %20 = vector.broadcast %c0_i32_18 : i32 to vector<128x1xi32>
    %21 = arith.cmpi slt, %17, %20 : vector<128x1xi32>
    %c0_i32_19 = arith.constant 0 : i32
    %22 = arith.cmpi slt, %15, %c0_i32_19 : i32
    %23 = vector.broadcast %22 : i1 to vector<128x1xi1>
    %24 = vector.broadcast %23 : vector<128x1xi1> to vector<128x1xi1>
    %25 = arith.xori %21, %24 : vector<128x1xi1>
    %26 = arith.andi %25, %19 : vector<128x1xi1>
    %27 = vector.broadcast %15 : i32 to vector<128x1xi32>
    %28 = arith.addi %17, %27 : vector<128x1xi32>
    %29 = arith.select %26, %28, %17 : vector<128x1xi1>, vector<128x1xi32>
    %c1_i32_20 = arith.constant 1 : i32
    %30 = vector.broadcast %c1_i32_20 : i32 to vector<128x1xi32>
    %31 = arith.cmpi sge, %29, %30 : vector<128x1xi32>
    %c14_i32 = arith.constant 14 : i32
    %32 = vector.broadcast %c14_i32 : i32 to vector<128x1xi32>
    %33 = arith.cmpi sle, %29, %32 : vector<128x1xi32>
    %c7 = arith.constant 7 : index
    %c0_21 = arith.constant 0 : index
    %34 = vector.load %arg10[%c7, %c0_21] : memref<176x16xbf16, #tpu.memory_space<vmem>>, vector<128x16xbf16>
    %cst_22 = arith.constant 0.000000e+00 : bf16
    %35 = vector.shape_cast %31 : vector<128x1xi1> to vector<128x1xi1>
    %36 = vector.broadcast %35 : vector<128x1xi1> to vector<128x16xi1>
    %37 = vector.broadcast %cst_22 : bf16 to vector<128x16xbf16>
    %38 = arith.select %36, %34, %37 : vector<128x16xi1>, vector<128x16xbf16>
    %c0_23 = arith.constant 0 : index
    %c0_24 = arith.constant 0 : index
    %39 = vector.load %arg5[%c0_23, %c0_24] : memref<144x128xbf16, #tpu.memory_space<vmem>>, vector<16x128xbf16>
    %cst_25 = arith.constant dense<0.000000e+00> : vector<128x128xf32>
    %40 = tpu.matmul %38, %39, %cst_25 {dimension_numbers = #tpu.dot_dimension_numbers<[1], [0], [0], [1], [0, 0, 1, 1], [], []>} : vector<128x16xbf16>, vector<16x128xbf16>, vector<128x128xf32> -> vector<128x128xf32>
    %c8_26 = arith.constant 8 : index
    %c0_27 = arith.constant 0 : index
    %41 = vector.load %arg10[%c8_26, %c0_27] : memref<176x16xbf16, #tpu.memory_space<vmem>>, vector<128x16xbf16>
    %c16 = arith.constant 16 : index
    %c0_28 = arith.constant 0 : index
    %42 = vector.load %arg5[%c16, %c0_28] : memref<144x128xbf16, #tpu.memory_space<vmem>>, vector<16x128xbf16>
    %cst_29 = arith.constant dense<0.000000e+00> : vector<128x128xf32>
    %43 = tpu.matmul %41, %42, %cst_29 {dimension_numbers = #tpu.dot_dimension_numbers<[1], [0], [0], [1], [0, 0, 1, 1], [], []>} : vector<128x16xbf16>, vector<16x128xbf16>, vector<128x128xf32> -> vector<128x128xf32>
    %44 = arith.addf %40, %43 : vector<128x128xf32>
    %c9 = arith.constant 9 : index
    %c0_30 = arith.constant 0 : index
    %45 = vector.load %arg10[%c9, %c0_30] : memref<176x16xbf16, #tpu.memory_space<vmem>>, vector<128x16xbf16>
    %cst_31 = arith.constant 0.000000e+00 : bf16
    %46 = vector.shape_cast %33 : vector<128x1xi1> to vector<128x1xi1>
    %47 = vector.broadcast %46 : vector<128x1xi1> to vector<128x16xi1>
    %48 = vector.broadcast %cst_31 : bf16 to vector<128x16xbf16>
    %49 = arith.select %47, %45, %48 : vector<128x16xi1>, vector<128x16xbf16>
    %c32 = arith.constant 32 : index
    %c0_32 = arith.constant 0 : index
    %50 = vector.load %arg5[%c32, %c0_32] : memref<144x128xbf16, #tpu.memory_space<vmem>>, vector<16x128xbf16>
    %cst_33 = arith.constant dense<0.000000e+00> : vector<128x128xf32>
    %51 = tpu.matmul %49, %50, %cst_33 {dimension_numbers = #tpu.dot_dimension_numbers<[1], [0], [0], [1], [0, 0, 1, 1], [], []>} : vector<128x16xbf16>, vector<16x128xbf16>, vector<128x128xf32> -> vector<128x128xf32>
    %52 = arith.addf %44, %51 : vector<128x128xf32>
    %c23 = arith.constant 23 : index
    %c0_34 = arith.constant 0 : index
    %53 = vector.load %arg10[%c23, %c0_34] : memref<176x16xbf16, #tpu.memory_space<vmem>>, vector<128x16xbf16>
    %cst_35 = arith.constant 0.000000e+00 : bf16
    %54 = vector.shape_cast %31 : vector<128x1xi1> to vector<128x1xi1>
    %55 = vector.broadcast %54 : vector<128x1xi1> to vector<128x16xi1>
    %56 = vector.broadcast %cst_35 : bf16 to vector<128x16xbf16>
    %57 = arith.select %55, %53, %56 : vector<128x16xi1>, vector<128x16xbf16>
    %c48 = arith.constant 48 : index
    %c0_36 = arith.constant 0 : index
    %58 = vector.load %arg5[%c48, %c0_36] : memref<144x128xbf16, #tpu.memory_space<vmem>>, vector<16x128xbf16>
    %cst_37 = arith.constant dense<0.000000e+00> : vector<128x128xf32>
    %59 = tpu.matmul %57, %58, %cst_37 {dimension_numbers = #tpu.dot_dimension_numbers<[1], [0], [0], [1], [0, 0, 1, 1], [], []>} : vector<128x16xbf16>, vector<16x128xbf16>, vector<128x128xf32> -> vector<128x128xf32>
    %60 = arith.addf %52, %59 : vector<128x128xf32>
    %c24_38 = arith.constant 24 : index
    %c0_39 = arith.constant 0 : index
    %61 = vector.load %arg10[%c24_38, %c0_39] : memref<176x16xbf16, #tpu.memory_space<vmem>>, vector<128x16xbf16>
    %c64 = arith.constant 64 : index
    %c0_40 = arith.constant 0 : index
    %62 = vector.load %arg5[%c64, %c0_40] : memref<144x128xbf16, #tpu.memory_space<vmem>>, vector<16x128xbf16>
    %cst_41 = arith.constant dense<0.000000e+00> : vector<128x128xf32>
    %63 = tpu.matmul %61, %62, %cst_41 {dimension_numbers = #tpu.dot_dimension_numbers<[1], [0], [0], [1], [0, 0, 1, 1], [], []>} : vector<128x16xbf16>, vector<16x128xbf16>, vector<128x128xf32> -> vector<128x128xf32>
    %64 = arith.addf %60, %63 : vector<128x128xf32>
    %c25 = arith.constant 25 : index
    %c0_42 = arith.constant 0 : index
    %65 = vector.load %arg10[%c25, %c0_42] : memref<176x16xbf16, #tpu.memory_space<vmem>>, vector<128x16xbf16>
    %cst_43 = arith.constant 0.000000e+00 : bf16
    %66 = vector.shape_cast %33 : vector<128x1xi1> to vector<128x1xi1>
    %67 = vector.broadcast %66 : vector<128x1xi1> to vector<128x16xi1>
    %68 = vector.broadcast %cst_43 : bf16 to vector<128x16xbf16>
    %69 = arith.select %67, %65, %68 : vector<128x16xi1>, vector<128x16xbf16>
    %c80 = arith.constant 80 : index
    %c0_44 = arith.constant 0 : index
    %70 = vector.load %arg5[%c80, %c0_44] : memref<144x128xbf16, #tpu.memory_space<vmem>>, vector<16x128xbf16>
    %cst_45 = arith.constant dense<0.000000e+00> : vector<128x128xf32>
    %71 = tpu.matmul %69, %70, %cst_45 {dimension_numbers = #tpu.dot_dimension_numbers<[1], [0], [0], [1], [0, 0, 1, 1], [], []>} : vector<128x16xbf16>, vector<16x128xbf16>, vector<128x128xf32> -> vector<128x128xf32>
    %72 = arith.addf %64, %71 : vector<128x128xf32>
    %c39 = arith.constant 39 : index
    %c0_46 = arith.constant 0 : index
    %73 = vector.load %arg10[%c39, %c0_46] : memref<176x16xbf16, #tpu.memory_space<vmem>>, vector<128x16xbf16>
    %cst_47 = arith.constant 0.000000e+00 : bf16
    %74 = vector.shape_cast %31 : vector<128x1xi1> to vector<128x1xi1>
    %75 = vector.broadcast %74 : vector<128x1xi1> to vector<128x16xi1>
    %76 = vector.broadcast %cst_47 : bf16 to vector<128x16xbf16>
    %77 = arith.select %75, %73, %76 : vector<128x16xi1>, vector<128x16xbf16>
    %c96 = arith.constant 96 : index
    %c0_48 = arith.constant 0 : index
    %78 = vector.load %arg5[%c96, %c0_48] : memref<144x128xbf16, #tpu.memory_space<vmem>>, vector<16x128xbf16>
    %cst_49 = arith.constant dense<0.000000e+00> : vector<128x128xf32>
    %79 = tpu.matmul %77, %78, %cst_49 {dimension_numbers = #tpu.dot_dimension_numbers<[1], [0], [0], [1], [0, 0, 1, 1], [], []>} : vector<128x16xbf16>, vector<16x128xbf16>, vector<128x128xf32> -> vector<128x128xf32>
    %80 = arith.addf %72, %79 : vector<128x128xf32>
    %c40 = arith.constant 40 : index
    %c0_50 = arith.constant 0 : index
    %81 = vector.load %arg10[%c40, %c0_50] : memref<176x16xbf16, #tpu.memory_space<vmem>>, vector<128x16xbf16>
    %c112 = arith.constant 112 : index
    %c0_51 = arith.constant 0 : index
    %82 = vector.load %arg5[%c112, %c0_51] : memref<144x128xbf16, #tpu.memory_space<vmem>>, vector<16x128xbf16>
    %cst_52 = arith.constant dense<0.000000e+00> : vector<128x128xf32>
    %83 = tpu.matmul %81, %82, %cst_52 {dimension_numbers = #tpu.dot_dimension_numbers<[1], [0], [0], [1], [0, 0, 1, 1], [], []>} : vector<128x16xbf16>, vector<16x128xbf16>, vector<128x128xf32> -> vector<128x128xf32>
    %84 = arith.addf %80, %83 : vector<128x128xf32>
    %c41 = arith.constant 41 : index
    %c0_53 = arith.constant 0 : index
    %85 = vector.load %arg10[%c41, %c0_53] : memref<176x16xbf16, #tpu.memory_space<vmem>>, vector<128x16xbf16>
    %cst_54 = arith.constant 0.000000e+00 : bf16
    %86 = vector.shape_cast %33 : vector<128x1xi1> to vector<128x1xi1>
    %87 = vector.broadcast %86 : vector<128x1xi1> to vector<128x16xi1>
    %88 = vector.broadcast %cst_54 : bf16 to vector<128x16xbf16>
    %89 = arith.select %87, %85, %88 : vector<128x16xi1>, vector<128x16xbf16>
    %c128 = arith.constant 128 : index
    %c0_55 = arith.constant 0 : index
    %90 = vector.load %arg5[%c128, %c0_55] : memref<144x128xbf16, #tpu.memory_space<vmem>>, vector<16x128xbf16>
    %cst_56 = arith.constant dense<0.000000e+00> : vector<128x128xf32>
    %91 = tpu.matmul %89, %90, %cst_56 {dimension_numbers = #tpu.dot_dimension_numbers<[1], [0], [0], [1], [0, 0, 1, 1], [], []>} : vector<128x16xbf16>, vector<16x128xbf16>, vector<128x128xf32> -> vector<128x128xf32>
    %92 = arith.addf %84, %91 : vector<128x128xf32>
    %c0_57 = arith.constant 0 : index
    %c0_58 = arith.constant 0 : index
    %93 = vector.load %arg6[%c0_57, %c0_58] : memref<1x128xf32, #tpu.memory_space<vmem>>, vector<1x128xf32>
    %94 = vector.broadcast %93 : vector<1x128xf32> to vector<128x128xf32>
    %95 = arith.addf %92, %94 : vector<128x128xf32>
    %cst_59 = arith.constant 0.000000e+00 : f32
    %96 = vector.broadcast %cst_59 : f32 to vector<128x128xf32>
    %97 = arith.maximumf %95, %96 : vector<128x128xf32>
    %98 = arith.truncf %97 : vector<128x128xf32> to vector<128x128xbf16>
    %c0_60 = arith.constant 0 : index
    %c0_61 = arith.constant 0 : index
    %99 = vector.load %arg7[%c0_60, %c0_61] : memref<128x128xbf16, #tpu.memory_space<vmem>>, vector<128x128xbf16>
    %cst_62 = arith.constant dense<0.000000e+00> : vector<128x128xf32>
    %100 = tpu.matmul %98, %99, %cst_62 {dimension_numbers = #tpu.dot_dimension_numbers<[1], [0], [0], [1], [0, 0, 1, 1], [], []>} : vector<128x128xbf16>, vector<128x128xbf16>, vector<128x128xf32> -> vector<128x128xf32>
    %c0_63 = arith.constant 0 : index
    %c0_64 = arith.constant 0 : index
    %101 = vector.load %arg8[%c0_63, %c0_64] : memref<1x128xf32, #tpu.memory_space<vmem>>, vector<1x128xf32>
    %102 = vector.broadcast %101 : vector<1x128xf32> to vector<128x128xf32>
    %103 = arith.addf %100, %102 : vector<128x128xf32>
    %104 = arith.truncf %103 : vector<128x128xf32> to vector<128x128xbf16>
    %c0_65 = arith.constant 0 : index
    %c0_66 = arith.constant 0 : index
    %c0_67 = arith.constant 0 : index
    %105 = vector.load %arg9[%c0_65, %c0_66, %c0_67] : memref<1x128x128xbf16, #tpu.memory_space<vmem>>, vector<1x128x128xbf16>
    %106 = vector.shape_cast %105 : vector<1x128x128xbf16> to vector<128x128xbf16>
    %107 = vector.shape_cast %104 : vector<128x128xbf16> to vector<1x128x128xbf16>
    tpu.vector_store %arg9[%c0_65, %c0_66, %c0_67], %107 {strides = array<i32>} : memref<1x128x128xbf16, #tpu.memory_space<vmem>>, vector<1x128x128xbf16>,
    return
  }
  func.func @transform_0(%arg0: i32, %arg1: i32) -> (i32, i32, i32, i32) {
    %c0_i32 = arith.constant 0 : i32
    %c0_i32_0 = arith.constant 0 : i32
    %c0_i32_1 = arith.constant 0 : i32
    return %arg0, %arg1, %c0_i32, %c0_i32_0 : i32, i32, i32, i32
  }
  func.func @transform_1(%arg0: i32, %arg1: i32) -> (i32, i32, i32, i32) {
    %c0_i32 = arith.constant 0 : i32
    %c0_i32_0 = arith.constant 0 : i32
    %c0_i32_1 = arith.constant 0 : i32
    return %arg0, %arg1, %c0_i32, %c0_i32_0 : i32, i32, i32, i32
  }
  func.func @transform_2(%arg0: i32, %arg1: i32) -> (i32, i32, i32, i32) {
    %c0_i32 = arith.constant 0 : i32
    %c0_i32_0 = arith.constant 0 : i32
    %c0_i32_1 = arith.constant 0 : i32
    return %arg0, %arg1, %c0_i32, %c0_i32_0 : i32, i32, i32, i32
  }
  func.func @transform_3(%arg0: i32, %arg1: i32) -> (i32, i32) {
    %c0_i32 = arith.constant 0 : i32
    %c0_i32_0 = arith.constant 0 : i32
    %c0_i32_1 = arith.constant 0 : i32
    return %c0_i32, %c0_i32_0 : i32, i32
  }
  func.func @transform_4(%arg0: i32, %arg1: i32) -> (i32, i32) {
    %c0_i32 = arith.constant 0 : i32
    %c0_i32_0 = arith.constant 0 : i32
    %c0_i32_1 = arith.constant 0 : i32
    return %c0_i32, %c0_i32_0 : i32, i32
  }
  func.func @transform_5(%arg0: i32, %arg1: i32) -> (i32, i32) {
    %c0_i32 = arith.constant 0 : i32
    %c0_i32_0 = arith.constant 0 : i32
    %c0_i32_1 = arith.constant 0 : i32
    return %c0_i32, %c0_i32_0 : i32, i32
  }
  func.func @transform_6(%arg0: i32, %arg1: i32) -> (i32, i32) {
    %c0_i32 = arith.constant 0 : i32
    %c0_i32_0 = arith.constant 0 : i32
    %c0_i32_1 = arith.constant 0 : i32
    return %c0_i32, %c0_i32_0 : i32, i32
  }
  func.func @transform_7(%arg0: i32, %arg1: i32) -> (i32, i32, i32) {
    %c0_i32 = arith.constant 0 : i32
    %c0_i32_0 = arith.constant 0 : i32
    return %arg0, %arg1, %c0_i32 : i32, i32, i32
  }
}

</mosaic_0001>

<bundles_post_ra>
// kernel: tpu_custom_call.1
= control target key start
LH: loop header
LB: loop body
LE: loop exit
PB: predicated region body
PF: predicated region fallthrough
CT: control target
= control target key end

     0   :  { %s5724_s0 = inlined_call_operand.hbm [shape: bf16[2,16,16,16], index: 0, kind: input, shape index: {}]   ;;  %s5725_s1 = inlined_call_operand.hbm [shape: bf16[2,2,16,16], index: 1, kind: input, shape index: {}]   ;;  %s5726_s2 = inlined_call_operand.hbm [shape: bf16[2,2,16,16], index: 2, kind: input, shape index: {}]   ;;  %s5727_s3 = inlined_call_operand.hbm [shape: bf16[144,128], index: 3, kind: input, shape index: {}]   ;;  %s5728_s4 = inlined_call_operand.vmem [shape: f32[1,128], index: 4, kind: input, shape index: {}]   ;;  %s5729_s5 = inlined_call_operand.hbm [shape: bf16[128,128], index: 5, kind: input, shape index: {}]   ;;  %s5730_s6 = inlined_call_operand.vmem [shape: f32[1,128], index: 6, kind: input, shape index: {}]   ;;  %s5731_s7 = inlined_call_operand.hbm [shape: bf16[2,256,128], index: 7, kind: output, shape index: {}]  }
   0x1   :  { %5766 = sst [smem:[#allocation28_spill]] %s5725_s1 }
   0x2   :  { %5767 = sst [smem:[#allocation29_spill]] %s5727_s3 }
   0x3   :  { %5768 = sst [smem:[#allocation30_spill]] %s5728_s4 }
   0x4   :  { %5769 = sst [smem:[#allocation31_spill]] %s5730_s6 }
   0x5   :  { %5770 = sst [smem:[#allocation32_spill]] %s5731_s7 }
   0x6   :  { %12 = vsyncpa [#allocation4], 0 }
   0x7   :  { %14 = vsyncpa [#allocation4 + $0x1], 0 }
   0x8   :  { %15 = vsyncpa [#allocation7], 0 }
   0x9   :  { %17 = vsyncpa [#allocation7 + $0x1], 0 }
   0xa   :  { %18 = vsyncpa [#allocation10], 0 }
   0xb   :  { %19 = vsyncpa [#allocation5], 0 }
   0xc   :  { %21 = vsyncpa [#allocation5 + $0x1], 0  ;;  %s4614_s24 = smov 0   ;;  %s4616_s25 = smov 0  }
   0xd   :  { %s4618_s26 = smov 0   ;;  %s4620_s27 = smov 0  }
   0xe   :  { %s4622_s28 = smov 0   ;;  %s4624_s29 = smov 0  }
   0xf   :  { %s4626_s30 = smov 0   ;;  %s4628_s8 = smov 0  }
  0x10 LB: > { %5771 = sst [smem:[#allocation17_spill]] %s4532_s24  ;;  %s4655_s9 = sadd.s32 4294967295, %s4560_s8   ;;  %s4560_s8 = sphi %s4628_s8, %s27_s8   ;;  %s4556_s30 = sphi %s4626_s30, %s5854_s30   ;;  %s4552_s29 = sphi %s4624_s29, %s5853_s29   ;;  %s4548_s28 = sphi %s4622_s28, %s5852_s28   ;;  %s4544_s27 = sphi %s4620_s27, %s5851_s27   ;;  %s4540_s26 = sphi %s4618_s26, %s5846_s26   ;;  %s4536_s25 = sphi %s4616_s25, %s5850_s25   ;;  %s4532_s24 = sphi %s4614_s24, %s5849_s24  }
  0x11   : > { %5772 = sst [smem:[#allocation18_spill]] %s4540_s26  ;;  %s3507_s10 = sadd.s32 4294967294, %s4560_s8  }
  0x12   : > { %5773 = sst [smem:[#allocation19_spill]] %s4544_s27  ;;  %p55_p0 = scmp.ne.s32.totalorder %s4540_s26, %s4536_s25 }
  0x13   : > { %5774 = sst [smem:[#allocation20_spill]] %s4548_s28  ;;  %p56_p1 = scmp.eq.s32.totalorder %s4560_s8, 0 }
  0x14   : > { %5775 = sst [smem:[#allocation21_spill]] %s4560_s8  ;;  %p61_p2 = scmp.ne.s32.totalorder %s4536_s25, %s4532_s24 }
  0x15   : > { %5776 = sst [smem:[#allocation22_spill]] %s4655_s9  ;;  %p5735_p3 = scmp.eq.s32.totalorder %s4655_s9, 0 }
  0x16   : > { %p227_p4 = scmp.eq.s32.totalorder %s4655_s9, 3  ;;  %p4666_p5 = por %p56_p1, %p55_p0 }
  0x17   : > { %p233_p6 = scmp.eq.s32.totalorder %s3507_s10, 3  ;;  %p4672_p7 = por %p5735_p3, %p61_p2 }
  0x18   : > { %s5777_s12 = scalar_select %p4666_p5, 1, 0 }
  0x19   : > { %s5778_s13 = scalar_select %p4672_p7, 1, 0 }
  0x1a   : > { %p4676_p8 = por %p227_p4, %p55_p0  ;;  %p4680_p9 = por %p233_p6, %p61_p2 }
  0x1b   : > { %p3508_p10 = scmp.ge.s32.totalorder %s4560_s8, 1  ;;  %p240_p11 = scmp.lt.s32.totalorder %s4560_s8, 5 }
  0x1c   : > { %s5779_s14 = scalar_select %p4676_p8, 1, 0 }
  0x1d   : > { %s5781_s15 = scalar_select %p4680_p9, 1, 0 }
  0x1e   : > { %5780 = sst [smem:[#allocation23_spill]] %s5779_s14  ;;  %p4686_p12 = pnand %p3508_p10, %p240_p11 }
  0x1f   : > { %5782 = sst [smem:[#allocation24_spill]] %s5781_s15  ;;  %s4562_s17 = smov [#allocation9]  }
  0x20   : > { %s5783_s16 = scalar_select %p4686_p12, 1, 0 }
  0x21   : > { %s252_s18 = sshll.u32 %s4562_s17, 4  ;;  %p4173_p13 = pneg %p4686_p12  ;;  %s253_s18 = int_to_ptr.vmem [resolvable:$true] %s252_s18 }
  0x22   : > { %s39_s20 = sadd.s32 1, %s4556_s30  ;;  %s36_s21 = sadd.s32 1, %s4552_s29 }
  0x23   : > { %p4694_p0 = pnand %p4173_p13, %p5735_p3  ;;  %s5785_s3 = sld [smem:[#allocation29_spill]] }
  0x25   : > { %s5784_s19 = scalar_select %p4694_p0, 1, 0 }
  0x26   : > { %p5750_p2 = pneg %p4694_p0 }
  0x29   : > { %s4308_s10 = scalar_lea.hbm %s5785_s3, 1152 }
  0x2a   : > { %p4309_p1 = scmp.ne.s32.totalorder %s5785_s3, %s4308_s10  ;;  %p4315_p10 = scmp.lt.u32.totalorder %s4308_s10, %s5785_s3 }
  0x2c   : > { %p4311_p4 = pnand %p5750_p2, %p4309_p1 }
  0x2e   : > { %p4312_p6 = pneg %p4311_p4 }
  0x30   : > { %p4317_p11 = pnand %p4315_p10, %p4312_p6 }
  0x32   : > { %4320 = shalt.err (!%p4317_p11)
}
  0x33   : > { %s4321_s7 = scalar_lea.vmem %s253_s18, 1152  ;;  %p4329_p8 = scmp.lt.s32.totalorder %s253_s18, %s253_s18 }
  0x34   : > { %p4322_p13 = scmp.ne.s32.totalorder %s253_s18, %s4321_s7  ;;  %p4330_p7 = scmp.lt.s32.totalorder %s4321_s7, %s4321_s7 }
  0x36   : > { %p4324_p3 = pnand %p4322_p13, %p5750_p2  ;;  %p4331_p12 = por %p4330_p7, %p4329_p8 }
  0x38   : > { %p4325_p9 = pneg %p4324_p3 }
  0x3a   : > { %p4332_p5 = pnand %p4331_p12, %p4325_p9 }
  0x3c   : > { %4335 = shalt.err (!%p4332_p5)
}
  0x3d   : > { %s5739_s11 = smov 64   ;;  %s5741_s24 = smov 4  }
  0x3e   : > { %4176 = dma.hbm_to_vmem [thread:$0]  (!%p4694_p0), %s5785_s3, 1152, %s253_s18, [#allocation10], %s5739_s11, %s5739_s11, %s5741_s24  }
  0x3f   : > { %p37_p3 = scmp.ge.s32.totalorder %s36_s21, 2  ;;  %p4196_p5 = scmp.lt.s32.totalorder %s4560_s8, 4 }
  0x40   : > { %s4727_s22 = sand.u32 1, %s4540_s26   ;;  %s309_s23 = sand.u32 1, %s4560_s8  }
  0x41   : > { %s5856_s21 = smov (%p37_p3, %s36_s21), 0  ;;  %s5858_s20 = smov (!%p37_p3, %s39_s20), %s4556_s30 }
  0x42   : > { %5786 = sst [smem:[#allocation25_spill]] %s5856_s21  ;;  %s44_s10 = ssub.s32 %s4552_s29, %s5856_s21 }
  0x43   : > { %p5787_p7 = scmp.ne.s32.totalorder %s5777_s12, 0  ;;  %p41_p9 = scmp.ge.s32.totalorder %s5858_s20, 2 }
  0x44   : > { %s5749_s18 = sshll.u32 %s4727_s22, 3  ;;  %s3518_s7 = sshll.u32 %s4552_s29, 1 }
  0x45   : > { %p4737_p8 = pnand %p4196_p5, %p5787_p7  ;;  %s5860_s20 = smov (%p41_p9, %s5858_s20), 0 }
  0x46   : > { %5789 = sst [smem:[#allocation26_spill]] %s5860_s20  ;;  %s43_s15 = ssub.s32 %s4556_s30, %s5860_s20 }
  0x47   : > { %s5788_s17 = scalar_select %p4737_p8, 1, 0 }
  0x48   : > { %s3519_s11 = sshll.u32 %s4556_s30, 2  ;;  %s45_s24 = sor.u32 %s44_s10, %s43_s15 }
  0x49   : > { %s4748_s3 = sadd.s32 %s3519_s11, %s3518_s7  ;;  %p46_p12 = scmp.eq.s32.totalorder %s45_s24, 0 }
  0x4a   : > { %s3520_s12 = sshll.u32 %s4748_s3, 6  ;;  %s5790_s1 = sld [smem:[#allocation28_spill]] }
  0x4b   : > { %s313_s20 = scalar_lea.vmem [#allocation6], %s5749_s18  ;;  %s5791_s10 = sadd.s32 1, %s4540_s26 }
  0x4c   : > { %s322_s28 = sshll.u32 %s313_s20, 4  ;;  %s4767_s24 = scalar_lea.sflag [#allocation7], %s309_s23  ;;  %s4765_s28 = int_to_ptr.vmem [resolvable:$true] %s322_s28 }
  0x4d   : > { %s4763_s11 = scalar_select %p46_p12, %s4540_s26, %s5791_s10  }
  0x4e   : > { %p4773_p4 = pneg %p4737_p8 }
  0x4f   : > { %5792 = sst [smem:[#allocation27_spill]] %s4763_s11 }
  0x50   : > { %s4756_s14 = scalar_lea.hbm %s5790_s1, %s3520_s12  ;;  %s4341_s15 = scalar_lea.hbm %s5790_s1, 512 }
  0x51   : > { %s4336_s7 = scalar_lea.hbm %s4756_s14, 128  ;;  %p4342_p11 = scmp.lt.u32.totalorder %s4756_s14, %s5790_s1 }
  0x52   : > { %p4337_p1 = scmp.ne.s32.totalorder %s4756_s14, %s4336_s7  ;;  %p4343_p13 = scmp.lt.u32.totalorder %s4341_s15, %s4336_s7 }
  0x53   : > { %s5793_s8 = scalar_select %p4773_p4, 1, 0 }
  0x54   : > { %p4339_p6 = pnand %p4773_p4, %p4337_p1  ;;  %p4344_p3 = por %p4343_p13, %p4342_p11 }
  0x55   : > { %p4345_p5 = scmp.lt.u32.totalorder %s4336_s7, %s4756_s14 }
  0x56   : > { %p4340_p10 = pneg %p4339_p6 }
  0x57   : > { %p4346_p7 = por %p4345_p5, %p4344_p3 }
  0x59   : > { %p4347_p9 = pnand %p4346_p7, %p4340_p10 }
  0x5b   : > { %4350 = shalt.err (!%p4347_p9)
}
  0x5c   : > { %s4351_s23 = scalar_lea.vmem %s4765_s28, 128  ;;  %s4565_s21 = smov [#allocation6]  }
  0x5d   : > { %p4352_p12 = scmp.ne.s32.totalorder %s4765_s28, %s4351_s23  ;;  %s4356_s20 = sshll.u32 %s4565_s21, 4  ;;  %s4357_s20 = int_to_ptr.vmem [resolvable:$false] %s4356_s20 }
  0x5e   : > { %s4358_s18 = scalar_lea.vmem %s4357_s20, 256  ;;  %p4359_p2 = scmp.lt.s32.totalorder %s4765_s28, %s4357_s20 }
  0x5f   : > { %p4354_p1 = pnand %p4352_p12, %p4773_p4  ;;  %p4360_p0 = scmp.lt.s32.totalorder %s4358_s18, %s4351_s23 }
  0x61   : > { %p4355_p6 = pneg %p4354_p1  ;;  %p4361_p11 = por %p4360_p0, %p4359_p2 }
  0x63   : > { %p4362_p13 = pnand %p4361_p11, %p4355_p6 }
  0x65   : > { %4365 = shalt.err (!%p4362_p13)
}
  0x66   : > { %s5794_s7 = smov 4   ;;  %s5795_s15 = smov 64  }
  0x67   : > { %4186 = dma.hbm_to_vmem [thread:$0]  (!%p4737_p8), %s4756_s14, 128, %s4765_s28, %s4767_s24, %s5795_s15, %s5795_s15, %s5794_s7  }
  0x68   : > { %s4805_s23 = scalar_lea.hbm %s5726_s2, %s3520_s12  ;;  %s5796_s20 = sshll.u32 %s4727_s22, 3 }
  0x69   : > { %s4809_s18 = scalar_lea.vmem [#allocation8], %s5796_s20  ;;  %s4566_s11 = smov [#allocation11]  }
  0x6a   : > { %s345_s1 = sshll.u32 %s4809_s18, 4  ;;  %s268_s26 = sshll.u32 %s4566_s11, 4  ;;  %s269_s26 = int_to_ptr.vmem [resolvable:$true] %s268_s26  ;;  %s4840_s1 = int_to_ptr.vmem [resolvable:$true] %s345_s1 }
  0x6b   : > { %s3512_s27 = sshll.u32 %s4727_s22, 6  ;;  %s4366_s9 = scalar_lea.hbm %s5729_s5, 1024 }
  0x6c   : > { %p4367_p0 = scmp.ne.s32.totalorder %s5729_s5, %s4366_s9  ;;  %p5797_p2 = scmp.ne.s32.totalorder %s5784_s19, 0 }
  0x6d   : > { %p4373_p7 = scmp.lt.u32.totalorder %s4366_s9, %s5729_s5 }
  0x6e   : > { %p5798_p10 = pneg %p5797_p2 }
  0x70   : > { %p4369_p3 = pnand %p4367_p0, %p5798_p10 }
  0x72   : > { %p4370_p5 = pneg %p4369_p3 }
  0x74   : > { %p4375_p9 = pnand %p4373_p7, %p4370_p5 }
  0x76   : > { %4378 = shalt.err (!%p4375_p9)
}
  0x77   : > { %s4379_s11 = scalar_lea.vmem %s269_s26, 1024  ;;  %p5799_p1 = pmov %p5798_p10 }
  0x78   : > { %p4380_p12 = scmp.ne.s32.totalorder %s269_s26, %s4379_s11  ;;  %p4387_p13 = scmp.lt.s32.totalorder %s269_s26, %s269_s26 }
  0x79   : > { %p4388_p8 = scmp.lt.s32.totalorder %s4379_s11, %s4379_s11 }
  0x7a   : > { %p4382_p6 = pnand %p4380_p12, %p5799_p1 }
  0x7b   : > { %p4389_p4 = por %p4388_p8, %p4387_p13 }
  0x7c   : > { %p4383_p11 = pneg %p4382_p6 }
  0x7e   : > { %p4390_p0 = pnand %p4389_p4, %p4383_p11 }
  0x80   : > { %4393 = shalt.err (!%p4390_p0)
}
  0x81   : > { %4179 = dma.hbm_to_vmem [thread:$0]  (!%p5797_p2), %s5729_s5, 1024, %s269_s26, [#allocation10], %s5795_s15, %s5795_s15, %s5794_s7  }
  0x82   : > { %s3674_s9 = sshll.u32 %s4552_s29, 4  ;;  %s3515_s10 = sshll.u32 %s4556_s30, 5 }
  0x83   : > { %s289_s21 = scalar_lea.vmem [#allocation3], %s3512_s27  ;;  %s296_s18 = sadd.s32 %s3674_s9, %s3515_s10 }
  0x84   : > { %s299_s20 = sshll.u32 %s289_s21, 4  ;;  %s3516_s19 = sshll.u32 %s296_s18, 6  ;;  %s4838_s20 = int_to_ptr.vmem [resolvable:$true] %s299_s20 }
  0x85   : > { %s4845_s14 = scalar_lea.hbm %s5724_s0, %s3516_s19  ;;  %s286_s26 = scalar_lea.sflag [#allocation4], %s4727_s22 }
  0x86   : > { %s4394_s12 = scalar_lea.hbm %s4845_s14, 1024  ;;  %p5800_p4 = scmp.ne.s32.totalorder %s5793_s8, 0 }
  0x87   : > { %p4395_p8 = scmp.ne.s32.totalorder %s4845_s14, %s4394_s12  ;;  %s4399_s4 = scalar_lea.hbm %s5724_s0, 4096 }
  0x88   : > { %p4400_p3 = scmp.lt.u32.totalorder %s4845_s14, %s5724_s0  ;;  %p4401_p5 = scmp.lt.u32.totalorder %s4399_s4, %s4394_s12 }
  0x89   : > { %p4397_p2 = pnand %p4395_p8, %p5800_p4  ;;  %p4403_p9 = scmp.lt.u32.totalorder %s4394_s12, %s4845_s14 }
  0x8a   : > { %p4402_p7 = por %p4401_p5, %p4400_p3 }
  0x8b   : > { %p4398_p10 = pneg %p4397_p2 }
  0x8c   : > { %p4404_p12 = por %p4403_p9, %p4402_p7 }
  0x8e   : > { %p4405_p1 = pnand %p4404_p12, %p4398_p10 }
  0x90   : > { %4408 = shalt.err (!%p4405_p1)
}
  0x91   : > { %s4409_s10 = scalar_lea.vmem %s4838_s20, 1024  ;;  %s4567_s21 = smov [#allocation3]  }
  0x92   : > { %p4410_p6 = scmp.ne.s32.totalorder %s4838_s20, %s4409_s10  ;;  %s4414_s18 = sshll.u32 %s4567_s21, 4  ;;  %s4415_s18 = int_to_ptr.vmem [resolvable:$false] %s4414_s18 }
  0x93   : > { %s4416_s19 = scalar_lea.vmem %s4415_s18, 2048  ;;  %p4417_p0 = scmp.lt.s32.totalorder %s4838_s20, %s4415_s18 }
  0x94   : > { %p4412_p11 = pnand %p4410_p6, %p5800_p4  ;;  %p4418_p8 = scmp.lt.s32.totalorder %s4416_s19, %s4409_s10 }
  0x96   : > { %p4413_p13 = pneg %p4412_p11  ;;  %p4419_p2 = por %p4418_p8, %p4417_p0 }
  0x98   : > { %p4420_p3 = pnand %p4419_p2, %p4413_p13 }
  0x9a   : > { %4423 = shalt.err (!%p4420_p3)
}
  0x9b   : > { %p5801_p10 = scmp.ne.s32.totalorder %s5788_s17, 0  ;;  %s4424_s28 = scalar_lea.hbm %s4805_s23, 128 }
  0x9c   : > { %p4425_p5 = scmp.ne.s32.totalorder %s4805_s23, %s4424_s28  ;;  %s4429_s27 = scalar_lea.hbm %s5726_s2, 512 }
  0x9d   : > { %4183 = dma.hbm_to_vmem [thread:$0]  (!%p5801_p10), %s4845_s14, 1024, %s4838_s20, %s286_s26, %s5795_s15, %s5795_s15, %s5794_s7  }
  0x9e   : > { %p4427_p7 = pnand %p4425_p5, %p5800_p4  ;;  %p4430_p12 = scmp.lt.u32.totalorder %s4805_s23, %s5726_s2 }
  0x9f   : > { %p4431_p1 = scmp.lt.u32.totalorder %s4429_s27, %s4424_s28  ;;  %p4433_p11 = scmp.lt.u32.totalorder %s4424_s28, %s4805_s23 }
  0xa0   : > { %p4428_p9 = pneg %p4427_p7 }
  0xa1   : > { %p4432_p6 = por %p4431_p1, %p4430_p12 }
  0xa3   : > { %p4434_p13 = por %p4433_p11, %p4432_p6 }
  0xa5   : > { %p4435_p0 = pnand %p4434_p13, %p4428_p9 }
  0xa7   : > { %4438 = shalt.err (!%p4435_p0)
}
  0xa8   : > { %s4439_s22 = scalar_lea.vmem %s4840_s1, 128  ;;  %s4568_s20 = smov [#allocation8]  }
  0xa9   : > { %p4440_p8 = scmp.ne.s32.totalorder %s4840_s1, %s4439_s22  ;;  %s4444_s14 = sshll.u32 %s4568_s20, 4  ;;  %s4445_s14 = int_to_ptr.vmem [resolvable:$false] %s4444_s14 }
  0xaa   : > { %s4446_s26 = scalar_lea.vmem %s4445_s14, 256  ;;  %p4447_p5 = scmp.lt.s32.totalorder %s4840_s1, %s4445_s14 }
  0xab   : > { %p4442_p2 = pnand %p4440_p8, %p5800_p4  ;;  %p4448_p7 = scmp.lt.s32.totalorder %s4446_s26, %s4439_s22 }
  0xad   : > { %p4443_p3 = pneg %p4442_p2  ;;  %p4449_p12 = por %p4448_p7, %p4447_p5 }
  0xaf   : > { %p4450_p1 = pnand %p4449_p12, %p4443_p3 }
  0xb1   : > { %4453 = shalt.err (!%p4450_p1)
}
  0xb2   : > { %4189 = dma.hbm_to_vmem [thread:$0]  (!%p5801_p10), %s4805_s23, 128, %s4840_s1, %s4767_s24, %s5795_s15, %s5795_s15, %s5794_s7  }
  0xb3   : > { %p5802_p4 = scmp.ne.s32.totalorder %s5783_s16, 0 }
  0xb4   : > { %s4902_s8 = sand.u32 (!%p5802_p4), 1, %s4536_s25   ;;  %p5803_p9 = scmp.ne.s32.totalorder (!%p5802_p4), %s5778_s13, 0 }
  0xb5   : > { %357 = sbr.rel (%p5802_p4) target bundleno = 857 (0x359), region = 48  ;;  %s3526_s6 = sshll.u32 (!%p5802_p4), %s4902_s8, 6 }
  0xb6   : > { %s360_s9 = scalar_lea.sflag (!%p5802_p4), [#allocation4], %s4902_s8  ;;  %s4908_s17 = scalar_lea.vmem (!%p5802_p4), [#allocation3], %s3526_s6 }
  0xbc   : > { %4515 = dma.done.wait (%p5803_p9), %s360_s9, 1024  }
  0xbd   : > { %4517 = vsyncadd (%p5803_p9), %s360_s9, 4294966272  ;;  %s5804_s1 = sld [smem:[#allocation22_spill]]  ;;  %s3527_s24 = sshll.u32 %s4902_s8, 3 }
  0xbe   : > { %s4916_s15 = scalar_lea.vmem [#allocation6], %s3527_s24 }
  0xc3   : > { %s368_s16 = sand.u32 1, %s5804_s1  }
  0xc4   : > { %s369_s7 = scalar_lea.sflag [#allocation7], %s368_s16 }
  0xc5   : > { %4519 = dma.done.wait (%p5803_p9), %s369_s7, 256  }
  0xc6   : > { %4521 = vsyncadd (%p5803_p9), %s369_s7, 4294967040  ;;  %s4922_s23 = scalar_lea.vmem [#allocation8], %s3527_s24  ;;  %p5805_p10 = scmp.eq.s32.totalorder %s5804_s1, 0 }
  0xc8   : > { %4523 = dma.done.wait (%p5805_p10), [#allocation10], 2176   ;;  %p5806_p6 = pmov %p5805_p10 }
  0xc9   : > { %vm435_vm0 = vcmask 125952   ;;  %vm437_vm1 = vcmask 130052   ;;  %v539_v0 = vlaneseq  ;;  %v4569_v1 = vmov 0   ;;  %v4272_v11 = vld [vmem:[#allocation9 + $0x20] sm:$0xff]   ;;  %v4273_v13 = vld [vmem:[#allocation9 + $0x8] sm:$0xff]   ;;  %v4280_v39 = vld [vmem:[%s4908_s17 + $0x14] sm:$0xff]  }
  0xca   : > { %4525 = vsyncadd (%p5806_p6), [#allocation10], 4294965120  ;;  %436 = vst.msk [vmem:[#allocation2] sm:$0xf] %vm435_vm0, %v4569_v1  ;;  %vm4570_vm2 = vmmov 1   ;;  %vm518_vm4 = vcmask 130048   ;;  %3907 = vmatprep.subr.bf16.mxu0 %v4272_v11  ;;  %3835 = vmatprep.subr.bf16.mxu1 %v4273_v13 }
  0xcb   : > { %438 = vst.msk [vmem:[#allocation2 + $0x50] sm:$0xf0] %vm437_vm1, %v4569_v1  ;;  %vm822_vm3 = vmpackc.low %vm4570_vm2, %vm4570_vm2  ;;  %v4932_v2 = vshrl.u32 %v539_v0, 7  ;;  %v4274_v15 = vld [vmem:[%s4916_s15] ss:$0 sps:$4 sm:$0xff]   ;;  %3908 = vmatpush3.bf16.msra.mxu0 %v4272_v11  ;;  %3836 = vmatpush3.bf16.msra.mxu1 %v4273_v13  ;;  %vm5763_vm10 = vcmask 1043456  }
  0xcc   : > { %v4938_v6 = vsel %vm822_vm3, 65537, %v4569_v1  ;;  %v4275_v16 = vld [vmem:[%s4916_s15 + $0x4] ss:$0 sps:$4 sm:$0xff]   ;;  %v4276_v17 = vld [vmem:[%s4908_s17] ss:$0 sps:$4 sm:$0xff]   ;;  %521 = vst.msk [vmem:[#allocation2 + $0x20] sm:$0xff] %vm518_vm4, %v4280_v39 }
  0xcd   : > { %v541_v3 = vadd.s32 8, %v4932_v2  ;;  %v542_v4 = vadd.s32 16, %v4932_v2  ;;  %v543_v5 = vadd.s32 24, %v4932_v2  ;;  %v560_v7 = vand.u32 15, %v4932_v2  ;;  %449 = vst.msk [vmem:[#allocation2] sm:$0xf0] %vm437_vm1, %v4274_v15 }
  0xce   : > { %v544_v8 = vadd.s32 32, %v4932_v2  ;;  %v545_v9 = vadd.s32 40, %v4932_v2  ;;  %v4944_v10 = vadd.s32 112, %v4932_v2  ;;  %450 = vst.msk [vmem:[#allocation2 + $0x8] sm:$0xf] %vm435_vm0, %v4275_v16  ;;  %v4277_v20 = vld [vmem:[%s4908_s17 + $0x4] sm:$0xff]  }
  0xcf   : > { %v567_v12 = vand.u32 15, %v541_v3  ;;  %v574_v14 = vand.u32 15, %v542_v4  ;;  %v581_v18 = vand.u32 15, %v543_v5  ;;  %vm748_vm5 = vcmp.ge.s32.totalorder %v560_v7, 1  ;;  %517 = vst.msk [vmem:[#allocation2 + $0x8] sm:$0xf0] %vm437_vm1, %v4276_v17 }
  0xd0   : > { %vm821_vm8 = vmpackc.low %vm748_vm5, %vm748_vm5  ;;  %vm877_vm9 = vsmask.f32 3328  ;;  %v588_v21 = vand.u32 15, %v544_v8  ;;  %v595_v22 = vand.u32 15, %v545_v9  ;;  %519 = vst.msk [vmem:[#allocation2 + $0x10] sm:$0xff] %vm518_vm4, %v4277_v20  ;;  %v4968_v27 = vld [vmem:[#allocation9 + $0x28] sm:$0xff]  }
  0xd1   : > { %vm750_vm6 = vcmp.ge.s32.totalorder %v574_v14, 1  ;;  %vm4950_vm7 = vcmp.le.s32.totalorder %v567_v12, 14  ;;  %vm4957_vm11 = vcmp.le.s32.totalorder %v581_v18, 14  ;;  %v837_v24 = vsel %vm821_vm8, 65537, %v4569_v1  ;;  %v4279_v33 = vld [vmem:[%s4908_s17 + $0xc] sm:$0xff]   ;;  %3925 = vmatprep.subr.bf16.mxu0 %v4968_v27  ;;  %v4281_v44 = vld [vmem:[%s4908_s17 + $0x1c] sm:$0xff]  }
  0xd2   : > { %vm823_vm12 = vmpackc.low %vm750_vm6, %vm750_vm6  ;;  %v3545_v26 = vcombine.low %v837_v24, %v4938_v6  ;;  %vm4970_vm14 = vcmp.ge.s32.totalorder %v588_v21, 1  ;;  %v4975_v29 = vadd.s32 48, %v4932_v2  ;;  %vm4982_vm2 = vcmp.le.s32.totalorder %v595_v22, 14  ;;  %520 = vst.msk [vmem:[#allocation2 + $0x18] sm:$0xff] %vm518_vm4, %v4279_v33  ;;  %v4282_v55 = vld [vmem:[%s4908_s17 + $0x24] sm:$0xff]   ;;  %v4283_v61 = vld [vmem:[%s4908_s17 + $0x2c] sm:$0xff]  }
  0xd3   : > { %v839_v25 = vsel %vm823_vm12, 65537, %v4569_v1  ;;  %vm1368_vm13 = vmpackc.low %vm4950_vm7, %vm4950_vm7  ;;  %v658_v34 = vand.u32 15, %v4944_v10  ;;  %vm1126_vm3 = vsmask.f32 4352  ;;  %522 = vst.msk [vmem:[#allocation2 + $0x28] sm:$0xff] %vm518_vm4, %v4281_v44  ;;  %v4284_v10 = vld [vmem:[%s4908_s17 + $0x34] sm:$0xff]  }
  0xd4   : > { %v3546_v30 = vcombine.low %v839_v25, %v4938_v6  ;;  %vm1370_vm15 = vmpackc.low %vm4957_vm11, %vm4957_vm11  ;;  %v1384_v31 = vsel %vm1368_vm13, 65537, %v4569_v1  ;;  %v879_v35 = vshrl.u32 %v3545_v26, 16  ;;  %v882_v36 = vshll.u32 %v3545_v26, 16  ;;  %v969_v47 = vld [vmem:[#allocation2] sm:$0xf0]  ;;  %523 = vst.msk [vmem:[#allocation2 + $0x30] sm:$0xff] %vm518_vm4, %v4282_v55 }
  0xd5   : > { %v1386_v37 = vsel %vm1370_vm15, 65537, %v4569_v1  ;;  %v3571_v38 = vcombine.low %v4938_v6, %v1384_v31  ;;  %vm825_vm5 = vmpackc.low %vm4970_vm14, %vm4970_vm14  ;;  %v982_v53 = vrot.slane %v969_v47, 4  ;;  %524 = vst.msk [vmem:[#allocation2 + $0x38] sm:$0xff] %vm518_vm4, %v4283_v61  ;;  %vm5029_vm7 = vcmp.ge.s32.totalorder %v658_v34, 1  ;;  %v4286_v25 = vld [vmem:[#allocation9] sm:$0xff]   ;;  %v5063_v32 = vld [vmem:[#allocation2 + $0x20] sm:$0xff] }
  0xd6   : > { %v887_v40 = vshrl.u32 %v3546_v30, 16  ;;  %v890_v41 = vshll.u32 %v3546_v30, 16  ;;  %v3572_v42 = vcombine.low %v4938_v6, %v1386_v37  ;;  %v841_v43 = vsel %vm825_vm5, 65537, %v4569_v1  ;;  %v5000_v50 = vld [vmem:[#allocation2 + $0x8] sm:$0xff]  ;;  %vm1372_vm6 = vmpackc.low %vm4982_vm2, %vm4982_vm2  ;;  %525 = vst.msk [vmem:[#allocation2 + $0x40] sm:$0xff] %vm518_vm4, %v4284_v10  ;;  %3853 = vmatprep.subr.bf16.mxu1 %v4286_v25  ;;  %s5834_s21 = sld [smem:[#allocation30_spill]] }
  0xd7   : > { %v881_v45 = vrot.slane %v879_v35, 4  ;;  %v884_v46 = vrot.slane %v882_v36, 5  ;;  %v1424_v48 = vshrl.u32 %v3571_v38, 16  ;;  %v1427_v49 = vshll.u32 %v3571_v38, 16  ;;  %v1980_v60 = vld [vmem:[#allocation2 + $0x8] sm:$0xf0]  ;;  %vm835_vm13 = vmpackc.low %vm5029_vm7, %vm5029_vm7 }
  0xd8   : > { %v889_v51 = vrot.slane %v887_v40, 4  ;;  %v892_v52 = vrot.slane %v890_v41, 5  ;;  %v1432_v54 = vshrl.u32 %v3572_v42, 16  ;;  %v983_v57 = vrot.slane %v5000_v50, 4  ;;  %v5010_v3 = vld [vmem:[#allocation2 + $0x10] sm:$0xff]  ;;  %s5835_s28 = sld [smem:[#allocation31_spill]] }
  0xd9   : > { %v5004_v56 = vor.u32 %v884_v46, %v881_v45  ;;  %v1426_v58 = vrot.slane %v1424_v48, 3  ;;  %v1429_v59 = vrot.slane %v1427_v49, 4  ;;  %v1435_v0 = vshll.u32 %v3572_v42, 16  ;;  %v5056_v24 = vld [vmem:[#allocation2 + $0x18] sm:$0xff]  ;;  %v5085_v42 = vld [vmem:[#allocation9 + $0x30] sm:$0xff]   ;;  %s5652_s3 = scalar_lea.vmem [#allocation12], %s3526_s6 }
  0xda   : > { %v5008_v62 = vor.u32 %v892_v52, %v889_v51  ;;  %v1434_v63 = vrot.slane %v1432_v54, 3  ;;  %v1992_v4 = vrot.slane %v1980_v60, 4  ;;  %v984_v5 = vsel %vm5763_vm10, %v982_v53, %v983_v57  ;;  %v5072_v36 = vld [vmem:[#allocation2 + $0x28] sm:$0xff]  ;;  %v4285_v49 = vld [vmem:[%s4908_s17 + $0x3c] ss:$0 sps:$4 sm:$0xff]   ;;  %s5836_s12 = sld [smem:[#allocation19_spill]] }
  0xdb   : > { %v5017_v7 = vor.u32 %v1429_v59, %v1426_v58  ;;  %v1993_v8 = vrot.slane %v5010_v3, 4  ;;  %v3547_v9 = vcombine.low %v841_v43, %v4938_v6  ;;  %3837 = vmatprep.mubr.msk.bf16.mxu1 %vm518_vm4, %v984_v5  ;;  %v1437_v12 = vrot.slane %v1435_v0, 4  ;;  %v5083_v41 = vld [vmem:[#allocation2 + $0x30] sm:$0xff]  ;;  %v5087_v43 = vld [vmem:[#allocation9 + $0x10] sm:$0xff]   ;;  %526 = vst.msk [vmem:[#allocation2 + $0x48] sm:$0xf] %vm435_vm0, %v4285_v49 }
  0xdc   : > { %v5026_v11 = vsel %vm877_vm9, %v5004_v56, %v5008_v62  ;;  %v1388_v18 = vsel %vm1372_vm6, 65537, %v4569_v1  ;;  %v602_v19 = vand.u32 15, %v4975_v29  ;;  %v1995_v46 = vrot.slane %v5056_v24, 4  ;;  %v5092_v48 = vld [vmem:[#allocation2 + $0x38] sm:$0xff]  ;;  %s5837_s27 = sld [smem:[#allocation20_spill]]  ;;  %s3348_s20 = sshll.u32 %s5652_s3, 4  ;;  %s5663_s20 = int_to_ptr.vmem [resolvable:$true] %s3348_s20 }
  0xdd   : > { %vm950_vm8 = vcmp.ne.s16.totalorder %v5026_v11, 0  ;;  %vm5762_vm11 = vcmp.ne.s16.totalorder %v5017_v7, 0  ;;  %v1994_v14 = vsel %vm5763_vm10, %v1992_v4, %v1993_v8  ;;  %v896_v15 = vshrl.u32 %v3547_v9, 16  ;;  %v5106_v54 = vld [vmem:[#allocation2 + $0x40] sm:$0xff]  ;;  %s5838_s14 = sld [smem:[#allocation23_spill]]  ;;  %s5839_s17 = sld [smem:[#allocation32_spill]] }
  0xde   : > { %v5037_v16 = vor.u32 %v1437_v12, %v1434_v63  ;;  %v1503_v17 = vsel %vm5762_vm11, %v969_v47, 0  ;;  %3909 = vmatprep.mubr.msk.bf16.mxu0 %vm518_vm4, %v1994_v14  ;;  %v5052_v20 = vsel %vm950_vm8, %v5000_v50, 0  ;;  %v2153_v23 = vsel %vm5762_vm11, %v1980_v60, 0  ;;  %v5108_v55 = vld [vmem:[#allocation2 + $0x40] sm:$0xf]  ;;  %s3333_s16 = scalar_lea.sflag [#allocation5], %s4902_s8 }
  0xdf   : > { %v1515_v21 = vshrl.u32 %v1503_v17, 16  ;;  %v1518_v22 = vshll.u32 %v1503_v17, 16  ;;  %v2165_v28 = vshrl.u32 %v2153_v23, 16  ;;  %v2168_v30 = vshll.u32 %v2153_v23, 16  ;;  %s4454_s24 = scalar_lea.vmem %s5663_s20, 1024  ;;  %s4571_s7 = smov [#allocation12]  }
  0xe0   : > { %v5061_v26 = vsel %vm1126_vm3, %v5017_v7, %v5037_v16  ;;  %v899_v31 = vshll.u32 %v3547_v9, 16  ;;  %v5069_v33 = vsel %vm950_vm8, %v5010_v3, 0  ;;  %v898_v34 = vrot.slane %v896_v15, 4  ;;  %s3669_s11 = sshll.u32 %s5836_s12, 4  ;;  %p4455_p11 = scmp.ne.s32.totalorder %s5663_s20, %s4454_s24 }
  0xe1   : > { %vm5761_vm12 = vcmp.ne.s16.totalorder %v5061_v26, 0  ;;  %v986_v35 = vsel %vm5763_vm10, %v983_v57, %v1993_v8  ;;  %v5074_v37 = vrot.slane %v1515_v21, 4  ;;  %v5076_v38 = vrot.slane %v1518_v22, 5  ;;  %s4458_s15 = sshll.u32 %s4571_s7, 4  ;;  %s4459_s15 = int_to_ptr.vmem [resolvable:$false] %s4458_s15 }
  0xe2   : > { %v5078_v39 = vrot.slane %v2165_v28, 4  ;;  %v5080_v40 = vrot.slane %v2168_v30, 5  ;;  %3838 = vmatmul.mubr.msk.bf16.vlgmr.msra.gmra.mrb[0].mxu1 %vm518_vm4, %v986_v35  ;;  %v901_v44 = vrot.slane %v899_v31, 5  ;;  %v3573_v45 = vcombine.low %v4938_v6, %v1388_v18  ;;  %s3670_s4 = sshll.u32 %s5837_s27, 5  ;;  %p4461_p2 = scmp.lt.s32.totalorder %s5663_s20, %s4459_s15 }
  0xe3   : > { %v1997_v47 = vrot.slane %v5063_v32, 4  ;;  %3854 = vmatpush3.bf16.msra.mxu1 %v4286_v25  ;;  %v5098_v51 = vsel %vm5761_vm12, %v5000_v50, 0  ;;  %v5103_v52 = vsel %vm5761_vm12, %v5010_v3, 0  ;;  %v1999_v53 = vrot.slane %v5072_v36, 4  ;;  %s3345_s22 = sadd.s32 %s3670_s4, %s3669_s11  ;;  %p5840_p13 = scmp.ne.s32.totalorder %s5838_s14, 0 }
  0xe4   : > { %3871 = vmatprep.subr.bf16.mxu1 %v5087_v43  ;;  %v5111_v57 = vor.u32 %v901_v44, %v898_v34  ;;  %v1441_v58 = vshrl.u32 %v3573_v45, 16  ;;  %v1444_v59 = vshll.u32 %v3573_v45, 16  ;;  %v1996_v50 = vsel %vm5763_vm10, %v1993_v8, %v1995_v46  ;;  %v1745_v45 = vld [vmem:[#allocation2 + $0x48] sm:$0xf]  ;;  %s3671_s26 = sshll.u32 %s3345_s22, 6 }
  0xe5   : > { %3910 = vmatmul.mubr.msk.bf16.vlgmr.msra.gmra.mrb[0].mxu0 %vm518_vm4, %v1996_v50  ;;  %3841 = vmatprep.mubr.msk.bf16.mxu1 %vm518_vm4, %v1996_v50  ;;  %v1998_v60 = vsel %vm5763_vm10, %v1995_v46, %v1997_v47  ;;  %v2001_v61 = vrot.slane %v5083_v41, 4  ;;  %v2003_v63 = vrot.slane %v5092_v48, 4  ;;  %v2005_v0 = vrot.slane %v5106_v54, 4  ;;  %s5668_s1 = scalar_lea.hbm %s5839_s17, %s3671_s26  ;;  %p4456_p0 = pnand %p4455_p11, %p5840_p13 }
  0xe6   : > { %v5127_v4 = vsel %vm877_vm9, %v5008_v62, %v5111_v57  ;;  %v1443_v5 = vrot.slane %v1441_v58, 3  ;;  %v1446_v8 = vrot.slane %v1444_v59, 4  ;;  %3926 = vmatpush3.bf16.msra.mxu0 %v4968_v27  ;;  %3913 = vmatprep.mubr.msk.bf16.mxu0 %vm518_vm4, %v1998_v60  ;;  %v2171_v9 = vor.u32 %v5080_v40, %v5078_v39  ;;  %v4288_v27 = vld [vmem:[%s4922_s23] ss:$0 sps:$4 sm:$0xff]  }
  0xe7   : > { %vm951_vm14 = vcmp.ne.s16.totalorder %v5127_v4, 0  ;;  %v2000_v10 = vsel %vm5763_vm10, %v1997_v47, %v1999_v53  ;;  %v851_v62 = vsel %vm835_vm13, 65537, %v4569_v1  ;;  %v997_v12 = vrot.slane %v5108_v55, 4  ;;  %3943 = vmatprep.subr.bf16.mxu0 %v5085_v42  ;;  %537 = vst.msk [vmem:[#allocation2 + $0x48] sm:$0xf0] %vm437_vm1, %v4288_v27  ;;  %p4457_p8 = pneg %p4456_p0 }
  0xe8   : > { %v960_v14 = vsel %vm951_vm14, %v5010_v3, 0  ;;  %v5147_v15 = vor.u32 %v1446_v8, %v1443_v5  ;;  %v5152_v17 = vsel %vm951_vm14, %v5056_v24, 0  ;;  %v3552_v13 = vcombine.low %v851_v62, %v4938_v6  ;;  %v4291_v5 = vld [vmem:[%s4922_s23 + $0x4] ss:$0 sps:$4 sm:$0xff]   ;;  %s4460_s23 = scalar_lea.vmem %s4459_s15, 2048 }
  0xe9   : > { %v1145_v18 = vshrl.u32 %v960_v14, 16  ;;  %v1148_v21 = vshll.u32 %v960_v14, 16  ;;  %v2002_v22 = vsel %vm5763_vm10, %v1999_v53, %v2001_v61  ;;  %v2004_v23 = vsel %vm5763_vm10, %v2001_v61, %v2003_v63  ;;  %v780_v53 = vld [vmem:[#allocation2] sm:$0xf8]  ;;  %538 = vst.msk [vmem:[#allocation2 + $0x50] sm:$0xf] %vm435_vm0, %v4291_v5  ;;  %p4462_p3 = scmp.lt.s32.totalorder %s4460_s23, %s4454_s24 }
  0xea   : > { %3842 = vmatmul.mubr.msk.bf16.gmra.mrb[4].mxu1 %vm518_vm4, %v1998_v60  ;;  %v5162_v25 = vsel %vm1126_vm3, %v5037_v16, %v5147_v15  ;;  %v2006_v28 = vsel %vm5763_vm10, %v2003_v63, %v2005_v0  ;;  %v941_v30 = vshrl.u32 %v3552_v13, 16  ;;  %v944_v31 = vshll.u32 %v3552_v13, 16 }
  0xeb   : > { %3845 = vmatprep.mubr.msk.bf16.mxu1 %vm518_vm4, %v2000_v10  ;;  %v1147_v34 = vrot.slane %v1145_v18, 3  ;;  %vm5760_vm15 = vcmp.ne.s16.totalorder %v5162_v25, 0  ;;  %v1775_v35 = vshrl.u32 %v5152_v17, 16  ;;  %v5169_v44 = vsel %vm5763_vm10, %v2003_v63, %v997_v12  ;;  %p4463_p5 = por %p4462_p3, %p4461_p2 }
  0xec   : > { %v1150_v46 = vrot.slane %v1148_v21, 4  ;;  %v1505_v16 = vsel %vm5760_vm15, %v5010_v3, 0  ;;  %v2155_v47 = vsel %vm5760_vm15, %v5056_v24, 0  ;;  %v943_v49 = vrot.slane %v941_v30, 4 }
  0xed   : > { %v1532_v58 = vshrl.u32 %v1505_v16, 16  ;;  %v1535_v59 = vshll.u32 %v1505_v16, 16  ;;  %v2182_v50 = vshrl.u32 %v2155_v47, 16  ;;  %v2185_v60 = vshll.u32 %v2155_v47, 16  ;;  %3914 = vmatmul.mubr.msk.bf16.gmra.mrb[4].mxu0 %vm518_vm4, %v2000_v10  ;;  %p4464_p7 = pnand %p4463_p5, %p4457_p8 }
  0xee   : > { %3917 = vmatprep.mubr.msk.bf16.mxu0 %vm518_vm4, %v2002_v22  ;;  %v946_v61 = vrot.slane %v944_v31, 5  ;;  %v2007_v63 = vrot.slane %v1745_v45, 4  ;;  %vm5765_vm1 = vcmp.ne.s16.totalorder %v5004_v56, 0  ;;  %v1136_v3 = vshrl.u32 %v5052_v20, 16 }
  0xef   : > { %v5182_v8 = vrot.slane %v1532_v58, 4  ;;  %v5184_v62 = vrot.slane %v1535_v59, 5  ;;  %v2184_v12 = vrot.slane %v2182_v50, 4  ;;  %v2187_v27 = vrot.slane %v2185_v60, 5 }
  0xf0   : > { %v5186_v14 = vor.u32 %v946_v61, %v943_v49  ;;  %v2008_v13 = vsel %vm5763_vm10, %v2005_v0, %v2007_v63  ;;  %v958_v10 = vsel %vm5765_vm1, %v780_v53, 0  ;;  %v1138_v18 = vrot.slane %v1136_v3, 3 }
  0xf1   : > { %v1128_v21 = vshrl.u32 %v958_v10, 16  ;;  %v1131_v30 = vshll.u32 %v958_v10, 16  ;;  %v1139_v31 = vshll.u32 %v5052_v20, 16  ;;  %v2173_v16 = vshrl.u32 %v5103_v52, 16 }
  0xf2   : > { %3846 = vmatmul.mubr.msk.bf16.gmra.mrb[8].mxu1 %vm518_vm4, %v2002_v22  ;;  %vm5764_vm2 = vcmp.ne.s16.totalorder %v5186_v14, 0  ;;  %v2176_v0 = vshll.u32 %v5103_v52, 16  ;;  %v5198_v47 = vor.u32 %v1150_v46, %v1147_v34  ;;  %v5200_v49 = vor.u32 %v2187_v27, %v2184_v12 }
  0xf3   : > { %3849 = vmatprep.mubr.msk.bf16.mxu1 %vm518_vm4, %v2004_v23  ;;  %v5205_v22 = vsel %vm5764_vm2, %v5108_v55, 0  ;;  %v5209_v20 = vsel %vm5764_vm2, %v1745_v45, 0  ;;  %v1130_v53 = vrot.slane %v1128_v21, 3  ;;  %v1133_v58 = vrot.slane %v1131_v30, 4 }
  0xf4   : > { %v1141_v59 = vrot.slane %v1139_v31, 4  ;;  %v2175_v50 = vrot.slane %v2173_v16, 4  ;;  %v2178_v60 = vrot.slane %v2176_v0, 5  ;;  %vm754_vm0 = vcmp.ge.s32.totalorder %v602_v19, 1 }
  0xf5   : > { %3918 = vmatmul.mubr.msk.bf16.gmra.mrb[8].mxu0 %vm518_vm4, %v2004_v23  ;;  %v1134_v52 = vor.u32 %v1133_v58, %v1130_v53  ;;  %vm827_vm5 = vmpackc.low %vm754_vm0, %vm754_vm0  ;;  %v547_v34 = vadd.s32 56, %v4932_v2  ;;  %v548_v55 = vadd.s32 64, %v4932_v2  ;;  %v549_v46 = vadd.s32 72, %v4932_v2 }
  0xf6   : > { %3921 = vmatprep.mubr.msk.bf16.mxu0 %vm518_vm4, %v2006_v28  ;;  %v1142_v45 = vor.u32 %v1141_v59, %v1138_v18  ;;  %v2179_v61 = vor.u32 %v2178_v60, %v2175_v50  ;;  %v843_v63 = vsel %vm827_vm5, 65537, %v4569_v1  ;;  %v550_v3 = vadd.s32 80, %v4932_v2 }
  0xf7   : > { %v3548_v29 = vcombine.low %v843_v63, %v4938_v6  ;;  %v609_v19 = vand.u32 15, %v547_v34  ;;  %v616_v23 = vand.u32 15, %v548_v55  ;;  %v623_v5 = vand.u32 15, %v549_v46  ;;  %v5257_v63 = vld [vmem:[#allocation9 + $0x18] sm:$0xff]  }
  0xf8   : > { %v1143_v12 = vsel %vm1126_vm3, %v1134_v52, %v1142_v45  ;;  %v2180_v27 = vsel %vm877_vm9, %v2171_v9, %v2179_v61  ;;  %v1152_v28 = vsel %vm1126_vm3, %v1142_v45, %v5198_v47  ;;  %v2189_v10 = vsel %vm877_vm9, %v2179_v61, %v5200_v49 }
  0xf9   : > { %v905_v18 = vshrl.u32 %v3548_v29, 16  ;;  %v908_v21 = vshll.u32 %v3548_v29, 16  ;;  %vm771_vm6 = vcmp.le.s32.totalorder %v609_v19, 14  ;;  %vm756_vm7 = vcmp.ge.s32.totalorder %v616_v23, 1 }
  0xfa   : > { %3850 = vmatmul.mubr.msk.bf16.gmra.mrb[12].mxu1 %vm518_vm4, %v5169_v44  ;;  %vm1374_vm13 = vmpackc.low %vm771_vm6, %vm771_vm6  ;;  %vm5233_vm0 = vcmp.le.s32.totalorder %v623_v5, 14  ;;  %v630_v40 = vand.u32 15, %v550_v3  ;;  %v551_v9 = vadd.s32 88, %v4932_v2  ;;  %v5239_v30 = vadd.s32 96, %v4932_v2 }
  0xfb   : > { %3855 = vmatprep.mubr.msk.bf16.mxu1 %vm518_vm4, %v1143_v12  ;;  %v907_v31 = vrot.slane %v905_v18, 4  ;;  %v910_v16 = vrot.slane %v908_v21, 5  ;;  %v1390_v44 = vsel %vm1374_vm13, 65537, %v4569_v1  ;;  %vm829_vm5 = vmpackc.low %vm756_vm7, %vm756_vm7  ;;  %v5243_v0 = vadd.s32 104, %v4932_v2 }
  0xfc   : > { %v3574_v53 = vcombine.low %v4938_v6, %v1390_v44  ;;  %v845_v58 = vsel %vm829_vm5, 65537, %v4569_v1  ;;  %vm1376_vm6 = vmpackc.low %vm5233_vm0, %vm5233_vm0  ;;  %vm758_vm15 = vcmp.ge.s32.totalorder %v630_v40, 1  ;;  %v637_v59 = vand.u32 15, %v551_v9 }
  0xfd   : > { %3922 = vmatmul.mubr.msk.bf16.gmra.mrb[12].mxu0 %vm518_vm4, %v2008_v13  ;;  %v911_v50 = vor.u32 %v910_v16, %v907_v31  ;;  %v3549_v60 = vcombine.low %v845_v58, %v4938_v6  ;;  %v1392_v52 = vsel %vm1376_vm6, 65537, %v4569_v1  ;;  %vm831_vm7 = vmpackc.low %vm758_vm15, %vm758_vm15  ;;  %v644_v34 = vand.u32 15, %v5239_v30 }
  0xfe   : > { %3927 = vmatprep.mubr.msk.bf16.mxu0 %vm518_vm4, %v2180_v27  ;;  %v1450_v55 = vshrl.u32 %v3574_v53, 16  ;;  %v1453_v46 = vshll.u32 %v3574_v53, 16  ;;  %v3575_v45 = vcombine.low %v4938_v6, %v1392_v52  ;;  %v847_v61 = vsel %vm831_vm7, 65537, %v4569_v1 }
  0xff   : > { %v5261_v13 = vsel %vm877_vm9, %v5111_v57, %v911_v50  ;;  %v914_v3 = vshrl.u32 %v3549_v60, 16  ;;  %v917_v29 = vshll.u32 %v3549_v60, 16  ;;  %v3550_v19 = vcombine.low %v847_v61, %v4938_v6  ;;  %v5270_v60 = vld [vmem:[#allocation9 + $0x38] sm:$0xff]  }
 0x100   : > { %vm952_vm15 = vcmp.ne.s16.totalorder %v5261_v13, 0  ;;  %v1452_v23 = vrot.slane %v1450_v55, 3  ;;  %v1455_v5 = vrot.slane %v1453_v46, 4  ;;  %v1459_v12 = vshrl.u32 %v3575_v45, 16 }
 0x101   : > { %v961_v27 = vsel %vm952_vm15, %v5056_v24, 0  ;;  %v916_v18 = vrot.slane %v914_v3, 4  ;;  %v919_v21 = vrot.slane %v917_v29, 5  ;;  %v1462_v39 = vshll.u32 %v3575_v45, 16 }
 0x102   : > { %3856 = vmatmul.mubr.msk.bf16.vlgmr.msra.gmra.mrb[0].mxu1 %vm518_vm4, %v1152_v28  ;;  %v1154_v57 = vshrl.u32 %v961_v27, 16  ;;  %v1157_v40 = vshll.u32 %v961_v27, 16  ;;  %v1456_v9 = vor.u32 %v1455_v5, %v1452_v23  ;;  %v1461_v31 = vrot.slane %v1459_v12, 3 }
 0x103   : > { %3872 = vmatpush3.bf16.msra.mxu1 %v5087_v43  ;;  %v920_v16 = vor.u32 %v919_v21, %v916_v18  ;;  %v1464_v44 = vrot.slane %v1462_v39, 4  ;;  %v923_v53 = vshrl.u32 %v3550_v19, 16  ;;  %v926_v58 = vshll.u32 %v3550_v19, 16 }
 0x104   : > { %3889 = vmatprep.subr.bf16.mxu1 %v5257_v63  ;;  %v1156_v28 = vrot.slane %v1154_v57, 3  ;;  %v1159_v52 = vrot.slane %v1157_v40, 4  ;;  %v5275_v55 = vsel %vm1126_vm3, %v5147_v15, %v1456_v9  ;;  %vm5277_vm13 = vcmp.le.s32.totalorder %v637_v59, 14 }
 0x105   : > { %3928 = vmatmul.mubr.msk.bf16.vlgmr.msra.gmra.mrb[0].mxu0 %vm518_vm4, %v2189_v10  ;;  %vm1497_vm0 = vcmp.ne.s16.totalorder %v5275_v55, 0  ;;  %v5284_v43 = vsel %vm877_vm9, %v911_v50, %v920_v16  ;;  %v5286_v45 = vor.u32 %v1464_v44, %v1461_v31  ;;  %v925_v61 = vrot.slane %v923_v53, 4  ;;  %vm1378_vm7 = vmpackc.low %vm5277_vm13, %vm5277_vm13 }
 0x106   : > { %3944 = vmatpush3.bf16.msra.mxu0 %v5085_v42  ;;  %v1160_v3 = vor.u32 %v1159_v52, %v1156_v28  ;;  %v2156_v15 = vsel %vm1497_vm0, %v5063_v32, 0  ;;  %vm953_vm5 = vcmp.ne.s16.totalorder %v5284_v43, 0  ;;  %v928_v59 = vrot.slane %v926_v58, 5 }
 0x107   : > { %v2191_v29 = vshrl.u32 %v2156_v15, 16  ;;  %v2194_v10 = vshll.u32 %v2156_v15, 16  ;;  %v962_v50 = vsel %vm953_vm5, %v5063_v32, 0  ;;  %v5298_v19 = vsel %vm1126_vm3, %v1456_v9, %v5286_v45  ;;  %3961 = vmatprep.subr.bf16.mxu0 %v5270_v60 }
 0x108   : > { %v1161_v42 = vsel %vm1126_vm3, %v5198_v47, %v1160_v3  ;;  %v1163_v23 = vshrl.u32 %v962_v50, 16  ;;  %v1166_v5 = vshll.u32 %v962_v50, 16  ;;  %vm1498_vm6 = vcmp.ne.s16.totalorder %v5298_v19, 0 }
 0x109   : > { %3859 = vmatprep.mubr.msk.bf16.mxu1 %vm518_vm4, %v1161_v42  ;;  %v2193_v12 = vrot.slane %v2191_v29, 4  ;;  %v2196_v27 = vrot.slane %v2194_v10, 5  ;;  %v2157_v18 = vsel %vm1498_vm6, %v5072_v36, 0  ;;  %v929_v21 = vor.u32 %v928_v59, %v925_v61 }
 0x10a   : > { %v1165_v39 = vrot.slane %v1163_v23, 3  ;;  %v1168_v57 = vrot.slane %v1166_v5, 4  ;;  %v2200_v47 = vshrl.u32 %v2157_v18, 16  ;;  %v2203_v40 = vshll.u32 %v2157_v18, 16 }
 0x10b   : > { %v2197_v9 = vor.u32 %v2196_v27, %v2193_v12  ;;  %v5312_v31 = vsel %vm877_vm9, %v920_v16, %v929_v21  ;;  %v1394_v44 = vsel %vm1378_vm7, 65537, %v4569_v1  ;;  %vm760_vm13 = vcmp.ge.s32.totalorder %v644_v34, 1 }
 0x10c   : > { %v1169_v53 = vor.u32 %v1168_v57, %v1165_v39  ;;  %v2202_v58 = vrot.slane %v2200_v47, 4  ;;  %v2205_v28 = vrot.slane %v2203_v40, 5  ;;  %vm954_vm12 = vcmp.ne.s16.totalorder %v5312_v31, 0  ;;  %vm833_vm11 = vmpackc.low %vm760_vm13, %vm760_vm13 }
 0x10d   : > { %v2198_v52 = vsel %vm877_vm9, %v5200_v49, %v2197_v9  ;;  %v963_v46 = vsel %vm954_vm12, %v5072_v36, 0  ;;  %v3576_v16 = vcombine.low %v4938_v6, %v1394_v44  ;;  %v849_v61 = vsel %vm833_vm11, 65537, %v4569_v1 }
 0x10e   : > { %3931 = vmatprep.mubr.msk.bf16.mxu0 %vm518_vm4, %v2198_v52  ;;  %v1170_v30 = vsel %vm1126_vm3, %v1160_v3, %v1169_v53  ;;  %v5327_v34 = vor.u32 %v2205_v28, %v2202_v58  ;;  %v1172_v15 = vshrl.u32 %v963_v46, 16  ;;  %v1175_v59 = vshll.u32 %v963_v46, 16 }
 0x10f   : > { %3860 = vmatmul.mubr.msk.bf16.gmra.mrb[4].mxu1 %vm518_vm4, %v1170_v30  ;;  %v1468_v29 = vshrl.u32 %v3576_v16, 16  ;;  %v1471_v49 = vshll.u32 %v3576_v16, 16  ;;  %v3551_v10 = vcombine.low %v849_v61, %v4938_v6  ;;  %v651_v50 = vand.u32 15, %v5243_v0 }
 0x110   : > { %v2207_v42 = vsel %vm877_vm9, %v2197_v9, %v5327_v34  ;;  %v1174_v23 = vrot.slane %v1172_v15, 3  ;;  %v1177_v5 = vrot.slane %v1175_v59, 4  ;;  %v555_v12 = vadd.s32 120, %v4932_v2 }
 0x111   : > { %3932 = vmatmul.mubr.msk.bf16.gmra.mrb[4].mxu0 %vm518_vm4, %v2207_v42  ;;  %v1470_v3 = vrot.slane %v1468_v29, 3  ;;  %v1473_v27 = vrot.slane %v1471_v49, 4  ;;  %v932_v18 = vshrl.u32 %v3551_v10, 16  ;;  %v935_v39 = vshll.u32 %v3551_v10, 16 }
 0x112   : > { %v1178_v57 = vor.u32 %v1177_v5, %v1174_v23  ;;  %vm777_vm11 = vcmp.le.s32.totalorder %v651_v50, 14  ;;  %v665_v47 = vand.u32 15, %v555_v12  ;;  %v1199_v40 = vshrl.u32 %v5205_v22, 16 }
 0x113   : > { %v1474_v44 = vor.u32 %v1473_v27, %v1470_v3  ;;  %v934_v0 = vrot.slane %v932_v18, 4  ;;  %v937_v58 = vrot.slane %v935_v39, 5  ;;  %vm1380_vm7 = vmpackc.low %vm777_vm11, %vm777_vm11  ;;  %v1202_v9 = vshll.u32 %v5205_v22, 16 }
 0x114   : > { %v1179_v28 = vsel %vm1126_vm3, %v1169_v53, %v1178_v57  ;;  %v1396_v2 = vsel %vm1380_vm7, 65537, %v4569_v1  ;;  %vm779_vm13 = vcmp.le.s32.totalorder %v665_v47, 14  ;;  %v5340_v52 = vrot.slane %v1199_v40, 3 }
 0x115   : > { %3863 = vmatprep.mubr.msk.bf16.mxu1 %vm518_vm4, %v1179_v28  ;;  %v5345_v46 = vsel %vm1126_vm3, %v5286_v45, %v1474_v44  ;;  %v938_v16 = vor.u32 %v937_v58, %v934_v0  ;;  %v3577_v61 = vcombine.low %v4938_v6, %v1396_v2  ;;  %vm1382_vm10 = vmpackc.low %vm779_vm13, %vm779_vm13  ;;  %v1204_v30 = vrot.slane %v1202_v9, 4 }
 0x116   : > { %vm1499_vm11 = vcmp.ne.s16.totalorder %v5345_v46, 0  ;;  %v1398_v22 = vsel %vm1382_vm10, 65537, %v4569_v1  ;;  %v1521_v53 = vor.u32 %v5076_v38, %v5074_v37  ;;  %v1523_v15 = vshrl.u32 %v5098_v51, 16 }
 0x117   : > { %v2158_v59 = vsel %vm1499_vm11, %v5083_v41, 0  ;;  %v5357_v45 = vsel %vm877_vm9, %v929_v21, %v938_v16  ;;  %v1477_v29 = vshrl.u32 %v3577_v61, 16  ;;  %v1480_v49 = vshll.u32 %v3577_v61, 16 }
 0x118   : > { %v2209_v10 = vshrl.u32 %v2158_v59, 16  ;;  %v2212_v50 = vshll.u32 %v2158_v59, 16  ;;  %vm955_vm7 = vcmp.ne.s16.totalorder %v5357_v45, 0  ;;  %v5362_v1 = vsel %vm877_vm9, %v938_v16, %v5186_v14 }
 0x119   : > { %v964_v42 = vsel %vm955_vm7, %v5083_v41, 0  ;;  %v1479_v23 = vrot.slane %v1477_v29, 3  ;;  %v1482_v5 = vrot.slane %v1480_v49, 4  ;;  %vm956_vm10 = vcmp.ne.s16.totalorder %v5362_v1, 0 }
 0x11a   : > { %v2211_v21 = vrot.slane %v2209_v10, 4  ;;  %v2214_v12 = vrot.slane %v2212_v50, 5  ;;  %v1181_v3 = vshrl.u32 %v964_v42, 16  ;;  %v1184_v27 = vshll.u32 %v964_v42, 16 }
 0x11b   : > { %v1483_v18 = vor.u32 %v1482_v5, %v1479_v23  ;;  %v965_v39 = vsel %vm956_vm10, %v5092_v48, 0  ;;  %v3578_v47 = vcombine.low %v4938_v6, %v1398_v22  ;;  %v1205_v40 = vor.u32 %v1204_v30, %v5340_v52  ;;  %v2387_v6 = vld [vmem:[#allocation2 + $0x10] sm:$0xf8] }
 0x11c   : > { %v2215_v0 = vor.u32 %v2214_v12, %v2211_v21  ;;  %v1183_v58 = vrot.slane %v1181_v3, 3  ;;  %v1186_v9 = vrot.slane %v1184_v27, 4  ;;  %v1190_v28 = vshrl.u32 %v965_v39, 16  ;;  %v2152_v12 = vld [vmem:[#allocation2 + $0x48] sm:$0x1f] }
 0x11d   : > { %v5374_v2 = vsel %vm1126_vm3, %v1474_v44, %v1483_v18  ;;  %v1193_v16 = vshll.u32 %v965_v39, 16  ;;  %v1486_v61 = vshrl.u32 %v3578_v47, 16  ;;  %v1489_v59 = vshll.u32 %v3578_v47, 16 }
 0x11e   : > { %v2216_v29 = vsel %vm877_vm9, %v5327_v34, %v2215_v0  ;;  %v1187_v49 = vor.u32 %v1186_v9, %v1183_v58  ;;  %vm1500_vm13 = vcmp.ne.s16.totalorder %v5374_v2, 0  ;;  %v1192_v10 = vrot.slane %v1190_v28, 3 }
 0x11f   : > { %3935 = vmatprep.mubr.msk.bf16.mxu0 %vm518_vm4, %v2216_v29  ;;  %v2159_v52 = vsel %vm1500_vm13, %v5092_v48, 0  ;;  %v1195_v30 = vrot.slane %v1193_v16, 4  ;;  %v1488_v44 = vrot.slane %v1486_v61, 3  ;;  %v1491_v22 = vrot.slane %v1489_v59, 4 }
 0x120   : > { %v1188_v50 = vsel %vm1126_vm3, %v1178_v57, %v1187_v49  ;;  %v2218_v42 = vshrl.u32 %v2159_v52, 16  ;;  %v2221_v23 = vshll.u32 %v2159_v52, 16  ;;  %v1525_v5 = vrot.slane %v1523_v15, 4 }
 0x121   : > { %3864 = vmatmul.mubr.msk.bf16.gmra.mrb[8].mxu1 %vm518_vm4, %v1188_v50  ;;  %v1196_v34 = vor.u32 %v1195_v30, %v1192_v10  ;;  %v5385_v21 = vor.u32 %v1491_v22, %v1488_v44  ;;  %v1526_v3 = vshll.u32 %v5098_v51, 16  ;;  %v2396_v27 = vsel %vm5765_vm1, %v2387_v6, 0 }
 0x122   : > { %v2220_v39 = vrot.slane %v2218_v42, 4  ;;  %v2223_v47 = vrot.slane %v2221_v23, 5  ;;  %v2397_v57 = vsel %vm950_vm8, %v5056_v24, 0  ;;  %v2408_v58 = vshrl.u32 %v2396_v27, 16 }
 0x123   : > { %v1197_v15 = vsel %vm1126_vm3, %v1187_v49, %v1196_v34  ;;  %v5396_v9 = vsel %vm1126_vm3, %v1483_v18, %v5385_v21  ;;  %v1206_v28 = vsel %vm1126_vm3, %v1196_v34, %v1205_v40  ;;  %vm1502_vm2 = vcmp.ne.s16.totalorder %v5385_v21, 0 }
 0x124   : > { %v2224_v51 = vor.u32 %v2223_v47, %v2220_v39  ;;  %3867 = vmatprep.mubr.msk.bf16.mxu1 %vm518_vm4, %v1197_v15  ;;  %vm1501_vm1 = vcmp.ne.s16.totalorder %v5396_v9, 0  ;;  %v2161_v11 = vsel %vm1502_vm2, %v2152_v12, 0  ;;  %v1528_v16 = vrot.slane %v1526_v3, 5 }
 0x125   : > { %v2160_v61 = vsel %vm1501_vm1, %v5106_v54, 0  ;;  %v2236_v59 = vshrl.u32 %v2161_v11, 16  ;;  %v2239_v18 = vshll.u32 %v2161_v11, 16  ;;  %v2410_v29 = vrot.slane %v2408_v58, 3 }
 0x126   : > { %v2225_v40 = vsel %vm877_vm9, %v2215_v0, %v2224_v51  ;;  %v2227_v49 = vshrl.u32 %v2160_v61, 16  ;;  %v2230_v10 = vshll.u32 %v2160_v61, 16  ;;  %v1529_v6 = vor.u32 %v1528_v16, %v1525_v5 }
 0x127   : > { %3936 = vmatmul.mubr.msk.bf16.gmra.mrb[8].mxu0 %vm518_vm4, %v2225_v40  ;;  %v2238_v52 = vrot.slane %v2236_v59, 4  ;;  %v2241_v30 = vrot.slane %v2239_v18, 5  ;;  %v2411_v44 = vshll.u32 %v2396_v27, 16  ;;  %v2416_v22 = vshrl.u32 %v2397_v57, 16 }
 0x128   : > { %v2229_v50 = vrot.slane %v2227_v49, 4  ;;  %v2232_v42 = vrot.slane %v2230_v10, 5  ;;  %v1530_v23 = vsel %vm877_vm9, %v1521_v53, %v1529_v6  ;;  %v2419_v34 = vshll.u32 %v2397_v57, 16 }
 0x129   : > { %3868 = vmatmul.mubr.msk.bf16.gmra.mrb[12].mxu1 %vm518_vm4, %v1206_v28  ;;  %v2242_v0 = vor.u32 %v2241_v30, %v2238_v52  ;;  %v2413_v12 = vrot.slane %v2411_v44, 4  ;;  %v2418_v3 = vrot.slane %v2416_v22, 3  ;;  %v1538_v5 = vor.u32 %v5184_v62, %v5182_v8 }
 0x12a   : > { %v2233_v39 = vor.u32 %v2232_v42, %v2229_v50  ;;  %3873 = vmatprep.mubr.msk.bf16.mxu1 %vm518_vm4, %v1530_v23  ;;  %v2421_v27 = vrot.slane %v2419_v34, 4  ;;  %v2398_v47 = vsel %vm951_vm14, %v5063_v32, 0  ;;  %v1506_v37 = vsel %vm1497_vm0, %v5056_v24, 0 }
 0x12b   : > { %v2414_v38 = vor.u32 %v2413_v12, %v2410_v29  ;;  %v1539_v53 = vsel %vm877_vm9, %v1529_v6, %v1538_v5  ;;  %v2425_v57 = vshrl.u32 %v2398_v47, 16  ;;  %v2428_v58 = vshll.u32 %v2398_v47, 16 }
 0x12c   : > { %v2234_v15 = vsel %vm877_vm9, %v2224_v51, %v2233_v39  ;;  %v2243_v8 = vsel %vm877_vm9, %v2233_v39, %v2242_v0  ;;  %v2422_v62 = vor.u32 %v2421_v27, %v2418_v3  ;;  %v1541_v28 = vshrl.u32 %v1506_v37, 16 }
 0x12d   : > { %3939 = vmatprep.mubr.msk.bf16.mxu0 %vm518_vm4, %v2234_v15  ;;  %v2427_v11 = vrot.slane %v2425_v57, 3  ;;  %v2430_v4 = vrot.slane %v2428_v58, 4  ;;  %v1544_v16 = vshll.u32 %v1506_v37, 16  ;;  %v2399_v24 = vsel %vm952_vm15, %v5072_v36, 0 }
 0x12e   : > { %v2423_v61 = vsel %vm1126_vm3, %v2414_v38, %v2422_v62  ;;  %v1543_v59 = vrot.slane %v1541_v28, 4  ;;  %v2434_v18 = vshrl.u32 %v2399_v24, 16  ;;  %v2437_v29 = vshll.u32 %v2399_v24, 16 }
 0x12f   : > { %3940 = vmatmul.mubr.msk.bf16.gmra.mrb[12].mxu0 %vm518_vm4, %v2243_v8  ;;  %v2431_v51 = vor.u32 %v2430_v4, %v2427_v11  ;;  %v1546_v40 = vrot.slane %v1544_v16, 5  ;;  %v1507_v49 = vsel %vm1498_vm6, %v5063_v32, 0  ;;  %v2400_v10 = vsel %vm953_vm5, %v5083_v41, 0  ;;  %v5452_v8 = vld [vmem:[#allocation9 + $0x40] sm:$0xff]   ;;  %v5461_v4 = vld [vmem:[#allocation2 + $0x48] sm:$0xff] }
 0x130   : > { %3945 = vmatprep.mubr.msk.bf16.mxu0 %vm518_vm4, %v2423_v61  ;;  %v2436_v6 = vrot.slane %v2434_v18, 3  ;;  %v2439_v52 = vrot.slane %v2437_v29, 4  ;;  %v1550_v30 = vshrl.u32 %v1507_v49, 16  ;;  %v1553_v44 = vshll.u32 %v1507_v49, 16 }
 0x131   : > { %v1778_v22 = vshll.u32 %v5152_v17, 16  ;;  %3874 = vmatmul.mubr.msk.bf16.vlgmr.msra.gmra.mrb[0].mxu1 %vm518_vm4, %v1539_v53  ;;  %v1547_v50 = vor.u32 %v1546_v40, %v1543_v59  ;;  %v2443_v42 = vshrl.u32 %v2400_v10, 16  ;;  %v2446_v23 = vshll.u32 %v2400_v10, 16 }
 0x132   : > { %v2440_v34 = vor.u32 %v2439_v52, %v2436_v6  ;;  %v1552_v0 = vrot.slane %v1550_v30, 4  ;;  %v1555_v32 = vrot.slane %v1553_v44, 5  ;;  %v1508_v12 = vsel %vm1499_vm11, %v5072_v36, 0  ;;  %3890 = vmatpush3.bf16.msra.mxu1 %v5257_v63  ;;  %v1334_v6 = vld [vmem:[#allocation2 + $0x40] sm:$0x1f] }
 0x133   : > { %v1548_v3 = vsel %vm877_vm9, %v1538_v5, %v1547_v50  ;;  %v2445_v39 = vrot.slane %v2443_v42, 3  ;;  %v2448_v27 = vrot.slane %v2446_v23, 4  ;;  %v1559_v47 = vshrl.u32 %v1508_v12, 16 }
 0x134   : > { %v2432_v37 = vsel %vm1126_vm3, %v2422_v62, %v2431_v51  ;;  %3877 = vmatprep.mubr.msk.bf16.mxu1 %vm518_vm4, %v1548_v3  ;;  %v1556_v38 = vor.u32 %v1555_v32, %v1552_v0  ;;  %v1562_v53 = vshll.u32 %v1508_v12, 16  ;;  %v2401_v57 = vsel %vm954_vm12, %v5092_v48, 0 }
 0x135   : > { %v2441_v58 = vsel %vm1126_vm3, %v2431_v51, %v2440_v34  ;;  %v1561_v36 = vrot.slane %v1559_v47, 4  ;;  %v2452_v15 = vshrl.u32 %v2401_v57, 16  ;;  %v2455_v63 = vshll.u32 %v2401_v57, 16 }
 0x136   : > { %v1557_v5 = vsel %vm877_vm9, %v1547_v50, %v1556_v38  ;;  %v1564_v28 = vrot.slane %v1562_v53, 5  ;;  %v1509_v62 = vsel %vm1500_vm13, %v5083_v41, 0  ;;  %v2402_v11 = vsel %vm955_vm7, %v5106_v54, 0 }
 0x137   : > { %3946 = vmatmul.mubr.msk.bf16.vlgmr.msra.gmra.mrb[0].mxu0 %vm518_vm4, %v2432_v37  ;;  %v2449_v16 = vor.u32 %v2448_v27, %v2445_v39  ;;  %v2454_v24 = vrot.slane %v2452_v15, 3  ;;  %v2457_v61 = vrot.slane %v2455_v63, 4  ;;  %v1568_v59 = vshrl.u32 %v1509_v62, 16  ;;  %v5480_v39 = vld [vmem:[#allocation2 + $0x50] sm:$0xf] }
 0x138   : > { %3962 = vmatpush3.bf16.msra.mxu0 %v5270_v60  ;;  %3949 = vmatprep.mubr.msk.bf16.mxu0 %vm518_vm4, %v2441_v58  ;;  %v1565_v18 = vor.u32 %v1564_v28, %v1561_v36  ;;  %v1571_v29 = vshll.u32 %v1509_v62, 16  ;;  %v2461_v51 = vshrl.u32 %v2402_v11, 16  ;;  %v2464_v41 = vshll.u32 %v2402_v11, 16  ;;  %v1737_v27 = vld [vmem:[#allocation2 + $0x8] sm:$0xf8] }
 0x139   : > { %3878 = vmatmul.mubr.msk.bf16.gmra.mrb[4].mxu1 %vm518_vm4, %v1557_v5  ;;  %v2458_v40 = vor.u32 %v2457_v61, %v2454_v24  ;;  %v1570_v54 = vrot.slane %v1568_v59, 4  ;;  %v1510_v49 = vsel %vm1501_vm1, %v5092_v48, 0  ;;  %v2403_v10 = vsel %vm956_vm10, %v5461_v4, 0  ;;  %3979 = vmatprep.subr.bf16.mxu0 %v5452_v8 }
 0x13a   : > { %v1566_v60 = vsel %vm877_vm9, %v1556_v38, %v1565_v18  ;;  %v1573_v52 = vrot.slane %v1571_v29, 5  ;;  %v2463_v30 = vrot.slane %v2461_v51, 3  ;;  %v2466_v44 = vrot.slane %v2464_v41, 4 }
 0x13b   : > { %v2450_v50 = vsel %vm1126_vm3, %v2440_v34, %v2449_v16  ;;  %3881 = vmatprep.mubr.msk.bf16.mxu1 %vm518_vm4, %v1566_v60  ;;  %v1577_v42 = vshrl.u32 %v1510_v49, 16  ;;  %v1580_v23 = vshll.u32 %v1510_v49, 16  ;;  %v2470_v0 = vshrl.u32 %v2403_v10, 16 }
 0x13c   : > { %v2459_v48 = vsel %vm1126_vm3, %v2449_v16, %v2458_v40  ;;  %v1574_v32 = vor.u32 %v1573_v52, %v1570_v54  ;;  %v2473_v12 = vshll.u32 %v2403_v10, 16  ;;  %v1511_v3 = vsel %vm1502_vm2, %v1334_v6, 0 }
 0x13d   : > { %v1579_v47 = vrot.slane %v1577_v42, 4  ;;  %v1582_v37 = vrot.slane %v1580_v23, 5  ;;  %v2472_v38 = vrot.slane %v2470_v0, 3  ;;  %v1586_v53 = vshrl.u32 %v1511_v3, 16  ;;  %v5501_v42 = vld [vmem:[#allocation2 + $0x10] sm:$0xf0] }
 0x13e   : > { %v1575_v34 = vsel %vm877_vm9, %v1565_v18, %v1574_v32  ;;  %v2467_v57 = vor.u32 %v2466_v44, %v2463_v30  ;;  %v2475_v58 = vrot.slane %v2473_v12, 4  ;;  %v1589_v36 = vshll.u32 %v1511_v3, 16  ;;  %v5504_v0 = vld [vmem:[#allocation2 + $0x20] sm:$0xff]  ;;  %v5515_v3 = vld [vmem:[#allocation2 + $0x28] sm:$0xff] }
 0x13f   : > { %3950 = vmatmul.mubr.msk.bf16.gmra.mrb[4].mxu0 %vm518_vm4, %v2450_v50  ;;  %v1583_v15 = vor.u32 %v1582_v37, %v1579_v47  ;;  %v1588_v63 = vrot.slane %v1586_v53, 4  ;;  %vm5821_vm8 = vcmp.ne.s16.totalorder %v5186_v14, 0  ;;  %vm5822_vm14 = vcmp.ne.s16.totalorder %v5004_v56, 0 }
 0x140   : > { %v2404_v5 = vsel %vm5821_vm8, %v5480_v39, 0  ;;  %v1746_v28 = vsel %vm5822_vm14, %v1737_v27, 0  ;;  %3953 = vmatprep.mubr.msk.bf16.mxu0 %vm518_vm4, %v2459_v48  ;;  %v2476_v62 = vor.u32 %v2475_v58, %v2472_v38  ;;  %v1591_v11 = vrot.slane %v1589_v36, 5  ;;  %v5520_v27 = vld [vmem:[#allocation2 + $0x30] sm:$0xff] }
 0x141   : > { %v2479_v16 = vshrl.u32 %v2404_v5, 16  ;;  %v2482_v24 = vshll.u32 %v2404_v5, 16  ;;  %3882 = vmatmul.mubr.msk.bf16.gmra.mrb[8].mxu1 %vm518_vm4, %v1575_v34  ;;  %v1584_v61 = vsel %vm877_vm9, %v1574_v32, %v1583_v15  ;;  %v1758_v59 = vshrl.u32 %v1746_v28, 16  ;;  %v5512_v32 = vld [vmem:[#allocation2 + $0x18] sm:$0xff] }
 0x142   : > { %v1761_v18 = vshll.u32 %v1746_v28, 16  ;;  %v1766_v29 = vshrl.u32 %v5069_v33, 16  ;;  %3885 = vmatprep.mubr.msk.bf16.mxu1 %vm518_vm4, %v1584_v61  ;;  %v1592_v14 = vor.u32 %v1591_v11, %v1588_v63  ;;  %v1769_v10 = vshll.u32 %v5069_v33, 16  ;;  %v5529_v5 = vld [vmem:[#allocation2 + $0x38] sm:$0xff] }
 0x143   : > { %v2481_v51 = vrot.slane %v2479_v16, 3  ;;  %v2484_v56 = vrot.slane %v2482_v24, 4  ;;  %v1760_v41 = vrot.slane %v1758_v59, 3  ;;  %v1777_v6 = vrot.slane %v1775_v35, 3 }
 0x144   : > { %v1763_v54 = vrot.slane %v1761_v18, 4  ;;  %v1768_v49 = vrot.slane %v1766_v29, 3  ;;  %v2468_v60 = vsel %vm1126_vm3, %v2458_v40, %v2467_v57  ;;  %v1780_v52 = vrot.slane %v1778_v22, 4 }
 0x145   : > { %v2477_v30 = vsel %vm1126_vm3, %v2467_v57, %v2476_v62  ;;  %v1771_v50 = vrot.slane %v1769_v10, 4  ;;  %v1593_v23 = vsel %vm877_vm9, %v1583_v15, %v1592_v14  ;;  %v1749_v33 = vsel %vm952_vm15, %v5504_v0, 0 }
 0x146   : > { %v1764_v44 = vor.u32 %v1763_v54, %v1760_v41  ;;  %v2485_v35 = vor.u32 %v2484_v56, %v2481_v51  ;;  %v1784_v17 = vshrl.u32 %v1749_v33, 16  ;;  %v1787_v22 = vshll.u32 %v1749_v33, 16  ;;  %v4307_v41 = vld [vmem:[#allocation2 + $0x40] sm:$0xff] }
 0x147   : > { %3954 = vmatmul.mubr.msk.bf16.gmra.mrb[8].mxu0 %vm518_vm4, %v2468_v60  ;;  %v1772_v40 = vor.u32 %v1771_v50, %v1768_v49  ;;  %v2642_v48 = vrot.slane %v5501_v42, 4  ;;  %v2643_v12 = vrot.slane %v5512_v32, 4  ;;  %v1750_v13 = vsel %vm953_vm5, %v5515_v3, 0 }
 0x148   : > { %3957 = vmatprep.mubr.msk.bf16.mxu0 %vm518_vm4, %v2477_v30  ;;  %v1751_v47 = vsel %vm954_vm12, %v5520_v27, 0  ;;  %v1781_v38 = vor.u32 %v1780_v52, %v1777_v6  ;;  %v1786_v53 = vrot.slane %v1784_v17, 3  ;;  %v1789_v34 = vrot.slane %v1787_v22, 4 }
 0x149   : > { %3886 = vmatmul.mubr.msk.bf16.gmra.mrb[12].mxu1 %vm518_vm4, %v1593_v23  ;;  %v1773_v37 = vsel %vm1126_vm3, %v1764_v44, %v1772_v40  ;;  %v1793_v57 = vshrl.u32 %v1750_v13, 16  ;;  %v1796_v58 = vshll.u32 %v1750_v13, 16  ;;  %v1802_v43 = vshrl.u32 %v1751_v47, 16 }
 0x14a   : > { %3891 = vmatprep.mubr.msk.bf16.mxu1 %vm518_vm4, %v1773_v37  ;;  %v1790_v36 = vor.u32 %v1789_v34, %v1786_v53  ;;  %v1805_v15 = vshll.u32 %v1751_v47, 16  ;;  %v2486_v63 = vsel %vm1126_vm3, %v2476_v62, %v2485_v35  ;;  %v1752_v31 = vsel %vm955_vm7, %v5529_v5, 0 }
 0x14b   : > { %vm5823_vm12 = vcmask 1043456   ;;  %v1782_v11 = vsel %vm1126_vm3, %v1772_v40, %v1781_v38  ;;  %v1804_v16 = vrot.slane %v1802_v43, 3  ;;  %v1795_v61 = vrot.slane %v1793_v57, 3 }
 0x14c   : > { %v2644_v28 = vsel %vm5823_vm12, %v2642_v48, %v2643_v12  ;;  %v1807_v24 = vrot.slane %v1805_v15, 4  ;;  %v1798_v59 = vrot.slane %v1796_v58, 4  ;;  %v1811_v18 = vshrl.u32 %v1752_v31, 16  ;;  %vm5824_vm15 = vmmov %vm5823_vm12  ;;  %v2802_v58 = vld [vmem:[#allocation2 + $0x50] sm:$0x1f] }
 0x14d   : > { %v1814_v29 = vshll.u32 %v1752_v31, 16  ;;  %v2645_v62 = vrot.slane %v5504_v0, 4  ;;  %v1791_v14 = vsel %vm1126_vm3, %v1781_v38, %v1790_v36  ;;  %v1753_v54 = vsel %vm956_vm10, %v4307_v41, 0  ;;  %vm5825_vm5 = vmmov %vm5823_vm12 }
 0x14e   : > { %v1808_v45 = vor.u32 %v1807_v24, %v1804_v16  ;;  %v1813_v51 = vrot.slane %v1811_v18, 3  ;;  %v2647_v49 = vrot.slane %v5515_v3, 4  ;;  %v1799_v10 = vor.u32 %v1798_v59, %v1795_v61  ;;  %vm5827_vm10 = vmmov %vm5825_vm5 }
 0x14f   : > { %3958 = vmatmul.mubr.msk.bf16.gmra.mrb[12].mxu0 %vm518_vm4, %v2486_v63  ;;  %v1816_v56 = vrot.slane %v1814_v29, 4  ;;  %v1820_v60 = vshrl.u32 %v1753_v54, 16  ;;  %v1823_v52 = vshll.u32 %v1753_v54, 16  ;;  %v2646_v30 = vsel %vm5824_vm15, %v2643_v12, %v2645_v62  ;;  %vm5828_vm8 = vmmov %vm5825_vm5 }
 0x150   : > { %3963 = vmatprep.mubr.msk.bf16.mxu0 %vm518_vm4, %v2644_v28  ;;  %v2648_v50 = vsel %vm5825_vm5, %v2645_v62, %v2647_v49  ;;  %v1800_v23 = vsel %vm1126_vm3, %v1790_v36, %v1799_v10  ;;  %v1809_v1 = vsel %vm1126_vm3, %v1799_v10, %v1808_v45  ;;  %v2649_v40 = vrot.slane %v5520_v27, 4 }
 0x151   : > { %3892 = vmatmul.mubr.msk.bf16.vlgmr.msra.gmra.mrb[0].mxu1 %vm518_vm4, %v1782_v11  ;;  %v1817_v6 = vor.u32 %v1816_v56, %v1813_v51  ;;  %v1822_v33 = vrot.slane %v1820_v60, 3  ;;  %v1825_v35 = vrot.slane %v1823_v52, 4  ;;  %v2651_v17 = vrot.slane %v5529_v5, 4 }
 0x152   : > { %3895 = vmatprep.mubr.msk.bf16.mxu1 %vm518_vm4, %v1791_v14  ;;  %v1829_v22 = vshrl.u32 %v5209_v20, 16  ;;  %v1832_v48 = vshll.u32 %v5209_v20, 16  ;;  %vm5826_vm7 = vcmp.ne.s16.totalorder %v5017_v7, 0  ;;  %v2653_v47 = vrot.slane %v4307_v41, 4 }
 0x153   : > { %v1818_v44 = vsel %vm1126_vm3, %v1808_v45, %v1817_v6  ;;  %v1826_v12 = vor.u32 %v1825_v35, %v1822_v33  ;;  %v2803_v13 = vsel %vm5826_vm7, %v5501_v42, 0  ;;  %v2809_v37 = vsel %vm1500_vm13, %v4307_v41, 0 }
 0x154   : > { %v2652_v38 = vsel %vm5828_vm8, %v2649_v40, %v2651_v17  ;;  %v2655_v53 = vrot.slane %v5461_v4, 4  ;;  %v1831_v34 = vrot.slane %v1829_v22, 3  ;;  %v2868_v57 = vshrl.u32 %v2809_v37, 16 }
 0x155   : > { %v1834_v36 = vrot.slane %v1832_v48, 4  ;;  %vm5829_vm14 = vcmp.ne.s16.totalorder %v5061_v26, 0  ;;  %v2871_v7 = vshll.u32 %v2809_v37, 16  ;;  %v2810_v42 = vsel %vm1501_vm1, %v5461_v4, 0  ;;  %vm5830_vm1 = vmmov %vm5825_vm5 }
 0x156   : > { %v2804_v20 = vsel %vm5829_vm14, %v5512_v32, 0  ;;  %v1827_v2 = vsel %vm1126_vm3, %v1817_v6, %v1826_v12  ;;  %v2815_v43 = vshrl.u32 %v2803_v13, 16  ;;  %v2818_v15 = vshll.u32 %v2803_v13, 16  ;;  %vm5831_vm13 = vmmov %vm5830_vm1 }
 0x157   : > { %3964 = vmatmul.mubr.msk.bf16.vlgmr.msra.gmra.mrb[0].mxu0 %vm518_vm4, %v2646_v30  ;;  %v2877_v63 = vshrl.u32 %v2810_v42, 16  ;;  %v2870_v31 = vrot.slane %v2868_v57, 4  ;;  %v2873_v28 = vrot.slane %v2871_v7, 5  ;;  %v2880_v11 = vshll.u32 %v2810_v42, 16  ;;  %v4294_v42 = vld [vmem:[#allocation11] sm:$0xff]  }
 0x158   : > { %3980 = vmatpush3.bf16.msra.mxu0 %v5452_v8  ;;  %3967 = vmatprep.mubr.msk.bf16.mxu0 %vm518_vm4, %v2648_v50  ;;  %v2650_v8 = vsel %vm5827_vm10, %v2647_v49, %v2649_v40  ;;  %v2811_v26 = vsel %vm1502_vm2, %v2802_v58, 0  ;;  %v2823_v32 = vshrl.u32 %v2804_v20, 16  ;;  %v2826_v9 = vshll.u32 %v2804_v20, 16 }
 0x159   : > { %3896 = vmatmul.mubr.msk.bf16.gmra.mrb[4].mxu1 %vm518_vm4, %v1800_v23  ;;  %v2879_v4 = vrot.slane %v2877_v63, 4  ;;  %v2886_v16 = vshrl.u32 %v2811_v26, 16  ;;  %v1835_v24 = vor.u32 %v1834_v36, %v1831_v34  ;;  %v2882_v61 = vrot.slane %v2880_v11, 5  ;;  %3997 = vmatprep.subr.bf16.mxu1 %v4294_v42  ;;  %v4298_v63 = vld [vmem:[#allocation11 + $0x20] sm:$0xff]   ;;  %v4301_v11 = vld [vmem:[#allocation11 + $0x38] sm:$0xff]  }
 0x15a   : > { %3899 = vmatprep.mubr.msk.bf16.mxu1 %vm518_vm4, %v1809_v1  ;;  %v2889_v59 = vshll.u32 %v2811_v26, 16  ;;  %v2654_v18 = vsel %vm5830_vm1, %v2651_v17, %v2653_v47  ;;  %v2656_v29 = vsel %vm5831_vm13, %v2653_v47, %v2655_v53  ;;  %v2817_v14 = vrot.slane %v2815_v43, 4  ;;  %3998 = vmatpush3.bf16.msra.mxu1 %v4294_v42  ;;  %v4296_v43 = vld [vmem:[#allocation11 + $0x10] sm:$0xff]  }
 0x15b   : > { %v2888_v62 = vrot.slane %v2886_v16, 4  ;;  %v2874_v45 = vor.u32 %v2873_v28, %v2870_v31  ;;  %v2883_v21 = vor.u32 %v2882_v61, %v2879_v4  ;;  %v2820_v56 = vrot.slane %v2818_v15, 5  ;;  %v4297_v15 = vld [vmem:[#allocation11 + $0x18] sm:$0xff]   ;;  %v4299_v31 = vld [vmem:[#allocation11 + $0x28] sm:$0xff]   ;;  %v4300_v28 = vld [vmem:[#allocation11 + $0x30] sm:$0xff]  }
 0x15c   : > { %v2891_v51 = vrot.slane %v2889_v59, 5  ;;  %v2825_v41 = vrot.slane %v2823_v32, 4  ;;  %v2828_v54 = vrot.slane %v2826_v9, 5  ;;  %vm5832_vm2 = vcmp.ne.s16.totalorder %v5162_v25, 0 }
 0x15d   : > { %v2805_v49 = vsel %vm5832_vm2, %v5504_v0, 0  ;;  %v1836_v10 = vsel %vm1126_vm3, %v1826_v12, %v1835_v24  ;;  %v2806_v6 = vsel %vm1497_vm0, %v5515_v3, 0  ;;  %v2884_v60 = vsel %vm877_vm9, %v2874_v45, %v2883_v21  ;;  %vm5833_vm3 = vmmov %vm5830_vm1 }
 0x15e   : > { %v2892_v52 = vor.u32 %v2891_v51, %v2888_v62  ;;  %v2657_v30 = vrot.slane %v5480_v39, 4  ;;  %v2835_v50 = vshll.u32 %v2805_v49, 16  ;;  %v2821_v0 = vor.u32 %v2820_v56, %v2817_v14 }
 0x15f   : > { %3968 = vmatmul.mubr.msk.bf16.gmra.mrb[4].mxu0 %vm518_vm4, %v2650_v8  ;;  %v2829_v23 = vor.u32 %v2828_v54, %v2825_v41  ;;  %v2841_v1 = vshrl.u32 %v2806_v6, 16  ;;  %v2844_v55 = vshll.u32 %v2806_v6, 16  ;;  %v2807_v39 = vsel %vm1498_vm6, %v5520_v27, 0  ;;  %v5626_v54 = vld [vmem:[%s5834_s21] ss:$0 sm:$0xff] }
 0x160   : > { %3971 = vmatprep.mubr.msk.bf16.mxu0 %vm518_vm4, %v2652_v38  ;;  %v2893_v25 = vsel %vm877_vm9, %v2883_v21, %v2892_v52  ;;  %v2658_v3 = vsel %vm5833_vm3, %v2655_v53, %v2657_v30  ;;  %v2837_v35 = vrot.slane %v2835_v50, 5  ;;  %v2808_v48 = vsel %vm1499_vm11, %v5529_v5, 0 }
 0x161   : > { %3900 = vmatmul.mubr.msk.bf16.gmra.mrb[8].mxu1 %vm518_vm4, %v1818_v44  ;;  %v2832_v44 = vshrl.u32 %v2805_v49, 16  ;;  %v2830_v40 = vsel %vm877_vm9, %v2821_v0, %v2829_v23  ;;  %v2843_v17 = vrot.slane %v2841_v1, 4  ;;  %v2846_v22 = vrot.slane %v2844_v55, 5 }
 0x162   : > { %3903 = vmatprep.mubr.msk.bf16.mxu1 %vm518_vm4, %v1827_v2  ;;  %v2850_v13 = vshrl.u32 %v2807_v39, 16  ;;  %v2853_v8 = vshll.u32 %v2807_v39, 16  ;;  %v2859_v37 = vshrl.u32 %v2808_v48, 16  ;;  %v2862_v38 = vshll.u32 %v2808_v48, 16  ;;  %v4295_v2 = vld [vmem:[#allocation11 + $0x8] sm:$0xff]  }
 0x163   : > { %v2834_v33 = vrot.slane %v2832_v44, 4  ;;  %v2847_v47 = vor.u32 %v2846_v22, %v2843_v17  ;;  %3999 = vmatprep.subr.bf16.mxu1 %v4295_v2 }
 0x164   : > { %v2852_v34 = vrot.slane %v2850_v13, 4  ;;  %v2855_v57 = vrot.slane %v2853_v8, 5  ;;  %v2861_v27 = vrot.slane %v2859_v37, 4  ;;  %v2864_v58 = vrot.slane %v2862_v38, 5  ;;  %4000 = vmatpush3.bf16.msra.mxu1 %v4295_v2 }
 0x165   : > { %v2838_v12 = vor.u32 %v2837_v35, %v2834_v33  ;;  %4001 = vmatprep.subr.bf16.mxu1 %v4296_v43 }
 0x166   : > { %v2856_v46 = vor.u32 %v2855_v57, %v2852_v34  ;;  %v2865_v5 = vor.u32 %v2864_v58, %v2861_v27 }
 0x167   : > { %3972 = vmatmul.mubr.msk.bf16.gmra.mrb[8].mxu0 %vm518_vm4, %v2654_v18  ;;  %v2839_v53 = vsel %vm877_vm9, %v2829_v23, %v2838_v12  ;;  %v2848_v19 = vsel %vm877_vm9, %v2838_v12, %v2847_v47 }
 0x168   : > { %3975 = vmatprep.mubr.msk.bf16.mxu0 %vm518_vm4, %v2656_v29  ;;  %v2857_v36 = vsel %vm877_vm9, %v2847_v47, %v2856_v46  ;;  %v2866_v20 = vsel %vm877_vm9, %v2856_v46, %v2865_v5  ;;  %v2875_v7 = vsel %vm877_vm9, %v2865_v5, %v2874_v45  ;;  %4002 = vmatpush3.bf16.msra.mxu1 %v4296_v43 }
 0x169   : > { %3904 = vmatmul.mubr.msk.bf16.gmra.mrb[12].mxu1 %vm518_vm4, %v1836_v10  ;;  %4003 = vmatprep.subr.bf16.mxu1 %v4297_v15 }
 0x16c   : > { %4004 = vmatpush3.bf16.msra.mxu1 %v4297_v15 }
 0x16d   : > { %4005 = vmatprep.subr.bf16.mxu1 %v4298_v63 }
 0x16f   : > { %3976 = vmatmul.mubr.msk.bf16.gmra.mrb[12].mxu0 %vm518_vm4, %v2658_v3 }
 0x170   : > { %3981 = vmatprep.mubr.msk.bf16.mxu0 %vm518_vm4, %v2830_v40  ;;  %4006 = vmatpush3.bf16.msra.mxu1 %v4298_v63 }
 0x171   : > { %4007 = vmatprep.subr.bf16.mxu1 %v4299_v31 }
 0x174   : > { %4008 = vmatpush3.bf16.msra.mxu1 %v4299_v31 }
 0x175   : > { %4009 = vmatprep.subr.bf16.mxu1 %v4300_v28 }
 0x177   : > { %3982 = vmatmul.mubr.msk.bf16.vlgmr.msra.gmra.mrb[0].mxu0 %vm518_vm4, %v2839_v53 }
 0x178   : > { %3985 = vmatprep.mubr.msk.bf16.mxu0 %vm518_vm4, %v2848_v19  ;;  %4010 = vmatpush3.bf16.msra.mxu1 %v4300_v28 }
 0x179   : > { %4011 = vmatprep.subr.bf16.mxu1 %v4301_v11 }
 0x17c   : > { %4012 = vmatpush3.bf16.msra.mxu1 %v4301_v11 }
 0x17f   : > { %3986 = vmatmul.mubr.msk.bf16.gmra.mrb[4].mxu0 %vm518_vm4, %v2857_v36 }
 0x180   : > { %3989 = vmatprep.mubr.msk.bf16.mxu0 %vm518_vm4, %v2866_v20 }
 0x187   : > { %3990 = vmatmul.mubr.msk.bf16.gmra.mrb[8].mxu0 %vm518_vm4, %v2875_v7 }
 0x188   : > { %3993 = vmatprep.mubr.msk.bf16.mxu0 %vm518_vm4, %v2884_v60 }
 0x18f   : > { %3994 = vmatmul.mubr.msk.bf16.gmra.mrb[12].mxu0 %vm518_vm4, %v2893_v25 }
 0x224   : > { %v3893_v26 = vpop.f32.mrb[0].mxu1 }
 0x225   : > { %v1901_v32 = vpop.f32.mrb[1].mxu1 }
 0x226   : > { %v3894_v9 = vpop.f32.mrb[2].mxu1 }
 0x227   : > { %v1904_v4 = vpop.f32.mrb[3].mxu1 }
 0x22c   : > { %v3897_v16 = vpop.f32.mrb[4].mxu1 }
 0x22d   : > { %v1917_v24 = vpop.f32.mrb[5].mxu1 }
 0x22e   : > { %v3898_v61 = vpop.f32.mrb[6].mxu1 }
 0x22f   : > { %v1920_v59 = vpop.f32.mrb[7].mxu1 }
 0x234   : > { %v3901_v18 = vpop.f32.mrb[8].mxu1 }
 0x235   : > { %v1933_v29 = vpop.f32.mrb[9].mxu1 }
 0x236   : > { %v3902_v62 = vpop.f32.mrb[10].mxu1 }
 0x237   : > { %v1936_v14 = vpop.f32.mrb[11].mxu1 }
 0x23c   : > { %v3905_v45 = vpop.f32.mrb[12].mxu1 }
 0x23d   : > { %v5617_v21 = vpop.f32.mrb[13].mxu1 }
 0x23e   : > { %v5619_v51 = vpop.f32.mrb[14].mxu1 }
 0x23f   : > { %v5621_v56 = vpop.f32.mrb[15].mxu1 }
 0x24a   : > { %v3983_v41 = vpop.f32.mrb[0].mxu0 }
 0x24b   : > { %v4029_v49 = vadd.f32 %v3983_v41, %v3893_v26  ;;  %v2958_v10 = vpop.f32.mrb[1].mxu0 }
 0x24c   : > { %v4030_v6 = vadd.f32 %v2958_v10, %v1901_v32  ;;  %v3984_v60 = vpop.f32.mrb[2].mxu0 }
 0x24d   : > { %v3046_v52 = vadd.f32 %v4029_v49, %v5626_v54  ;;  %v4031_v30 = vadd.f32 %v3984_v60, %v3894_v9  ;;  %v2961_v44 = vpop.f32.mrb[3].mxu0 }
 0x24e   : > { %v3044_v50 = vadd.f32 %v4030_v6, %v5626_v54  ;;  %v4032_v25 = vadd.f32 %v2961_v44, %v1904_v4 }
 0x24f   : > { %v3047_v0 = vadd.f32 %v4031_v30, %v5626_v54  ;;  %v3062_v1 = vmax.f32 %v3046_v52, 0.0 }
 0x250   : > { %v3045_v23 = vadd.f32 %v4032_v25, %v5626_v54  ;;  %v3060_v3 = vmax.f32 %v3044_v50, 0.0 }
 0x251   : > { %v3063_v55 = vmax.f32 %v3047_v0, 0.0 }
 0x252   : > { %v3061_v33 = vmax.f32 %v3045_v23, 0.0  ;;  %v3987_v35 = vpop.f32.mrb[4].mxu0 }
 0x253   : > { %v3077_v40 = vpack.c.bf16 %v3063_v55, %v3062_v1  ;;  %v4033_v17 = vadd.f32 %v3987_v35, %v3897_v16  ;;  %v2974_v22 = vpop.f32.mrb[5].mxu0 }
 0x254   : > { %v4034_v39 = vadd.f32 %v2974_v22, %v1917_v24  ;;  %v3988_v48 = vpop.f32.mrb[6].mxu0  ;;  %v3076_v12 = vpack.c.bf16 %v3061_v33, %v3060_v3 }
 0x255   : > { %v3050_v13 = vadd.f32 %v4033_v17, %v5626_v54  ;;  %v4035_v8 = vadd.f32 %v3988_v48, %v3898_v61  ;;  %v2977_v47 = vpop.f32.mrb[7].mxu0 }
 0x256   : > { %v3048_v37 = vadd.f32 %v4034_v39, %v5626_v54  ;;  %v4036_v38 = vadd.f32 %v2977_v47, %v1920_v59  ;;  %4013 = vmatprep.mubr.bf16.mxu1 %v3076_v12 }
 0x257   : > { %v3051_v53 = vadd.f32 %v4035_v8, %v5626_v54  ;;  %4014 = vmatmul.mubr.bf16.vlgmr.msra.gmra.mrb[16].mxu1 %v3077_v40  ;;  %v3066_v57 = vmax.f32 %v3050_v13, 0.0 }
 0x258   : > { %v3049_v34 = vadd.f32 %v4036_v38, %v5626_v54  ;;  %v3064_v27 = vmax.f32 %v3048_v37, 0.0 }
 0x259   : > { %v3067_v19 = vmax.f32 %v3051_v53, 0.0 }
 0x25a   : > { %v3065_v58 = vmax.f32 %v3049_v34, 0.0  ;;  %v3991_v46 = vpop.f32.mrb[8].mxu0 }
 0x25b   : > { %v4037_v5 = vadd.f32 %v3991_v46, %v3901_v18  ;;  %v2990_v36 = vpop.f32.mrb[9].mxu0  ;;  %v3079_v20 = vpack.c.bf16 %v3067_v19, %v3066_v57 }
 0x25c   : > { %v4038_v7 = vadd.f32 %v2990_v36, %v1933_v29  ;;  %v3992_v42 = vpop.f32.mrb[10].mxu0  ;;  %v3078_v2 = vpack.c.bf16 %v3065_v58, %v3064_v27 }
 0x25d   : > { %v3054_v43 = vadd.f32 %v4037_v5, %v5626_v54  ;;  %v4039_v15 = vadd.f32 %v3992_v42, %v3902_v62  ;;  %v2993_v63 = vpop.f32.mrb[11].mxu0 }
 0x25e   : > { %v3052_v31 = vadd.f32 %v4038_v7, %v5626_v54  ;;  %v4040_v28 = vadd.f32 %v2993_v63, %v1936_v14  ;;  %4017 = vmatprep.mubr.bf16.mxu1 %v3078_v2 }
 0x25f   : > { %v3055_v11 = vadd.f32 %v4039_v15, %v5626_v54  ;;  %4018 = vmatmul.mubr.bf16.gmra.mrb[20].mxu1 %v3079_v20  ;;  %v3070_v32 = vmax.f32 %v3054_v43, 0.0 }
 0x260   : > { %v3053_v26 = vadd.f32 %v4040_v28, %v5626_v54  ;;  %v3068_v4 = vmax.f32 %v3052_v31, 0.0 }
 0x261   : > { %v3071_v9 = vmax.f32 %v3055_v11, 0.0 }
 0x262   : > { %v3069_v16 = vmax.f32 %v3053_v26, 0.0  ;;  %v3995_v24 = vpop.f32.mrb[12].mxu0 }
 0x263   : > { %v4041_v61 = vadd.f32 %v3995_v24, %v3905_v45  ;;  %v3006_v59 = vpop.f32.mrb[13].mxu0  ;;  %v3081_v18 = vpack.c.bf16 %v3071_v9, %v3070_v32 }
 0x264   : > { %v4042_v29 = vadd.f32 %v3006_v59, %v5617_v21  ;;  %v3996_v62 = vpop.f32.mrb[14].mxu0  ;;  %v3080_v41 = vpack.c.bf16 %v3069_v16, %v3068_v4 }
 0x265   : > { %v3058_v14 = vadd.f32 %v4041_v61, %v5626_v54  ;;  %v4043_v49 = vadd.f32 %v3996_v62, %v5619_v51  ;;  %v3009_v10 = vpop.f32.mrb[15].mxu0 }
 0x266   : > { %v3056_v6 = vadd.f32 %v4042_v29, %v5626_v54  ;;  %v4044_v60 = vadd.f32 %v3009_v10, %v5621_v56  ;;  %4021 = vmatprep.mubr.bf16.mxu1 %v3080_v41  ;;  %v3643_v56 = vld [vmem:[%s5835_s28] ss:$0 sm:$0xff] }
 0x267   : > { %v3059_v52 = vadd.f32 %v4043_v49, %v5626_v54  ;;  %4022 = vmatmul.mubr.bf16.gmra.mrb[24].mxu1 %v3081_v18  ;;  %v3074_v30 = vmax.f32 %v3058_v14, 0.0 }
 0x268   : > { %v3057_v45 = vadd.f32 %v4044_v60, %v5626_v54  ;;  %v3072_v21 = vmax.f32 %v3056_v6, 0.0 }
 0x269   : > { %v3075_v44 = vmax.f32 %v3059_v52, 0.0 }
 0x26a   : > { %v3073_v50 = vmax.f32 %v3057_v45, 0.0 }
 0x26b   : > { %v3083_v25 = vpack.c.bf16 %v3075_v44, %v3074_v30 }
 0x26c   : > { %v3082_v0 = vpack.c.bf16 %v3073_v50, %v3072_v21 }
 0x26e   : > { %4025 = vmatprep.mubr.bf16.mxu1 %v3082_v0 }
 0x26f   : > { %4026 = vmatmul.mubr.bf16.gmra.mrb[28].mxu1 %v3083_v25 }
 0x32a   : > { %v4015_v51 = vpop.f32.mrb[16].mxu1 }
 0x32b   : > { %v3189_v23 = vpop.f32.mrb[17].mxu1  ;;  %v3198_v55 = vadd.f32 %v4015_v51, %v3643_v56 }
 0x32c   : > { %v4016_v1 = vpop.f32.mrb[18].mxu1  ;;  %v3190_v54 = vadd.f32 %v3643_v56, %v3189_v23 }
 0x32d   : > { %v3201_v3 = vadd.f32 %v4016_v1, %v3643_v56  ;;  %v3192_v33 = vpop.f32.mrb[19].mxu1 }
 0x32e   : > { %v3193_v35 = vadd.f32 %v3643_v56, %v3192_v33 }
 0x32f   : > { %v3699_v40 = vpack.c.bf16 %v3201_v3, %v3198_v55 }
 0x330   : > { %v3694_v17 = vpack.c.bf16 %v3193_v35, %v3190_v54 }
 0x331   : > { %3731 = vst [vmem:[%s5652_s3 + $0x8] sm:$0xff] %v3699_v40  }
 0x332   : > { %3695 = vst [vmem:[%s5652_s3] sm:$0xff] %v3694_v17   ;;  %v4019_v22 = vpop.f32.mrb[20].mxu1 }
 0x333   : > { %v3205_v39 = vpop.f32.mrb[21].mxu1  ;;  %v3214_v12 = vadd.f32 %v4019_v22, %v3643_v56 }
 0x334   : > { %v4020_v48 = vpop.f32.mrb[22].mxu1  ;;  %v3206_v47 = vadd.f32 %v3643_v56, %v3205_v39 }
 0x335   : > { %v3217_v13 = vadd.f32 %v4020_v48, %v3643_v56  ;;  %v3208_v8 = vpop.f32.mrb[23].mxu1 }
 0x336   : > { %v3209_v37 = vadd.f32 %v3643_v56, %v3208_v8 }
 0x337   : > { %v3709_v38 = vpack.c.bf16 %v3217_v13, %v3214_v12 }
 0x338   : > { %v3704_v53 = vpack.c.bf16 %v3209_v37, %v3206_v47 }
 0x339   : > { %3733 = vst [vmem:[%s5652_s3 + $0x18] sm:$0xff] %v3709_v38  }
 0x33a   : > { %3732 = vst [vmem:[%s5652_s3 + $0x10] sm:$0xff] %v3704_v53   ;;  %v4023_v34 = vpop.f32.mrb[24].mxu1 }
 0x33b   : > { %v3221_v57 = vpop.f32.mrb[25].mxu1  ;;  %v3230_v27 = vadd.f32 %v4023_v34, %v3643_v56 }
 0x33c   : > { %v4024_v19 = vpop.f32.mrb[26].mxu1  ;;  %v3222_v5 = vadd.f32 %v3643_v56, %v3221_v57 }
 0x33d   : > { %v3233_v58 = vadd.f32 %v4024_v19, %v3643_v56  ;;  %v3224_v46 = vpop.f32.mrb[27].mxu1 }
 0x33e   : > { %v3225_v36 = vadd.f32 %v3643_v56, %v3224_v46 }
 0x33f   : > { %v3719_v20 = vpack.c.bf16 %v3233_v58, %v3230_v27 }
 0x340   : > { %v3714_v7 = vpack.c.bf16 %v3225_v36, %v3222_v5 }
 0x341   : > { %3735 = vst [vmem:[%s5652_s3 + $0x28] sm:$0xff] %v3719_v20  }
 0x342   : > { %3734 = vst [vmem:[%s5652_s3 + $0x20] sm:$0xff] %v3714_v7   ;;  %v4027_v42 = vpop.f32.mrb[28].mxu1 }
 0x343   : > { %v3237_v2 = vpop.f32.mrb[29].mxu1  ;;  %v3246_v15 = vadd.f32 %v4027_v42, %v3643_v56 }
 0x344   : > { %v4028_v43 = vpop.f32.mrb[30].mxu1  ;;  %v3238_v28 = vadd.f32 %v3643_v56, %v3237_v2 }
 0x345   : > { %v3249_v63 = vadd.f32 %v4028_v43, %v3643_v56  ;;  %v3240_v31 = vpop.f32.mrb[31].mxu1 }
 0x346   : > { %v3241_v11 = vadd.f32 %v3643_v56, %v3240_v31 }
 0x347   : > { %v3729_v26 = vpack.c.bf16 %v3249_v63, %v3246_v15 }
 0x348   : > { %v3724_v32 = vpack.c.bf16 %v3241_v11, %v3238_v28 }
 0x349   : > { %3737 = vst [vmem:[%s5652_s3 + $0x38] sm:$0xff] %v3729_v26  }
 0x34a   : > { %3736 = vst [vmem:[%s5652_s3 + $0x30] sm:$0xff] %v3724_v32  }
 0x34b   : > { %4467 = shalt.err (!%p4464_p7)
}
 0x34c   : > { %s4468_s13 = scalar_lea.hbm %s5668_s1, 1024  ;;  %s4472_s18 = scalar_lea.hbm %s5839_s17, 4096 }
 0x34d   : > { %p4469_p12 = scmp.ne.s32.totalorder %s5668_s1, %s4468_s13  ;;  %p4473_p9 = scmp.lt.u32.totalorder %s5668_s1, %s5839_s17 }
 0x34e   : > { %p4474_p10 = scmp.lt.u32.totalorder %s4472_s18, %s4468_s13  ;;  %p4476_p11 = scmp.lt.u32.totalorder %s4468_s13, %s5668_s1 }
 0x34f   : > { %p4470_p1 = pnand %p4469_p12, %p5840_p13 }
 0x350   : > { %p4475_p6 = por %p4474_p10, %p4473_p9 }
 0x351   : > { %p4471_p4 = pneg %p4470_p1 }
 0x352   : > { %p4477_p0 = por %p4476_p11, %p4475_p6 }
 0x354   : > { %p4478_p8 = pnand %p4477_p0, %p4471_p4 }
 0x356   : > { %4481 = shalt.err (!%p4478_p8)
}
 0x357   : > { %s4572_s3 = smov 64   ;;  %s4573_s12 = smov 4  }
 0x358   : > { %4171 = dma.vmem_to_hbm [thread:$0]  (%p5840_p13), %s5663_s20, 1024, %s5668_s1, %s3333_s16, %s4572_s3, %s4572_s3, %s4573_s12  }
 0x359 PF: > { %s5841_s27 = sld [smem:[#allocation21_spill]]  ;;  %s5842_s11 = sld [smem:[#allocation17_spill]] }
 0x35a   : > { %s5843_s4 = sld [smem:[#allocation24_spill]] }
 0x35f   : > { %p4199_p2 = scmp.ge.s32.totalorder %s5841_s27, 2  ;;  %s3363_s22 = sand.u32 1, %s5842_s11  }
 0x360   : > { %p5844_p3 = scmp.ne.s32.totalorder %s5843_s4, 0  ;;  %s3364_s26 = scalar_lea.sflag [#allocation5], %s3363_s22 }
 0x362   : > { %p4191_p5 = pnand %p4199_p2, %p5844_p3 }
 0x364   : > { %4527 = dma.done.wait (!%p4191_p5), %s3364_s26, 1024  }
 0x365   : > { %4529 = vsyncadd (!%p4191_p5), %s3364_s26, 4294966272  ;;  %s27_s8 = sadd.s32 1, %s5841_s27   ;;  %s5845_s6 = sld [smem:[#allocation18_spill]] }
 0x366   : > { %p24_p7 = scmp.ge.s32.totalorder %s27_s8, 6   ;;  %s5846_s26 = sld [smem:[#allocation27_spill]] }
 0x367   : > { %s5847_s20 = sld [smem:[#allocation25_spill]]  ;;  %s5848_s14 = sld [smem:[#allocation26_spill]] }
 0x368   : > { %s5849_s24 = smov %s4536_s25  ;;  %s5851_s27 = smov %s4552_s29 }
 0x369   : > { %s5852_s28 = smov %s4556_s30  ;;  %26 = sbr.rel (!%p24_p7) target bundleno = 16 (0x10), region = 125 }
 0x36b   : > { %s5850_s25 = smov %s5845_s6 }
 0x36d   : > { %s5853_s29 = smov %s5847_s20  ;;  %s5854_s30 = smov %s5848_s14 }
 0x370   :  { %3369 = vsyncpa [#allocation4], 1 }
 0x371   :  { %3371 = vsyncpa [#allocation4 + $0x1], 1 }
 0x372   :  { %3372 = vsyncpa [#allocation7], 1 }
 0x373   :  { %3374 = vsyncpa [#allocation7 + $0x1], 1 }
 0x374   :  { %3375 = vsyncpa [#allocation10], 1 }
 0x375   :  { %3376 = vsyncpa [#allocation5], 1 }
 0x376   :  { %3378 = vsyncpa [#allocation5 + $0x1], 1 }

// kernel: tpu_custom_call.1
= control target key start
LH: loop header
LB: loop body
LE: loop exit
PB: predicated region body
PF: predicated region fallthrough
CT: control target
= control target key end

     0   :  { %s5724_s0 = inlined_call_operand.hbm [shape: bf16[2,16,16,16], index: 0, kind: input, shape index: {}]   ;;  %s5725_s1 = inlined_call_operand.hbm [shape: bf16[2,2,16,16], index: 1, kind: input, shape index: {}]   ;;  %s5726_s2 = inlined_call_operand.hbm [shape: bf16[2,2,16,16], index: 2, kind: input, shape index: {}]   ;;  %s5727_s3 = inlined_call_operand.hbm [shape: bf16[144,128], index: 3, kind: input, shape index: {}]   ;;  %s5728_s4 = inlined_call_operand.vmem [shape: f32[1,128], index: 4, kind: input, shape index: {}]   ;;  %s5729_s5 = inlined_call_operand.hbm [shape: bf16[128,128], index: 5, kind: input, shape index: {}]   ;;  %s5730_s6 = inlined_call_operand.vmem [shape: f32[1,128], index: 6, kind: input, shape index: {}]   ;;  %s5731_s7 = inlined_call_operand.hbm [shape: bf16[2,256,128], index: 7, kind: output, shape index: {}]  }
   0x1   :  { %5766 = sst [smem:[#allocation28_spill]] %s5725_s1 }
   0x2   :  { %5767 = sst [smem:[#allocation29_spill]] %s5727_s3 }
   0x3   :  { %5768 = sst [smem:[#allocation30_spill]] %s5728_s4 }
   0x4   :  { %5769 = sst [smem:[#allocation31_spill]] %s5730_s6 }
   0x5   :  { %5770 = sst [smem:[#allocation32_spill]] %s5731_s7 }
   0x6   :  { %12 = vsyncpa [#allocation4], 0 }
   0x7   :  { %14 = vsyncpa [#allocation4 + $0x1], 0 }
   0x8   :  { %15 = vsyncpa [#allocation7], 0 }
   0x9   :  { %17 = vsyncpa [#allocation7 + $0x1], 0 }
   0xa   :  { %18 = vsyncpa [#allocation10], 0 }
   0xb   :  { %19 = vsyncpa [#allocation5], 0 }
   0xc   :  { %21 = vsyncpa [#allocation5 + $0x1], 0  ;;  %s4614_s24 = smov 0   ;;  %s4616_s25 = smov 0  }
   0xd   :  { %s4618_s26 = smov 0   ;;  %s4620_s27 = smov 0  }
   0xe   :  { %s4622_s28 = smov 0   ;;  %s4624_s29 = smov 0  }
   0xf   :  { %s4626_s30 = smov 0   ;;  %s4628_s8 = smov 0  }
  0x10 LB: > { %5771 = sst [smem:[#allocation17_spill]] %s4532_s24  ;;  %s4655_s9 = sadd.s32 4294967295, %s4560_s8   ;;  %s4560_s8 = sphi %s4628_s8, %s27_s8   ;;  %s4556_s30 = sphi %s4626_s30, %s5854_s30   ;;  %s4552_s29 = sphi %s4624_s29, %s5853_s29   ;;  %s4548_s28 = sphi %s4622_s28, %s5852_s28   ;;  %s4544_s27 = sphi %s4620_s27, %s5851_s27   ;;  %s4540_s26 = sphi %s4618_s26, %s5846_s26   ;;  %s4536_s25 = sphi %s4616_s25, %s5850_s25   ;;  %s4532_s24 = sphi %s4614_s24, %s5849_s24  }
  0x11   : > { %5772 = sst [smem:[#allocation18_spill]] %s4540_s26  ;;  %s3507_s10 = sadd.s32 4294967294, %s4560_s8  }
  0x12   : > { %5773 = sst [smem:[#allocation19_spill]] %s4544_s27  ;;  %p55_p0 = scmp.ne.s32.totalorder %s4540_s26, %s4536_s25 }
  0x13   : > { %5774 = sst [smem:[#allocation20_spill]] %s4548_s28  ;;  %p56_p1 = scmp.eq.s32.totalorder %s4560_s8, 0 }
  0x14   : > { %5775 = sst [smem:[#allocation21_spill]] %s4560_s8  ;;  %p61_p2 = scmp.ne.s32.totalorder %s4536_s25, %s4532_s24 }
  0x15   : > { %5776 = sst [smem:[#allocation22_spill]] %s4655_s9  ;;  %p5735_p3 = scmp.eq.s32.totalorder %s4655_s9, 0 }
  0x16   : > { %p227_p4 = scmp.eq.s32.totalorder %s4655_s9, 3  ;;  %p4666_p5 = por %p56_p1, %p55_p0 }
  0x17   : > { %p233_p6 = scmp.eq.s32.totalorder %s3507_s10, 3  ;;  %p4672_p7 = por %p5735_p3, %p61_p2 }
  0x18   : > { %s5777_s12 = scalar_select %p4666_p5, 1, 0 }
  0x19   : > { %s5778_s13 = scalar_select %p4672_p7, 1, 0 }
  0x1a   : > { %p4676_p8 = por %p227_p4, %p55_p0  ;;  %p4680_p9 = por %p233_p6, %p61_p2 }
  0x1b   : > { %p3508_p10 = scmp.ge.s32.totalorder %s4560_s8, 1  ;;  %p240_p11 = scmp.lt.s32.totalorder %s4560_s8, 5 }
  0x1c   : > { %s5779_s14 = scalar_select %p4676_p8, 1, 0 }
  0x1d   : > { %s5781_s15 = scalar_select %p4680_p9, 1, 0 }
  0x1e   : > { %5780 = sst [smem:[#allocation23_spill]] %s5779_s14  ;;  %p4686_p12 = pnand %p3508_p10, %p240_p11 }
  0x1f   : > { %5782 = sst [smem:[#allocation24_spill]] %s5781_s15  ;;  %s4562_s17 = smov [#allocation9]  }
  0x20   : > { %s5783_s16 = scalar_select %p4686_p12, 1, 0 }
  0x21   : > { %s252_s18 = sshll.u32 %s4562_s17, 4  ;;  %p4173_p13 = pneg %p4686_p12  ;;  %s253_s18 = int_to_ptr.vmem [resolvable:$true] %s252_s18 }
  0x22   : > { %s39_s20 = sadd.s32 1, %s4556_s30  ;;  %s36_s21 = sadd.s32 1, %s4552_s29 }
  0x23   : > { %p4694_p0 = pnand %p4173_p13, %p5735_p3  ;;  %s5785_s3 = sld [smem:[#allocation29_spill]] }
  0x25   : > { %s5784_s19 = scalar_select %p4694_p0, 1, 0 }
  0x26   : > { %p5750_p2 = pneg %p4694_p0 }
  0x29   : > { %s4308_s10 = scalar_lea.hbm %s5785_s3, 1152 }
  0x2a   : > { %p4309_p1 = scmp.ne.s32.totalorder %s5785_s3, %s4308_s10  ;;  %p4315_p10 = scmp.lt.u32.totalorder %s4308_s10, %s5785_s3 }
  0x2c   : > { %p4311_p4 = pnand %p5750_p2, %p4309_p1 }
  0x2e   : > { %p4312_p6 = pneg %p4311_p4 }
  0x30   : > { %p4317_p11 = pnand %p4315_p10, %p4312_p6 }
  0x32   : > { %4320 = shalt.err (!%p4317_p11)
}
  0x33   : > { %s4321_s7 = scalar_lea.vmem %s253_s18, 1152  ;;  %p4329_p8 = scmp.lt.s32.totalorder %s253_s18, %s253_s18 }
  0x34   : > { %p4322_p13 = scmp.ne.s32.totalorder %s253_s18, %s4321_s7  ;;  %p4330_p7 = scmp.lt.s32.totalorder %s4321_s7, %s4321_s7 }
  0x36   : > { %p4324_p3 = pnand %p4322_p13, %p5750_p2  ;;  %p4331_p12 = por %p4330_p7, %p4329_p8 }
  0x38   : > { %p4325_p9 = pneg %p4324_p3 }
  0x3a   : > { %p4332_p5 = pnand %p4331_p12, %p4325_p9 }
  0x3c   : > { %4335 = shalt.err (!%p4332_p5)
}
  0x3d   : > { %s5739_s11 = smov 64   ;;  %s5741_s24 = smov 4  }
  0x3e   : > { %4176 = dma.hbm_to_vmem [thread:$0]  (!%p4694_p0), %s5785_s3, 1152, %s253_s18, [#allocation10], %s5739_s11, %s5739_s11, %s5741_s24  }
  0x3f   : > { %p37_p3 = scmp.ge.s32.totalorder %s36_s21, 2  ;;  %p4196_p5 = scmp.lt.s32.totalorder %s4560_s8, 4 }
  0x40   : > { %s4727_s22 = sand.u32 1, %s4540_s26   ;;  %s309_s23 = sand.u32 1, %s4560_s8  }
  0x41   : > { %s5856_s21 = smov (%p37_p3, %s36_s21), 0  ;;  %s5858_s20 = smov (!%p37_p3, %s39_s20), %s4556_s30 }
  0x42   : > { %5786 = sst [smem:[#allocation25_spill]] %s5856_s21  ;;  %s44_s10 = ssub.s32 %s4552_s29, %s5856_s21 }
  0x43   : > { %p5787_p7 = scmp.ne.s32.totalorder %s5777_s12, 0  ;;  %p41_p9 = scmp.ge.s32.totalorder %s5858_s20, 2 }
  0x44   : > { %s5749_s18 = sshll.u32 %s4727_s22, 3  ;;  %s3518_s7 = sshll.u32 %s4552_s29, 1 }
  0x45   : > { %p4737_p8 = pnand %p4196_p5, %p5787_p7  ;;  %s5860_s20 = smov (%p41_p9, %s5858_s20), 0 }
  0x46   : > { %5789 = sst [smem:[#allocation26_spill]] %s5860_s20  ;;  %s43_s15 = ssub.s32 %s4556_s30, %s5860_s20 }
  0x47   : > { %s5788_s17 = scalar_select %p4737_p8, 1, 0 }
  0x48   : > { %s3519_s11 = sshll.u32 %s4556_s30, 2  ;;  %s45_s24 = sor.u32 %s44_s10, %s43_s15 }
  0x49   : > { %s4748_s3 = sadd.s32 %s3519_s11, %s3518_s7  ;;  %p46_p12 = scmp.eq.s32.totalorder %s45_s24, 0 }
  0x4a   : > { %s3520_s12 = sshll.u32 %s4748_s3, 6  ;;  %s5790_s1 = sld [smem:[#allocation28_spill]] }
  0x4b   : > { %s313_s20 = scalar_lea.vmem [#allocation6], %s5749_s18  ;;  %s5791_s10 = sadd.s32 1, %s4540_s26 }
  0x4c   : > { %s322_s28 = sshll.u32 %s313_s20, 4  ;;  %s4767_s24 = scalar_lea.sflag [#allocation7], %s309_s23  ;;  %s4765_s28 = int_to_ptr.vmem [resolvable:$true] %s322_s28 }
  0x4d   : > { %s4763_s11 = scalar_select %p46_p12, %s4540_s26, %s5791_s10  }
  0x4e   : > { %p4773_p4 = pneg %p4737_p8 }
  0x4f   : > { %5792 = sst [smem:[#allocation27_spill]] %s4763_s11 }
  0x50   : > { %s4756_s14 = scalar_lea.hbm %s5790_s1, %s3520_s12  ;;  %s4341_s15 = scalar_lea.hbm %s5790_s1, 512 }
  0x51   : > { %s4336_s7 = scalar_lea.hbm %s4756_s14, 128  ;;  %p4342_p11 = scmp.lt.u32.totalorder %s4756_s14, %s5790_s1 }
  0x52   : > { %p4337_p1 = scmp.ne.s32.totalorder %s4756_s14, %s4336_s7  ;;  %p4343_p13 = scmp.lt.u32.totalorder %s4341_s15, %s4336_s7 }
  0x53   : > { %s5793_s8 = scalar_select %p4773_p4, 1, 0 }
  0x54   : > { %p4339_p6 = pnand %p4773_p4, %p4337_p1  ;;  %p4344_p3 = por %p4343_p13, %p4342_p11 }
  0x55   : > { %p4345_p5 = scmp.lt.u32.totalorder %s4336_s7, %s4756_s14 }
  0x56   : > { %p4340_p10 = pneg %p4339_p6 }
  0x57   : > { %p4346_p7 = por %p4345_p5, %p4344_p3 }
  0x59   : > { %p4347_p9 = pnand %p4346_p7, %p4340_p10 }
  0x5b   : > { %4350 = shalt.err (!%p4347_p9)
}
  0x5c   : > { %s4351_s23 = scalar_lea.vmem %s4765_s28, 128  ;;  %s4565_s21 = smov [#allocation6]  }
  0x5d   : > { %p4352_p12 = scmp.ne.s32.totalorder %s4765_s28, %s4351_s23  ;;  %s4356_s20 = sshll.u32 %s4565_s21, 4  ;;  %s4357_s20 = int_to_ptr.vmem [resolvable:$false] %s4356_s20 }
  0x5e   : > { %s4358_s18 = scalar_lea.vmem %s4357_s20, 256  ;;  %p4359_p2 = scmp.lt.s32.totalorder %s4765_s28, %s4357_s20 }
  0x5f   : > { %p4354_p1 = pnand %p4352_p12, %p4773_p4  ;;  %p4360_p0 = scmp.lt.s32.totalorder %s4358_s18, %s4351_s23 }
  0x61   : > { %p4355_p6 = pneg %p4354_p1  ;;  %p4361_p11 = por %p4360_p0, %p4359_p2 }
  0x63   : > { %p4362_p13 = pnand %p4361_p11, %p4355_p6 }
  0x65   : > { %4365 = shalt.err (!%p4362_p13)
}
  0x66   : > { %s5794_s7 = smov 4   ;;  %s5795_s15 = smov 64  }
  0x67   : > { %4186 = dma.hbm_to_vmem [thread:$0]  (!%p4737_p8), %s4756_s14, 128, %s4765_s28, %s4767_s24, %s5795_s15, %s5795_s15, %s5794_s7  }
  0x68   : > { %s4805_s23 = scalar_lea.hbm %s5726_s2, %s3520_s12  ;;  %s5796_s20 = sshll.u32 %s4727_s22, 3 }
  0x69   : > { %s4809_s18 = scalar_lea.vmem [#allocation8], %s5796_s20  ;;  %s4566_s11 = smov [#allocation11]  }
  0x6a   : > { %s345_s1 = sshll.u32 %s4809_s18, 4  ;;  %s268_s26 = sshll.u32 %s4566_s11, 4  ;;  %s269_s26 = int_to_ptr.vmem [resolvable:$true] %s268_s26  ;;  %s4840_s1 = int_to_ptr.vmem [resolvable:$true] %s345_s1 }
  0x6b   : > { %s3512_s27 = sshll.u32 %s4727_s22, 6  ;;  %s4366_s9 = scalar_lea.hbm %s5729_s5, 1024 }
  0x6c   : > { %p4367_p0 = scmp.ne.s32.totalorder %s5729_s5, %s4366_s9  ;;  %p5797_p2 = scmp.ne.s32.totalorder %s5784_s19, 0 }
  0x6d   : > { %p4373_p7 = scmp.lt.u32.totalorder %s4366_s9, %s5729_s5 }
  0x6e   : > { %p5798_p10 = pneg %p5797_p2 }
  0x70   : > { %p4369_p3 = pnand %p4367_p0, %p5798_p10 }
  0x72   : > { %p4370_p5 = pneg %p4369_p3 }
  0x74   : > { %p4375_p9 = pnand %p4373_p7, %p4370_p5 }
  0x76   : > { %4378 = shalt.err (!%p4375_p9)
}
  0x77   : > { %s4379_s11 = scalar_lea.vmem %s269_s26, 1024  ;;  %p5799_p1 = pmov %p5798_p10 }
  0x78   : > { %p4380_p12 = scmp.ne.s32.totalorder %s269_s26, %s4379_s11  ;;  %p4387_p13 = scmp.lt.s32.totalorder %s269_s26, %s269_s26 }
  0x79   : > { %p4388_p8 = scmp.lt.s32.totalorder %s4379_s11, %s4379_s11 }
  0x7a   : > { %p4382_p6 = pnand %p4380_p12, %p5799_p1 }
  0x7b   : > { %p4389_p4 = por %p4388_p8, %p4387_p13 }
  0x7c   : > { %p4383_p11 = pneg %p4382_p6 }
  0x7e   : > { %p4390_p0 = pnand %p4389_p4, %p4383_p11 }
  0x80   : > { %4393 = shalt.err (!%p4390_p0)
}
  0x81   : > { %4179 = dma.hbm_to_vmem [thread:$0]  (!%p5797_p2), %s5729_s5, 1024, %s269_s26, [#allocation10], %s5795_s15, %s5795_s15, %s5794_s7  }
  0x82   : > { %s3674_s9 = sshll.u32 %s4552_s29, 4  ;;  %s3515_s10 = sshll.u32 %s4556_s30, 5 }
  0x83   : > { %s289_s21 = scalar_lea.vmem [#allocation3], %s3512_s27  ;;  %s296_s18 = sadd.s32 %s3674_s9, %s3515_s10 }
  0x84   : > { %s299_s20 = sshll.u32 %s289_s21, 4  ;;  %s3516_s19 = sshll.u32 %s296_s18, 6  ;;  %s4838_s20 = int_to_ptr.vmem [resolvable:$true] %s299_s20 }
  0x85   : > { %s4845_s14 = scalar_lea.hbm %s5724_s0, %s3516_s19  ;;  %s286_s26 = scalar_lea.sflag [#allocation4], %s4727_s22 }
  0x86   : > { %s4394_s12 = scalar_lea.hbm %s4845_s14, 1024  ;;  %p5800_p4 = scmp.ne.s32.totalorder %s5793_s8, 0 }
  0x87   : > { %p4395_p8 = scmp.ne.s32.totalorder %s4845_s14, %s4394_s12  ;;  %s4399_s4 = scalar_lea.hbm %s5724_s0, 4096 }
  0x88   : > { %p4400_p3 = scmp.lt.u32.totalorder %s4845_s14, %s5724_s0  ;;  %p4401_p5 = scmp.lt.u32.totalorder %s4399_s4, %s4394_s12 }
  0x89   : > { %p4397_p2 = pnand %p4395_p8, %p5800_p4  ;;  %p4403_p9 = scmp.lt.u32.totalorder %s4394_s12, %s4845_s14 }
  0x8a   : > { %p4402_p7 = por %p4401_p5, %p4400_p3 }
  0x8b   : > { %p4398_p10 = pneg %p4397_p2 }
  0x8c   : > { %p4404_p12 = por %p4403_p9, %p4402_p7 }
  0x8e   : > { %p4405_p1 = pnand %p4404_p12, %p4398_p10 }
  0x90   : > { %4408 = shalt.err (!%p4405_p1)
}
  0x91   : > { %s4409_s10 = scalar_lea.vmem %s4838_s20, 1024  ;;  %s4567_s21 = smov [#allocation3]  }
  0x92   : > { %p4410_p6 = scmp.ne.s32.totalorder %s4838_s20, %s4409_s10  ;;  %s4414_s18 = sshll.u32 %s4567_s21, 4  ;;  %s4415_s18 = int_to_ptr.vmem [resolvable:$false] %s4414_s18 }
  0x93   : > { %s4416_s19 = scalar_lea.vmem %s4415_s18, 2048  ;;  %p4417_p0 = scmp.lt.s32.totalorder %s4838_s20, %s4415_s18 }
  0x94   : > { %p4412_p11 = pnand %p4410_p6, %p5800_p4  ;;  %p4418_p8 = scmp.lt.s32.totalorder %s4416_s19, %s4409_s10 }
  0x96   : > { %p4413_p13 = pneg %p4412_p11  ;;  %p4419_p2 = por %p4418_p8, %p4417_p0 }
  0x98   : > { %p4420_p3 = pnand %p4419_p2, %p4413_p13 }
  0x9a   : > { %4423 = shalt.err (!%p4420_p3)
}
  0x9b   : > { %p5801_p10 = scmp.ne.s32.totalorder %s5788_s17, 0  ;;  %s4424_s28 = scalar_lea.hbm %s4805_s23, 128 }
  0x9c   : > { %p4425_p5 = scmp.ne.s32.totalorder %s4805_s23, %s4424_s28  ;;  %s4429_s27 = scalar_lea.hbm %s5726_s2, 512 }
  0x9d   : > { %4183 = dma.hbm_to_vmem [thread:$0]  (!%p5801_p10), %s4845_s14, 1024, %s4838_s20, %s286_s26, %s5795_s15, %s5795_s15, %s5794_s7  }
  0x9e   : > { %p4427_p7 = pnand %p4425_p5, %p5800_p4  ;;  %p4430_p12 = scmp.lt.u32.totalorder %s4805_s23, %s5726_s2 }
  0x9f   : > { %p4431_p1 = scmp.lt.u32.totalorder %s4429_s27, %s4424_s28  ;;  %p4433_p11 = scmp.lt.u32.totalorder %s4424_s28, %s4805_s23 }
  0xa0   : > { %p4428_p9 = pneg %p4427_p7 }
  0xa1   : > { %p4432_p6 = por %p4431_p1, %p4430_p12 }
  0xa3   : > { %p4434_p13 = por %p4433_p11, %p4432_p6 }
  0xa5   : > { %p4435_p0 = pnand %p4434_p13, %p4428_p9 }
  0xa7   : > { %4438 = shalt.err (!%p4435_p0)
}
  0xa8   : > { %s4439_s22 = scalar_lea.vmem %s4840_s1, 128  ;;  %s4568_s20 = smov [#allocation8]  }
  0xa9   : > { %p4440_p8 = scmp.ne.s32.totalorder %s4840_s1, %s4439_s22  ;;  %s4444_s14 = sshll.u32 %s4568_s20, 4  ;;  %s4445_s14 = int_to_ptr.vmem [resolvable:$false] %s4444_s14 }
  0xaa   : > { %s4446_s26 = scalar_lea.vmem %s4445_s14, 256  ;;  %p4447_p5 = scmp.lt.s32.totalorder %s4840_s1, %s4445_s14 }
  0xab   : > { %p4442_p2 = pnand %p4440_p8, %p5800_p4  ;;  %p4448_p7 = scmp.lt.s32.totalorder %s4446_s26, %s4439_s22 }
  0xad   : > { %p4443_p3 = pneg %p4442_p2  ;;  %p4449_p12 = por %p4448_p7, %p4447_p5 }
  0xaf   : > { %p4450_p1 = pnand %p4449_p12, %p4443_p3 }
  0xb1   : > { %4453 = shalt.err (!%p4450_p1)
}
  0xb2   : > { %4189 = dma.hbm_to_vmem [thread:$0]  (!%p5801_p10), %s4805_s23, 128, %s4840_s1, %s4767_s24, %s5795_s15, %s5795_s15, %s5794_s7  }
  0xb3   : > { %p5802_p4 = scmp.ne.s32.totalorder %s5783_s16, 0 }
  0xb4   : > { %s4902_s8 = sand.u32 (!%p5802_p4), 1, %s4536_s25   ;;  %p5803_p9 = scmp.ne.s32.totalorder (!%p5802_p4), %s5778_s13, 0 }
  0xb5   : > { %357 = sbr.rel (%p5802_p4) target bundleno = 857 (0x359), region = 48  ;;  %s3526_s6 = sshll.u32 (!%p5802_p4), %s4902_s8, 6 }
  0xb6   : > { %s360_s9 = scalar_lea.sflag (!%p5802_p4), [#allocation4], %s4902_s8  ;;  %s4908_s17 = scalar_lea.vmem (!%p5802_p4), [#allocation3], %s3526_s6 }
  0xbc   : > { %4515 = dma.done.wait (%p5803_p9), %s360_s9, 1024  }
  0xbd   : > { %4517 = vsyncadd (%p5803_p9), %s360_s9, 4294966272  ;;  %s5804_s1 = sld [smem:[#allocation22_spill]]  ;;  %s3527_s24 = sshll.u32 %s4902_s8, 3 }
  0xbe   : > { %s4916_s15 = scalar_lea.vmem [#allocation6], %s3527_s24 }
  0xc3   : > { %s368_s16 = sand.u32 1, %s5804_s1  }
  0xc4   : > { %s369_s7 = scalar_lea.sflag [#allocation7], %s368_s16 }
  0xc5   : > { %4519 = dma.done.wait (%p5803_p9), %s369_s7, 256  }
  0xc6   : > { %4521 = vsyncadd (%p5803_p9), %s369_s7, 4294967040  ;;  %s4922_s23 = scalar_lea.vmem [#allocation8], %s3527_s24  ;;  %p5805_p10 = scmp.eq.s32.totalorder %s5804_s1, 0 }
  0xc8   : > { %4523 = dma.done.wait (%p5805_p10), [#allocation10], 2176   ;;  %p5806_p6 = pmov %p5805_p10 }
  0xc9   : > { %vm435_vm0 = vcmask 125952   ;;  %vm437_vm1 = vcmask 130052   ;;  %v539_v0 = vlaneseq  ;;  %v4569_v1 = vmov 0   ;;  %v4272_v11 = vld [vmem:[#allocation9 + $0x20] sm:$0xff]   ;;  %v4273_v13 = vld [vmem:[#allocation9 + $0x8] sm:$0xff]   ;;  %v4280_v39 = vld [vmem:[%s4908_s17 + $0x14] sm:$0xff]  }
  0xca   : > { %4525 = vsyncadd (%p5806_p6), [#allocation10], 4294965120  ;;  %436 = vst.msk [vmem:[#allocation2] sm:$0xf] %vm435_vm0, %v4569_v1  ;;  %vm4570_vm2 = vmmov 1   ;;  %vm518_vm4 = vcmask 130048   ;;  %3907 = vmatprep.subr.bf16.mxu0 %v4272_v11  ;;  %3835 = vmatprep.subr.bf16.mxu1 %v4273_v13 }
  0xcb   : > { %438 = vst.msk [vmem:[#allocation2 + $0x50] sm:$0xf0] %vm437_vm1, %v4569_v1  ;;  %vm822_vm3 = vmpackc.low %vm4570_vm2, %vm4570_vm2  ;;  %v4932_v2 = vshrl.u32 %v539_v0, 7  ;;  %v4274_v15 = vld [vmem:[%s4916_s15] ss:$0 sps:$4 sm:$0xff]   ;;  %3908 = vmatpush3.bf16.msra.mxu0 %v4272_v11  ;;  %3836 = vmatpush3.bf16.msra.mxu1 %v4273_v13  ;;  %vm5763_vm10 = vcmask 1043456  }
  0xcc   : > { %v4938_v6 = vsel %vm822_vm3, 65537, %v4569_v1  ;;  %v4275_v16 = vld [vmem:[%s4916_s15 + $0x4] ss:$0 sps:$4 sm:$0xff]   ;;  %v4276_v17 = vld [vmem:[%s4908_s17] ss:$0 sps:$4 sm:$0xff]   ;;  %521 = vst.msk [vmem:[#allocation2 + $0x20] sm:$0xff] %vm518_vm4, %v4280_v39 }
  0xcd   : > { %v541_v3 = vadd.s32 8, %v4932_v2  ;;  %v542_v4 = vadd.s32 16, %v4932_v2  ;;  %v543_v5 = vadd.s32 24, %v4932_v2  ;;  %v560_v7 = vand.u32 15, %v4932_v2  ;;  %449 = vst.msk [vmem:[#allocation2] sm:$0xf0] %vm437_vm1, %v4274_v15 }
  0xce   : > { %v544_v8 = vadd.s32 32, %v4932_v2  ;;  %v545_v9 = vadd.s32 40, %v4932_v2  ;;  %v4944_v10 = vadd.s32 112, %v4932_v2  ;;  %450 = vst.msk [vmem:[#allocation2 + $0x8] sm:$0xf] %vm435_vm0, %v4275_v16  ;;  %v4277_v20 = vld [vmem:[%s4908_s17 + $0x4] sm:$0xff]  }
  0xcf   : > { %v567_v12 = vand.u32 15, %v541_v3  ;;  %v574_v14 = vand.u32 15, %v542_v4  ;;  %v581_v18 = vand.u32 15, %v543_v5  ;;  %vm748_vm5 = vcmp.ge.s32.totalorder %v560_v7, 1  ;;  %517 = vst.msk [vmem:[#allocation2 + $0x8] sm:$0xf0] %vm437_vm1, %v4276_v17 }
  0xd0   : > { %vm821_vm8 = vmpackc.low %vm748_vm5, %vm748_vm5  ;;  %vm877_vm9 = vsmask.f32 3328  ;;  %v588_v21 = vand.u32 15, %v544_v8  ;;  %v595_v22 = vand.u32 15, %v545_v9  ;;  %519 = vst.msk [vmem:[#allocation2 + $0x10] sm:$0xff] %vm518_vm4, %v4277_v20  ;;  %v4968_v27 = vld [vmem:[#allocation9 + $0x28] sm:$0xff]  }
  0xd1   : > { %vm750_vm6 = vcmp.ge.s32.totalorder %v574_v14, 1  ;;  %vm4950_vm7 = vcmp.le.s32.totalorder %v567_v12, 14  ;;  %vm4957_vm11 = vcmp.le.s32.totalorder %v581_v18, 14  ;;  %v837_v24 = vsel %vm821_vm8, 65537, %v4569_v1  ;;  %v4279_v33 = vld [vmem:[%s4908_s17 + $0xc] sm:$0xff]   ;;  %3925 = vmatprep.subr.bf16.mxu0 %v4968_v27  ;;  %v4281_v44 = vld [vmem:[%s4908_s17 + $0x1c] sm:$0xff]  }
  0xd2   : > { %vm823_vm12 = vmpackc.low %vm750_vm6, %vm750_vm6  ;;  %v3545_v26 = vcombine.low %v837_v24, %v4938_v6  ;;  %vm4970_vm14 = vcmp.ge.s32.totalorder %v588_v21, 1  ;;  %v4975_v29 = vadd.s32 48, %v4932_v2  ;;  %vm4982_vm2 = vcmp.le.s32.totalorder %v595_v22, 14  ;;  %520 = vst.msk [vmem:[#allocation2 + $0x18] sm:$0xff] %vm518_vm4, %v4279_v33  ;;  %v4282_v55 = vld [vmem:[%s4908_s17 + $0x24] sm:$0xff]   ;;  %v4283_v61 = vld [vmem:[%s4908_s17 + $0x2c] sm:$0xff]  }
  0xd3   : > { %v839_v25 = vsel %vm823_vm12, 65537, %v4569_v1  ;;  %vm1368_vm13 = vmpackc.low %vm4950_vm7, %vm4950_vm7  ;;  %v658_v34 = vand.u32 15, %v4944_v10  ;;  %vm1126_vm3 = vsmask.f32 4352  ;;  %522 = vst.msk [vmem:[#allocation2 + $0x28] sm:$0xff] %vm518_vm4, %v4281_v44  ;;  %v4284_v10 = vld [vmem:[%s4908_s17 + $0x34] sm:$0xff]  }
  0xd4   : > { %v3546_v30 = vcombine.low %v839_v25, %v4938_v6  ;;  %vm1370_vm15 = vmpackc.low %vm4957_vm11, %vm4957_vm11  ;;  %v1384_v31 = vsel %vm1368_vm13, 65537, %v4569_v1  ;;  %v879_v35 = vshrl.u32 %v3545_v26, 16  ;;  %v882_v36 = vshll.u32 %v3545_v26, 16  ;;  %v969_v47 = vld [vmem:[#allocation2] sm:$0xf0]  ;;  %523 = vst.msk [vmem:[#allocation2 + $0x30] sm:$0xff] %vm518_vm4, %v4282_v55 }
  0xd5   : > { %v1386_v37 = vsel %vm1370_vm15, 65537, %v4569_v1  ;;  %v3571_v38 = vcombine.low %v4938_v6, %v1384_v31  ;;  %vm825_vm5 = vmpackc.low %vm4970_vm14, %vm4970_vm14  ;;  %v982_v53 = vrot.slane %v969_v47, 4  ;;  %524 = vst.msk [vmem:[#allocation2 + $0x38] sm:$0xff] %vm518_vm4, %v4283_v61  ;;  %vm5029_vm7 = vcmp.ge.s32.totalorder %v658_v34, 1  ;;  %v4286_v25 = vld [vmem:[#allocation9] sm:$0xff]   ;;  %v5063_v32 = vld [vmem:[#allocation2 + $0x20] sm:$0xff] }
  0xd6   : > { %v887_v40 = vshrl.u32 %v3546_v30, 16  ;;  %v890_v41 = vshll.u32 %v3546_v30, 16  ;;  %v3572_v42 = vcombine.low %v4938_v6, %v1386_v37  ;;  %v841_v43 = vsel %vm825_vm5, 65537, %v4569_v1  ;;  %v5000_v50 = vld [vmem:[#allocation2 + $0x8] sm:$0xff]  ;;  %vm1372_vm6 = vmpackc.low %vm4982_vm2, %vm4982_vm2  ;;  %525 = vst.msk [vmem:[#allocation2 + $0x40] sm:$0xff] %vm518_vm4, %v4284_v10  ;;  %3853 = vmatprep.subr.bf16.mxu1 %v4286_v25  ;;  %s5834_s21 = sld [smem:[#allocation30_spill]] }
  0xd7   : > { %v881_v45 = vrot.slane %v879_v35, 4  ;;  %v884_v46 = vrot.slane %v882_v36, 5  ;;  %v1424_v48 = vshrl.u32 %v3571_v38, 16  ;;  %v1427_v49 = vshll.u32 %v3571_v38, 16  ;;  %v1980_v60 = vld [vmem:[#allocation2 + $0x8] sm:$0xf0]  ;;  %vm835_vm13 = vmpackc.low %vm5029_vm7, %vm5029_vm7 }
  0xd8   : > { %v889_v51 = vrot.slane %v887_v40, 4  ;;  %v892_v52 = vrot.slane %v890_v41, 5  ;;  %v1432_v54 = vshrl.u32 %v3572_v42, 16  ;;  %v983_v57 = vrot.slane %v5000_v50, 4  ;;  %v5010_v3 = vld [vmem:[#allocation2 + $0x10] sm:$0xff]  ;;  %s5835_s28 = sld [smem:[#allocation31_spill]] }
  0xd9   : > { %v5004_v56 = vor.u32 %v884_v46, %v881_v45  ;;  %v1426_v58 = vrot.slane %v1424_v48, 3  ;;  %v1429_v59 = vrot.slane %v1427_v49, 4  ;;  %v1435_v0 = vshll.u32 %v3572_v42, 16  ;;  %v5056_v24 = vld [vmem:[#allocation2 + $0x18] sm:$0xff]  ;;  %v5085_v42 = vld [vmem:[#allocation9 + $0x30] sm:$0xff]   ;;  %s5652_s3 = scalar_lea.vmem [#allocation12], %s3526_s6 }
  0xda   : > { %v5008_v62 = vor.u32 %v892_v52, %v889_v51  ;;  %v1434_v63 = vrot.slane %v1432_v54, 3  ;;  %v1992_v4 = vrot.slane %v1980_v60, 4  ;;  %v984_v5 = vsel %vm5763_vm10, %v982_v53, %v983_v57  ;;  %v5072_v36 = vld [vmem:[#allocation2 + $0x28] sm:$0xff]  ;;  %v4285_v49 = vld [vmem:[%s4908_s17 + $0x3c] ss:$0 sps:$4 sm:$0xff]   ;;  %s5836_s12 = sld [smem:[#allocation19_spill]] }
  0xdb   : > { %v5017_v7 = vor.u32 %v1429_v59, %v1426_v58  ;;  %v1993_v8 = vrot.slane %v5010_v3, 4  ;;  %v3547_v9 = vcombine.low %v841_v43, %v4938_v6  ;;  %3837 = vmatprep.mubr.msk.bf16.mxu1 %vm518_vm4, %v984_v5  ;;  %v1437_v12 = vrot.slane %v1435_v0, 4  ;;  %v5083_v41 = vld [vmem:[#allocation2 + $0x30] sm:$0xff]  ;;  %v5087_v43 = vld [vmem:[#allocation9 + $0x10] sm:$0xff]   ;;  %526 = vst.msk [vmem:[#allocation2 + $0x48] sm:$0xf] %vm435_vm0, %v4285_v49 }
  0xdc   : > { %v5026_v11 = vsel %vm877_vm9, %v5004_v56, %v5008_v62  ;;  %v1388_v18 = vsel %vm1372_vm6, 65537, %v4569_v1  ;;  %v602_v19 = vand.u32 15, %v4975_v29  ;;  %v1995_v46 = vrot.slane %v5056_v24, 4  ;;  %v5092_v48 = vld [vmem:[#allocation2 + $0x38] sm:$0xff]  ;;  %s5837_s27 = sld [smem:[#allocation20_spill]]  ;;  %s3348_s20 = sshll.u32 %s5652_s3, 4  ;;  %s5663_s20 = int_to_ptr.vmem [resolvable:$true] %s3348_s20 }
  0xdd   : > { %vm950_vm8 = vcmp.ne.s16.totalorder %v5026_v11, 0  ;;  %vm5762_vm11 = vcmp.ne.s16.totalorder %v5017_v7, 0  ;;  %v1994_v14 = vsel %vm5763_vm10, %v1992_v4, %v1993_v8  ;;  %v896_v15 = vshrl.u32 %v3547_v9, 16  ;;  %v5106_v54 = vld [vmem:[#allocation2 + $0x40] sm:$0xff]  ;;  %s5838_s14 = sld [smem:[#allocation23_spill]]  ;;  %s5839_s17 = sld [smem:[#allocation32_spill]] }
  0xde   : > { %v5037_v16 = vor.u32 %v1437_v12, %v1434_v63  ;;  %v1503_v17 = vsel %vm5762_vm11, %v969_v47, 0  ;;  %3909 = vmatprep.mubr.msk.bf16.mxu0 %vm518_vm4, %v1994_v14  ;;  %v5052_v20 = vsel %vm950_vm8, %v5000_v50, 0  ;;  %v2153_v23 = vsel %vm5762_vm11, %v1980_v60, 0  ;;  %v5108_v55 = vld [vmem:[#allocation2 + $0x40] sm:$0xf]  ;;  %s3333_s16 = scalar_lea.sflag [#allocation5], %s4902_s8 }
  0xdf   : > { %v1515_v21 = vshrl.u32 %v1503_v17, 16  ;;  %v1518_v22 = vshll.u32 %v1503_v17, 16  ;;  %v2165_v28 = vshrl.u32 %v2153_v23, 16  ;;  %v2168_v30 = vshll.u32 %v2153_v23, 16  ;;  %s4454_s24 = scalar_lea.vmem %s5663_s20, 1024  ;;  %s4571_s7 = smov [#allocation12]  }
  0xe0   : > { %v5061_v26 = vsel %vm1126_vm3, %v5017_v7, %v5037_v16  ;;  %v899_v31 = vshll.u32 %v3547_v9, 16  ;;  %v5069_v33 = vsel %vm950_vm8, %v5010_v3, 0  ;;  %v898_v34 = vrot.slane %v896_v15, 4  ;;  %s3669_s11 = sshll.u32 %s5836_s12, 4  ;;  %p4455_p11 = scmp.ne.s32.totalorder %s5663_s20, %s4454_s24 }
  0xe1   : > { %vm5761_vm12 = vcmp.ne.s16.totalorder %v5061_v26, 0  ;;  %v986_v35 = vsel %vm5763_vm10, %v983_v57, %v1993_v8  ;;  %v5074_v37 = vrot.slane %v1515_v21, 4  ;;  %v5076_v38 = vrot.slane %v1518_v22, 5  ;;  %s4458_s15 = sshll.u32 %s4571_s7, 4  ;;  %s4459_s15 = int_to_ptr.vmem [resolvable:$false] %s4458_s15 }
  0xe2   : > { %v5078_v39 = vrot.slane %v2165_v28, 4  ;;  %v5080_v40 = vrot.slane %v2168_v30, 5  ;;  %3838 = vmatmul.mubr.msk.bf16.vlgmr.msra.gmra.mrb[0].mxu1 %vm518_vm4, %v986_v35  ;;  %v901_v44 = vrot.slane %v899_v31, 5  ;;  %v3573_v45 = vcombine.low %v4938_v6, %v1388_v18  ;;  %s3670_s4 = sshll.u32 %s5837_s27, 5  ;;  %p4461_p2 = scmp.lt.s32.totalorder %s5663_s20, %s4459_s15 }
  0xe3   : > { %v1997_v47 = vrot.slane %v5063_v32, 4  ;;  %3854 = vmatpush3.bf16.msra.mxu1 %v4286_v25  ;;  %v5098_v51 = vsel %vm5761_vm12, %v5000_v50, 0  ;;  %v5103_v52 = vsel %vm5761_vm12, %v5010_v3, 0  ;;  %v1999_v53 = vrot.slane %v5072_v36, 4  ;;  %s3345_s22 = sadd.s32 %s3670_s4, %s3669_s11  ;;  %p5840_p13 = scmp.ne.s32.totalorder %s5838_s14, 0 }
  0xe4   : > { %3871 = vmatprep.subr.bf16.mxu1 %v5087_v43  ;;  %v5111_v57 = vor.u32 %v901_v44, %v898_v34  ;;  %v1441_v58 = vshrl.u32 %v3573_v45, 16  ;;  %v1444_v59 = vshll.u32 %v3573_v45, 16  ;;  %v1996_v50 = vsel %vm5763_vm10, %v1993_v8, %v1995_v46  ;;  %v1745_v45 = vld [vmem:[#allocation2 + $0x48] sm:$0xf]  ;;  %s3671_s26 = sshll.u32 %s3345_s22, 6 }
  0xe5   : > { %3910 = vmatmul.mubr.msk.bf16.vlgmr.msra.gmra.mrb[0].mxu0 %vm518_vm4, %v1996_v50  ;;  %3841 = vmatprep.mubr.msk.bf16.mxu1 %vm518_vm4, %v1996_v50  ;;  %v1998_v60 = vsel %vm5763_vm10, %v1995_v46, %v1997_v47  ;;  %v2001_v61 = vrot.slane %v5083_v41, 4  ;;  %v2003_v63 = vrot.slane %v5092_v48, 4  ;;  %v2005_v0 = vrot.slane %v5106_v54, 4  ;;  %s5668_s1 = scalar_lea.hbm %s5839_s17, %s3671_s26  ;;  %p4456_p0 = pnand %p4455_p11, %p5840_p13 }
  0xe6   : > { %v5127_v4 = vsel %vm877_vm9, %v5008_v62, %v5111_v57  ;;  %v1443_v5 = vrot.slane %v1441_v58, 3  ;;  %v1446_v8 = vrot.slane %v1444_v59, 4  ;;  %3926 = vmatpush3.bf16.msra.mxu0 %v4968_v27  ;;  %3913 = vmatprep.mubr.msk.bf16.mxu0 %vm518_vm4, %v1998_v60  ;;  %v2171_v9 = vor.u32 %v5080_v40, %v5078_v39  ;;  %v4288_v27 = vld [vmem:[%s4922_s23] ss:$0 sps:$4 sm:$0xff]  }
  0xe7   : > { %vm951_vm14 = vcmp.ne.s16.totalorder %v5127_v4, 0  ;;  %v2000_v10 = vsel %vm5763_vm10, %v1997_v47, %v1999_v53  ;;  %v851_v62 = vsel %vm835_vm13, 65537, %v4569_v1  ;;  %v997_v12 = vrot.slane %v5108_v55, 4  ;;  %3943 = vmatprep.subr.bf16.mxu0 %v5085_v42  ;;  %537 = vst.msk [vmem:[#allocation2 + $0x48] sm:$0xf0] %vm437_vm1, %v4288_v27  ;;  %p4457_p8 = pneg %p4456_p0 }
  0xe8   : > { %v960_v14 = vsel %vm951_vm14, %v5010_v3, 0  ;;  %v5147_v15 = vor.u32 %v1446_v8, %v1443_v5  ;;  %v5152_v17 = vsel %vm951_vm14, %v5056_v24, 0  ;;  %v3552_v13 = vcombine.low %v851_v62, %v4938_v6  ;;  %v4291_v5 = vld [vmem:[%s4922_s23 + $0x4] ss:$0 sps:$4 sm:$0xff]   ;;  %s4460_s23 = scalar_lea.vmem %s4459_s15, 2048 }
  0xe9   : > { %v1145_v18 = vshrl.u32 %v960_v14, 16  ;;  %v1148_v21 = vshll.u32 %v960_v14, 16  ;;  %v2002_v22 = vsel %vm5763_vm10, %v1999_v53, %v2001_v61  ;;  %v2004_v23 = vsel %vm5763_vm10, %v2001_v61, %v2003_v63  ;;  %v780_v53 = vld [vmem:[#allocation2] sm:$0xf8]  ;;  %538 = vst.msk [vmem:[#allocation2 + $0x50] sm:$0xf] %vm435_vm0, %v4291_v5  ;;  %p4462_p3 = scmp.lt.s32.totalorder %s4460_s23, %s4454_s24 }
  0xea   : > { %3842 = vmatmul.mubr.msk.bf16.gmra.mrb[4].mxu1 %vm518_vm4, %v1998_v60  ;;  %v5162_v25 = vsel %vm1126_vm3, %v5037_v16, %v5147_v15  ;;  %v2006_v28 = vsel %vm5763_vm10, %v2003_v63, %v2005_v0  ;;  %v941_v30 = vshrl.u32 %v3552_v13, 16  ;;  %v944_v31 = vshll.u32 %v3552_v13, 16 }
  0xeb   : > { %3845 = vmatprep.mubr.msk.bf16.mxu1 %vm518_vm4, %v2000_v10  ;;  %v1147_v34 = vrot.slane %v1145_v18, 3  ;;  %vm5760_vm15 = vcmp.ne.s16.totalorder %v5162_v25, 0  ;;  %v1775_v35 = vshrl.u32 %v5152_v17, 16  ;;  %v5169_v44 = vsel %vm5763_vm10, %v2003_v63, %v997_v12  ;;  %p4463_p5 = por %p4462_p3, %p4461_p2 }
  0xec   : > { %v1150_v46 = vrot.slane %v1148_v21, 4  ;;  %v1505_v16 = vsel %vm5760_vm15, %v5010_v3, 0  ;;  %v2155_v47 = vsel %vm5760_vm15, %v5056_v24, 0  ;;  %v943_v49 = vrot.slane %v941_v30, 4 }
  0xed   : > { %v1532_v58 = vshrl.u32 %v1505_v16, 16  ;;  %v1535_v59 = vshll.u32 %v1505_v16, 16  ;;  %v2182_v50 = vshrl.u32 %v2155_v47, 16  ;;  %v2185_v60 = vshll.u32 %v2155_v47, 16  ;;  %3914 = vmatmul.mubr.msk.bf16.gmra.mrb[4].mxu0 %vm518_vm4, %v2000_v10  ;;  %p4464_p7 = pnand %p4463_p5, %p4457_p8 }
  0xee   : > { %3917 = vmatprep.mubr.msk.bf16.mxu0 %vm518_vm4, %v2002_v22  ;;  %v946_v61 = vrot.slane %v944_v31, 5  ;;  %v2007_v63 = vrot.slane %v1745_v45, 4  ;;  %vm5765_vm1 = vcmp.ne.s16.totalorder %v5004_v56, 0  ;;  %v1136_v3 = vshrl.u32 %v5052_v20, 16 }
  0xef   : > { %v5182_v8 = vrot.slane %v1532_v58, 4  ;;  %v5184_v62 = vrot.slane %v1535_v59, 5  ;;  %v2184_v12 = vrot.slane %v2182_v50, 4  ;;  %v2187_v27 = vrot.slane %v2185_v60, 5 }
  0xf0   : > { %v5186_v14 = vor.u32 %v946_v61, %v943_v49  ;;  %v2008_v13 = vsel %vm5763_vm10, %v2005_v0, %v2007_v63  ;;  %v958_v10 = vsel %vm5765_vm1, %v780_v53, 0  ;;  %v1138_v18 = vrot.slane %v1136_v3, 3 }
  0xf1   : > { %v1128_v21 = vshrl.u32 %v958_v10, 16  ;;  %v1131_v30 = vshll.u32 %v958_v10, 16  ;;  %v1139_v31 = vshll.u32 %v5052_v20, 16  ;;  %v2173_v16 = vshrl.u32 %v5103_v52, 16 }
  0xf2   : > { %3846 = vmatmul.mubr.msk.bf16.gmra.mrb[8].mxu1 %vm518_vm4, %v2002_v22  ;;  %vm5764_vm2 = vcmp.ne.s16.totalorder %v5186_v14, 0  ;;  %v2176_v0 = vshll.u32 %v5103_v52, 16  ;;  %v5198_v47 = vor.u32 %v1150_v46, %v1147_v34  ;;  %v5200_v49 = vor.u32 %v2187_v27, %v2184_v12 }
  0xf3   : > { %3849 = vmatprep.mubr.msk.bf16.mxu1 %vm518_vm4, %v2004_v23  ;;  %v5205_v22 = vsel %vm5764_vm2, %v5108_v55, 0  ;;  %v5209_v20 = vsel %vm5764_vm2, %v1745_v45, 0  ;;  %v1130_v53 = vrot.slane %v1128_v21, 3  ;;  %v1133_v58 = vrot.slane %v1131_v30, 4 }
  0xf4   : > { %v1141_v59 = vrot.slane %v1139_v31, 4  ;;  %v2175_v50 = vrot.slane %v2173_v16, 4  ;;  %v2178_v60 = vrot.slane %v2176_v0, 5  ;;  %vm754_vm0 = vcmp.ge.s32.totalorder %v602_v19, 1 }
  0xf5   : > { %3918 = vmatmul.mubr.msk.bf16.gmra.mrb[8].mxu0 %vm518_vm4, %v2004_v23  ;;  %v1134_v52 = vor.u32 %v1133_v58, %v1130_v53  ;;  %vm827_vm5 = vmpackc.low %vm754_vm0, %vm754_vm0  ;;  %v547_v34 = vadd.s32 56, %v4932_v2  ;;  %v548_v55 = vadd.s32 64, %v4932_v2  ;;  %v549_v46 = vadd.s32 72, %v4932_v2 }
  0xf6   : > { %3921 = vmatprep.mubr.msk.bf16.mxu0 %vm518_vm4, %v2006_v28  ;;  %v1142_v45 = vor.u32 %v1141_v59, %v1138_v18  ;;  %v2179_v61 = vor.u32 %v2178_v60, %v2175_v50  ;;  %v843_v63 = vsel %vm827_vm5, 65537, %v4569_v1  ;;  %v550_v3 = vadd.s32 80, %v4932_v2 }
  0xf7   : > { %v3548_v29 = vcombine.low %v843_v63, %v4938_v6  ;;  %v609_v19 = vand.u32 15, %v547_v34  ;;  %v616_v23 = vand.u32 15, %v548_v55  ;;  %v623_v5 = vand.u32 15, %v549_v46  ;;  %v5257_v63 = vld [vmem:[#allocation9 + $0x18] sm:$0xff]  }
  0xf8   : > { %v1143_v12 = vsel %vm1126_vm3, %v1134_v52, %v1142_v45  ;;  %v2180_v27 = vsel %vm877_vm9, %v2171_v9, %v2179_v61  ;;  %v1152_v28 = vsel %vm1126_vm3, %v1142_v45, %v5198_v47  ;;  %v2189_v10 = vsel %vm877_vm9, %v2179_v61, %v5200_v49 }
  0xf9   : > { %v905_v18 = vshrl.u32 %v3548_v29, 16  ;;  %v908_v21 = vshll.u32 %v3548_v29, 16  ;;  %vm771_vm6 = vcmp.le.s32.totalorder %v609_v19, 14  ;;  %vm756_vm7 = vcmp.ge.s32.totalorder %v616_v23, 1 }
  0xfa   : > { %3850 = vmatmul.mubr.msk.bf16.gmra.mrb[12].mxu1 %vm518_vm4, %v5169_v44  ;;  %vm1374_vm13 = vmpackc.low %vm771_vm6, %vm771_vm6  ;;  %vm5233_vm0 = vcmp.le.s32.totalorder %v623_v5, 14  ;;  %v630_v40 = vand.u32 15, %v550_v3  ;;  %v551_v9 = vadd.s32 88, %v4932_v2  ;;  %v5239_v30 = vadd.s32 96, %v4932_v2 }
  0xfb   : > { %3855 = vmatprep.mubr.msk.bf16.mxu1 %vm518_vm4, %v1143_v12  ;;  %v907_v31 = vrot.slane %v905_v18, 4  ;;  %v910_v16 = vrot.slane %v908_v21, 5  ;;  %v1390_v44 = vsel %vm1374_vm13, 65537, %v4569_v1  ;;  %vm829_vm5 = vmpackc.low %vm756_vm7, %vm756_vm7  ;;  %v5243_v0 = vadd.s32 104, %v4932_v2 }
  0xfc   : > { %v3574_v53 = vcombine.low %v4938_v6, %v1390_v44  ;;  %v845_v58 = vsel %vm829_vm5, 65537, %v4569_v1  ;;  %vm1376_vm6 = vmpackc.low %vm5233_vm0, %vm5233_vm0  ;;  %vm758_vm15 = vcmp.ge.s32.totalorder %v630_v40, 1  ;;  %v637_v59 = vand.u32 15, %v551_v9 }
  0xfd   : > { %3922 = vmatmul.mubr.msk.bf16.gmra.mrb[12].mxu0 %vm518_vm4, %v2008_v13  ;;  %v911_v50 = vor.u32 %v910_v16, %v907_v31  ;;  %v3549_v60 = vcombine.low %v845_v58, %v4938_v6  ;;  %v1392_v52 = vsel %vm1376_vm6, 65537, %v4569_v1  ;;  %vm831_vm7 = vmpackc.low %vm758_vm15, %vm758_vm15  ;;  %v644_v34 = vand.u32 15, %v5239_v30 }
  0xfe   : > { %3927 = vmatprep.mubr.msk.bf16.mxu0 %vm518_vm4, %v2180_v27  ;;  %v1450_v55 = vshrl.u32 %v3574_v53, 16  ;;  %v1453_v46 = vshll.u32 %v3574_v53, 16  ;;  %v3575_v45 = vcombine.low %v4938_v6, %v1392_v52  ;;  %v847_v61 = vsel %vm831_vm7, 65537, %v4569_v1 }
  0xff   : > { %v5261_v13 = vsel %vm877_vm9, %v5111_v57, %v911_v50  ;;  %v914_v3 = vshrl.u32 %v3549_v60, 16  ;;  %v917_v29 = vshll.u32 %v3549_v60, 16  ;;  %v3550_v19 = vcombine.low %v847_v61, %v4938_v6  ;;  %v5270_v60 = vld [vmem:[#allocation9 + $0x38] sm:$0xff]  }
 0x100   : > { %vm952_vm15 = vcmp.ne.s16.totalorder %v5261_v13, 0  ;;  %v1452_v23 = vrot.slane %v1450_v55, 3  ;;  %v1455_v5 = vrot.slane %v1453_v46, 4  ;;  %v1459_v12 = vshrl.u32 %v3575_v45, 16 }
 0x101   : > { %v961_v27 = vsel %vm952_vm15, %v5056_v24, 0  ;;  %v916_v18 = vrot.slane %v914_v3, 4  ;;  %v919_v21 = vrot.slane %v917_v29, 5  ;;  %v1462_v39 = vshll.u32 %v3575_v45, 16 }
 0x102   : > { %3856 = vmatmul.mubr.msk.bf16.vlgmr.msra.gmra.mrb[0].mxu1 %vm518_vm4, %v1152_v28  ;;  %v1154_v57 = vshrl.u32 %v961_v27, 16  ;;  %v1157_v40 = vshll.u32 %v961_v27, 16  ;;  %v1456_v9 = vor.u32 %v1455_v5, %v1452_v23  ;;  %v1461_v31 = vrot.slane %v1459_v12, 3 }
 0x103   : > { %3872 = vmatpush3.bf16.msra.mxu1 %v5087_v43  ;;  %v920_v16 = vor.u32 %v919_v21, %v916_v18  ;;  %v1464_v44 = vrot.slane %v1462_v39, 4  ;;  %v923_v53 = vshrl.u32 %v3550_v19, 16  ;;  %v926_v58 = vshll.u32 %v3550_v19, 16 }
 0x104   : > { %3889 = vmatprep.subr.bf16.mxu1 %v5257_v63  ;;  %v1156_v28 = vrot.slane %v1154_v57, 3  ;;  %v1159_v52 = vrot.slane %v1157_v40, 4  ;;  %v5275_v55 = vsel %vm1126_vm3, %v5147_v15, %v1456_v9  ;;  %vm5277_vm13 = vcmp.le.s32.totalorder %v637_v59, 14 }
 0x105   : > { %3928 = vmatmul.mubr.msk.bf16.vlgmr.msra.gmra.mrb[0].mxu0 %vm518_vm4, %v2189_v10  ;;  %vm1497_vm0 = vcmp.ne.s16.totalorder %v5275_v55, 0  ;;  %v5284_v43 = vsel %vm877_vm9, %v911_v50, %v920_v16  ;;  %v5286_v45 = vor.u32 %v1464_v44, %v1461_v31  ;;  %v925_v61 = vrot.slane %v923_v53, 4  ;;  %vm1378_vm7 = vmpackc.low %vm5277_vm13, %vm5277_vm13 }
 0x106   : > { %3944 = vmatpush3.bf16.msra.mxu0 %v5085_v42  ;;  %v1160_v3 = vor.u32 %v1159_v52, %v1156_v28  ;;  %v2156_v15 = vsel %vm1497_vm0, %v5063_v32, 0  ;;  %vm953_vm5 = vcmp.ne.s16.totalorder %v5284_v43, 0  ;;  %v928_v59 = vrot.slane %v926_v58, 5 }
 0x107   : > { %v2191_v29 = vshrl.u32 %v2156_v15, 16  ;;  %v2194_v10 = vshll.u32 %v2156_v15, 16  ;;  %v962_v50 = vsel %vm953_vm5, %v5063_v32, 0  ;;  %v5298_v19 = vsel %vm1126_vm3, %v1456_v9, %v5286_v45  ;;  %3961 = vmatprep.subr.bf16.mxu0 %v5270_v60 }
 0x108   : > { %v1161_v42 = vsel %vm1126_vm3, %v5198_v47, %v1160_v3  ;;  %v1163_v23 = vshrl.u32 %v962_v50, 16  ;;  %v1166_v5 = vshll.u32 %v962_v50, 16  ;;  %vm1498_vm6 = vcmp.ne.s16.totalorder %v5298_v19, 0 }
 0x109   : > { %3859 = vmatprep.mubr.msk.bf16.mxu1 %vm518_vm4, %v1161_v42  ;;  %v2193_v12 = vrot.slane %v2191_v29, 4  ;;  %v2196_v27 = vrot.slane %v2194_v10, 5  ;;  %v2157_v18 = vsel %vm1498_vm6, %v5072_v36, 0  ;;  %v929_v21 = vor.u32 %v928_v59, %v925_v61 }
 0x10a   : > { %v1165_v39 = vrot.slane %v1163_v23, 3  ;;  %v1168_v57 = vrot.slane %v1166_v5, 4  ;;  %v2200_v47 = vshrl.u32 %v2157_v18, 16  ;;  %v2203_v40 = vshll.u32 %v2157_v18, 16 }
 0x10b   : > { %v2197_v9 = vor.u32 %v2196_v27, %v2193_v12  ;;  %v5312_v31 = vsel %vm877_vm9, %v920_v16, %v929_v21  ;;  %v1394_v44 = vsel %vm1378_vm7, 65537, %v4569_v1  ;;  %vm760_vm13 = vcmp.ge.s32.totalorder %v644_v34, 1 }
 0x10c   : > { %v1169_v53 = vor.u32 %v1168_v57, %v1165_v39  ;;  %v2202_v58 = vrot.slane %v2200_v47, 4  ;;  %v2205_v28 = vrot.slane %v2203_v40, 5  ;;  %vm954_vm12 = vcmp.ne.s16.totalorder %v5312_v31, 0  ;;  %vm833_vm11 = vmpackc.low %vm760_vm13, %vm760_vm13 }
 0x10d   : > { %v2198_v52 = vsel %vm877_vm9, %v5200_v49, %v2197_v9  ;;  %v963_v46 = vsel %vm954_vm12, %v5072_v36, 0  ;;  %v3576_v16 = vcombine.low %v4938_v6, %v1394_v44  ;;  %v849_v61 = vsel %vm833_vm11, 65537, %v4569_v1 }
 0x10e   : > { %3931 = vmatprep.mubr.msk.bf16.mxu0 %vm518_vm4, %v2198_v52  ;;  %v1170_v30 = vsel %vm1126_vm3, %v1160_v3, %v1169_v53  ;;  %v5327_v34 = vor.u32 %v2205_v28, %v2202_v58  ;;  %v1172_v15 = vshrl.u32 %v963_v46, 16  ;;  %v1175_v59 = vshll.u32 %v963_v46, 16 }
 0x10f   : > { %3860 = vmatmul.mubr.msk.bf16.gmra.mrb[4].mxu1 %vm518_vm4, %v1170_v30  ;;  %v1468_v29 = vshrl.u32 %v3576_v16, 16  ;;  %v1471_v49 = vshll.u32 %v3576_v16, 16  ;;  %v3551_v10 = vcombine.low %v849_v61, %v4938_v6  ;;  %v651_v50 = vand.u32 15, %v5243_v0 }
 0x110   : > { %v2207_v42 = vsel %vm877_vm9, %v2197_v9, %v5327_v34  ;;  %v1174_v23 = vrot.slane %v1172_v15, 3  ;;  %v1177_v5 = vrot.slane %v1175_v59, 4  ;;  %v555_v12 = vadd.s32 120, %v4932_v2 }
 0x111   : > { %3932 = vmatmul.mubr.msk.bf16.gmra.mrb[4].mxu0 %vm518_vm4, %v2207_v42  ;;  %v1470_v3 = vrot.slane %v1468_v29, 3  ;;  %v1473_v27 = vrot.slane %v1471_v49, 4  ;;  %v932_v18 = vshrl.u32 %v3551_v10, 16  ;;  %v935_v39 = vshll.u32 %v3551_v10, 16 }
 0x112   : > { %v1178_v57 = vor.u32 %v1177_v5, %v1174_v23  ;;  %vm777_vm11 = vcmp.le.s32.totalorder %v651_v50, 14  ;;  %v665_v47 = vand.u32 15, %v555_v12  ;;  %v1199_v40 = vshrl.u32 %v5205_v22, 16 }
 0x113   : > { %v1474_v44 = vor.u32 %v1473_v27, %v1470_v3  ;;  %v934_v0 = vrot.slane %v932_v18, 4  ;;  %v937_v58 = vrot.slane %v935_v39, 5  ;;  %vm1380_vm7 = vmpackc.low %vm777_vm11, %vm777_vm11  ;;  %v1202_v9 = vshll.u32 %v5205_v22, 16 }
 0x114   : > { %v1179_v28 = vsel %vm1126_vm3, %v1169_v53, %v1178_v57  ;;  %v1396_v2 = vsel %vm1380_vm7, 65537, %v4569_v1  ;;  %vm779_vm13 = vcmp.le.s32.totalorder %v665_v47, 14  ;;  %v5340_v52 = vrot.slane %v1199_v40, 3 }
 0x115   : > { %3863 = vmatprep.mubr.msk.bf16.mxu1 %vm518_vm4, %v1179_v28  ;;  %v5345_v46 = vsel %vm1126_vm3, %v5286_v45, %v1474_v44  ;;  %v938_v16 = vor.u32 %v937_v58, %v934_v0  ;;  %v3577_v61 = vcombine.low %v4938_v6, %v1396_v2  ;;  %vm1382_vm10 = vmpackc.low %vm779_vm13, %vm779_vm13  ;;  %v1204_v30 = vrot.slane %v1202_v9, 4 }
 0x116   : > { %vm1499_vm11 = vcmp.ne.s16.totalorder %v5345_v46, 0  ;;  %v1398_v22 = vsel %vm1382_vm10, 65537, %v4569_v1  ;;  %v1521_v53 = vor.u32 %v5076_v38, %v5074_v37  ;;  %v1523_v15 = vshrl.u32 %v5098_v51, 16 }
 0x117   : > { %v2158_v59 = vsel %vm1499_vm11, %v5083_v41, 0  ;;  %v5357_v45 = vsel %vm877_vm9, %v929_v21, %v938_v16  ;;  %v1477_v29 = vshrl.u32 %v3577_v61, 16  ;;  %v1480_v49 = vshll.u32 %v3577_v61, 16 }
 0x118   : > { %v2209_v10 = vshrl.u32 %v2158_v59, 16  ;;  %v2212_v50 = vshll.u32 %v2158_v59, 16  ;;  %vm955_vm7 = vcmp.ne.s16.totalorder %v5357_v45, 0  ;;  %v5362_v1 = vsel %vm877_vm9, %v938_v16, %v5186_v14 }
 0x119   : > { %v964_v42 = vsel %vm955_vm7, %v5083_v41, 0  ;;  %v1479_v23 = vrot.slane %v1477_v29, 3  ;;  %v1482_v5 = vrot.slane %v1480_v49, 4  ;;  %vm956_vm10 = vcmp.ne.s16.totalorder %v5362_v1, 0 }
 0x11a   : > { %v2211_v21 = vrot.slane %v2209_v10, 4  ;;  %v2214_v12 = vrot.slane %v2212_v50, 5  ;;  %v1181_v3 = vshrl.u32 %v964_v42, 16  ;;  %v1184_v27 = vshll.u32 %v964_v42, 16 }
 0x11b   : > { %v1483_v18 = vor.u32 %v1482_v5, %v1479_v23  ;;  %v965_v39 = vsel %vm956_vm10, %v5092_v48, 0  ;;  %v3578_v47 = vcombine.low %v4938_v6, %v1398_v22  ;;  %v1205_v40 = vor.u32 %v1204_v30, %v5340_v52  ;;  %v2387_v6 = vld [vmem:[#allocation2 + $0x10] sm:$0xf8] }
 0x11c   : > { %v2215_v0 = vor.u32 %v2214_v12, %v2211_v21  ;;  %v1183_v58 = vrot.slane %v1181_v3, 3  ;;  %v1186_v9 = vrot.slane %v1184_v27, 4  ;;  %v1190_v28 = vshrl.u32 %v965_v39, 16  ;;  %v2152_v12 = vld [vmem:[#allocation2 + $0x48] sm:$0x1f] }
 0x11d   : > { %v5374_v2 = vsel %vm1126_vm3, %v1474_v44, %v1483_v18  ;;  %v1193_v16 = vshll.u32 %v965_v39, 16  ;;  %v1486_v61 = vshrl.u32 %v3578_v47, 16  ;;  %v1489_v59 = vshll.u32 %v3578_v47, 16 }
 0x11e   : > { %v2216_v29 = vsel %vm877_vm9, %v5327_v34, %v2215_v0  ;;  %v1187_v49 = vor.u32 %v1186_v9, %v1183_v58  ;;  %vm1500_vm13 = vcmp.ne.s16.totalorder %v5374_v2, 0  ;;  %v1192_v10 = vrot.slane %v1190_v28, 3 }
 0x11f   : > { %3935 = vmatprep.mubr.msk.bf16.mxu0 %vm518_vm4, %v2216_v29  ;;  %v2159_v52 = vsel %vm1500_vm13, %v5092_v48, 0  ;;  %v1195_v30 = vrot.slane %v1193_v16, 4  ;;  %v1488_v44 = vrot.slane %v1486_v61, 3  ;;  %v1491_v22 = vrot.slane %v1489_v59, 4 }
 0x120   : > { %v1188_v50 = vsel %vm1126_vm3, %v1178_v57, %v1187_v49  ;;  %v2218_v42 = vshrl.u32 %v2159_v52, 16  ;;  %v2221_v23 = vshll.u32 %v2159_v52, 16  ;;  %v1525_v5 = vrot.slane %v1523_v15, 4 }
 0x121   : > { %3864 = vmatmul.mubr.msk.bf16.gmra.mrb[8].mxu1 %vm518_vm4, %v1188_v50  ;;  %v1196_v34 = vor.u32 %v1195_v30, %v1192_v10  ;;  %v5385_v21 = vor.u32 %v1491_v22, %v1488_v44  ;;  %v1526_v3 = vshll.u32 %v5098_v51, 16  ;;  %v2396_v27 = vsel %vm5765_vm1, %v2387_v6, 0 }
 0x122   : > { %v2220_v39 = vrot.slane %v2218_v42, 4  ;;  %v2223_v47 = vrot.slane %v2221_v23, 5  ;;  %v2397_v57 = vsel %vm950_vm8, %v5056_v24, 0  ;;  %v2408_v58 = vshrl.u32 %v2396_v27, 16 }
 0x123   : > { %v1197_v15 = vsel %vm1126_vm3, %v1187_v49, %v1196_v34  ;;  %v5396_v9 = vsel %vm1126_vm3, %v1483_v18, %v5385_v21  ;;  %v1206_v28 = vsel %vm1126_vm3, %v1196_v34, %v1205_v40  ;;  %vm1502_vm2 = vcmp.ne.s16.totalorder %v5385_v21, 0 }
 0x124   : > { %v2224_v51 = vor.u32 %v2223_v47, %v2220_v39  ;;  %3867 = vmatprep.mubr.msk.bf16.mxu1 %vm518_vm4, %v1197_v15  ;;  %vm1501_vm1 = vcmp.ne.s16.totalorder %v5396_v9, 0  ;;  %v2161_v11 = vsel %vm1502_vm2, %v2152_v12, 0  ;;  %v1528_v16 = vrot.slane %v1526_v3, 5 }
 0x125   : > { %v2160_v61 = vsel %vm1501_vm1, %v5106_v54, 0  ;;  %v2236_v59 = vshrl.u32 %v2161_v11, 16  ;;  %v2239_v18 = vshll.u32 %v2161_v11, 16  ;;  %v2410_v29 = vrot.slane %v2408_v58, 3 }
 0x126   : > { %v2225_v40 = vsel %vm877_vm9, %v2215_v0, %v2224_v51  ;;  %v2227_v49 = vshrl.u32 %v2160_v61, 16  ;;  %v2230_v10 = vshll.u32 %v2160_v61, 16  ;;  %v1529_v6 = vor.u32 %v1528_v16, %v1525_v5 }
 0x127   : > { %3936 = vmatmul.mubr.msk.bf16.gmra.mrb[8].mxu0 %vm518_vm4, %v2225_v40  ;;  %v2238_v52 = vrot.slane %v2236_v59, 4  ;;  %v2241_v30 = vrot.slane %v2239_v18, 5  ;;  %v2411_v44 = vshll.u32 %v2396_v27, 16  ;;  %v2416_v22 = vshrl.u32 %v2397_v57, 16 }
 0x128   : > { %v2229_v50 = vrot.slane %v2227_v49, 4  ;;  %v2232_v42 = vrot.slane %v2230_v10, 5  ;;  %v1530_v23 = vsel %vm877_vm9, %v1521_v53, %v1529_v6  ;;  %v2419_v34 = vshll.u32 %v2397_v57, 16 }
 0x129   : > { %3868 = vmatmul.mubr.msk.bf16.gmra.mrb[12].mxu1 %vm518_vm4, %v1206_v28  ;;  %v2242_v0 = vor.u32 %v2241_v30, %v2238_v52  ;;  %v2413_v12 = vrot.slane %v2411_v44, 4  ;;  %v2418_v3 = vrot.slane %v2416_v22, 3  ;;  %v1538_v5 = vor.u32 %v5184_v62, %v5182_v8 }
 0x12a   : > { %v2233_v39 = vor.u32 %v2232_v42, %v2229_v50  ;;  %3873 = vmatprep.mubr.msk.bf16.mxu1 %vm518_vm4, %v1530_v23  ;;  %v2421_v27 = vrot.slane %v2419_v34, 4  ;;  %v2398_v47 = vsel %vm951_vm14, %v5063_v32, 0  ;;  %v1506_v37 = vsel %vm1497_vm0, %v5056_v24, 0 }
 0x12b   : > { %v2414_v38 = vor.u32 %v2413_v12, %v2410_v29  ;;  %v1539_v53 = vsel %vm877_vm9, %v1529_v6, %v1538_v5  ;;  %v2425_v57 = vshrl.u32 %v2398_v47, 16  ;;  %v2428_v58 = vshll.u32 %v2398_v47, 16 }
 0x12c   : > { %v2234_v15 = vsel %vm877_vm9, %v2224_v51, %v2233_v39  ;;  %v2243_v8 = vsel %vm877_vm9, %v2233_v39, %v2242_v0  ;;  %v2422_v62 = vor.u32 %v2421_v27, %v2418_v3  ;;  %v1541_v28 = vshrl.u32 %v1506_v37, 16 }
 0x12d   : > { %3939 = vmatprep.mubr.msk.bf16.mxu0 %vm518_vm4, %v2234_v15  ;;  %v2427_v11 = vrot.slane %v2425_v57, 3  ;;  %v2430_v4 = vrot.slane %v2428_v58, 4  ;;  %v1544_v16 = vshll.u32 %v1506_v37, 16  ;;  %v2399_v24 = vsel %vm952_vm15, %v5072_v36, 0 }
 0x12e   : > { %v2423_v61 = vsel %vm1126_vm3, %v2414_v38, %v2422_v62  ;;  %v1543_v59 = vrot.slane %v1541_v28, 4  ;;  %v2434_v18 = vshrl.u32 %v2399_v24, 16  ;;  %v2437_v29 = vshll.u32 %v2399_v24, 16 }
 0x12f   : > { %3940 = vmatmul.mubr.msk.bf16.gmra.mrb[12].mxu0 %vm518_vm4, %v2243_v8  ;;  %v2431_v51 = vor.u32 %v2430_v4, %v2427_v11  ;;  %v1546_v40 = vrot.slane %v1544_v16, 5  ;;  %v1507_v49 = vsel %vm1498_vm6, %v5063_v32, 0  ;;  %v2400_v10 = vsel %vm953_vm5, %v5083_v41, 0  ;;  %v5452_v8 = vld [vmem:[#allocation9 + $0x40] sm:$0xff]   ;;  %v5461_v4 = vld [vmem:[#allocation2 + $0x48] sm:$0xff] }
 0x130   : > { %3945 = vmatprep.mubr.msk.bf16.mxu0 %vm518_vm4, %v2423_v61  ;;  %v2436_v6 = vrot.slane %v2434_v18, 3  ;;  %v2439_v52 = vrot.slane %v2437_v29, 4  ;;  %v1550_v30 = vshrl.u32 %v1507_v49, 16  ;;  %v1553_v44 = vshll.u32 %v1507_v49, 16 }
 0x131   : > { %v1778_v22 = vshll.u32 %v5152_v17, 16  ;;  %3874 = vmatmul.mubr.msk.bf16.vlgmr.msra.gmra.mrb[0].mxu1 %vm518_vm4, %v1539_v53  ;;  %v1547_v50 = vor.u32 %v1546_v40, %v1543_v59  ;;  %v2443_v42 = vshrl.u32 %v2400_v10, 16  ;;  %v2446_v23 = vshll.u32 %v2400_v10, 16 }
 0x132   : > { %v2440_v34 = vor.u32 %v2439_v52, %v2436_v6  ;;  %v1552_v0 = vrot.slane %v1550_v30, 4  ;;  %v1555_v32 = vrot.slane %v1553_v44, 5  ;;  %v1508_v12 = vsel %vm1499_vm11, %v5072_v36, 0  ;;  %3890 = vmatpush3.bf16.msra.mxu1 %v5257_v63  ;;  %v1334_v6 = vld [vmem:[#allocation2 + $0x40] sm:$0x1f] }
 0x133   : > { %v1548_v3 = vsel %vm877_vm9, %v1538_v5, %v1547_v50  ;;  %v2445_v39 = vrot.slane %v2443_v42, 3  ;;  %v2448_v27 = vrot.slane %v2446_v23, 4  ;;  %v1559_v47 = vshrl.u32 %v1508_v12, 16 }
 0x134   : > { %v2432_v37 = vsel %vm1126_vm3, %v2422_v62, %v2431_v51  ;;  %3877 = vmatprep.mubr.msk.bf16.mxu1 %vm518_vm4, %v1548_v3  ;;  %v1556_v38 = vor.u32 %v1555_v32, %v1552_v0  ;;  %v1562_v53 = vshll.u32 %v1508_v12, 16  ;;  %v2401_v57 = vsel %vm954_vm12, %v5092_v48, 0 }
 0x135   : > { %v2441_v58 = vsel %vm1126_vm3, %v2431_v51, %v2440_v34  ;;  %v1561_v36 = vrot.slane %v1559_v47, 4  ;;  %v2452_v15 = vshrl.u32 %v2401_v57, 16  ;;  %v2455_v63 = vshll.u32 %v2401_v57, 16 }
 0x136   : > { %v1557_v5 = vsel %vm877_vm9, %v1547_v50, %v1556_v38  ;;  %v1564_v28 = vrot.slane %v1562_v53, 5  ;;  %v1509_v62 = vsel %vm1500_vm13, %v5083_v41, 0  ;;  %v2402_v11 = vsel %vm955_vm7, %v5106_v54, 0 }
 0x137   : > { %3946 = vmatmul.mubr.msk.bf16.vlgmr.msra.gmra.mrb[0].mxu0 %vm518_vm4, %v2432_v37  ;;  %v2449_v16 = vor.u32 %v2448_v27, %v2445_v39  ;;  %v2454_v24 = vrot.slane %v2452_v15, 3  ;;  %v2457_v61 = vrot.slane %v2455_v63, 4  ;;  %v1568_v59 = vshrl.u32 %v1509_v62, 16  ;;  %v5480_v39 = vld [vmem:[#allocation2 + $0x50] sm:$0xf] }
 0x138   : > { %3962 = vmatpush3.bf16.msra.mxu0 %v5270_v60  ;;  %3949 = vmatprep.mubr.msk.bf16.mxu0 %vm518_vm4, %v2441_v58  ;;  %v1565_v18 = vor.u32 %v1564_v28, %v1561_v36  ;;  %v1571_v29 = vshll.u32 %v1509_v62, 16  ;;  %v2461_v51 = vshrl.u32 %v2402_v11, 16  ;;  %v2464_v41 = vshll.u32 %v2402_v11, 16  ;;  %v1737_v27 = vld [vmem:[#allocation2 + $0x8] sm:$0xf8] }
 0x139   : > { %3878 = vmatmul.mubr.msk.bf16.gmra.mrb[4].mxu1 %vm518_vm4, %v1557_v5  ;;  %v2458_v40 = vor.u32 %v2457_v61, %v2454_v24  ;;  %v1570_v54 = vrot.slane %v1568_v59, 4  ;;  %v1510_v49 = vsel %vm1501_vm1, %v5092_v48, 0  ;;  %v2403_v10 = vsel %vm956_vm10, %v5461_v4, 0  ;;  %3979 = vmatprep.subr.bf16.mxu0 %v5452_v8 }
 0x13a   : > { %v1566_v60 = vsel %vm877_vm9, %v1556_v38, %v1565_v18  ;;  %v1573_v52 = vrot.slane %v1571_v29, 5  ;;  %v2463_v30 = vrot.slane %v2461_v51, 3  ;;  %v2466_v44 = vrot.slane %v2464_v41, 4 }
 0x13b   : > { %v2450_v50 = vsel %vm1126_vm3, %v2440_v34, %v2449_v16  ;;  %3881 = vmatprep.mubr.msk.bf16.mxu1 %vm518_vm4, %v1566_v60  ;;  %v1577_v42 = vshrl.u32 %v1510_v49, 16  ;;  %v1580_v23 = vshll.u32 %v1510_v49, 16  ;;  %v2470_v0 = vshrl.u32 %v2403_v10, 16 }
 0x13c   : > { %v2459_v48 = vsel %vm1126_vm3, %v2449_v16, %v2458_v40  ;;  %v1574_v32 = vor.u32 %v1573_v52, %v1570_v54  ;;  %v2473_v12 = vshll.u32 %v2403_v10, 16  ;;  %v1511_v3 = vsel %vm1502_vm2, %v1334_v6, 0 }
 0x13d   : > { %v1579_v47 = vrot.slane %v1577_v42, 4  ;;  %v1582_v37 = vrot.slane %v1580_v23, 5  ;;  %v2472_v38 = vrot.slane %v2470_v0, 3  ;;  %v1586_v53 = vshrl.u32 %v1511_v3, 16  ;;  %v5501_v42 = vld [vmem:[#allocation2 + $0x10] sm:$0xf0] }
 0x13e   : > { %v1575_v34 = vsel %vm877_vm9, %v1565_v18, %v1574_v32  ;;  %v2467_v57 = vor.u32 %v2466_v44, %v2463_v30  ;;  %v2475_v58 = vrot.slane %v2473_v12, 4  ;;  %v1589_v36 = vshll.u32 %v1511_v3, 16  ;;  %v5504_v0 = vld [vmem:[#allocation2 + $0x20] sm:$0xff]  ;;  %v5515_v3 = vld [vmem:[#allocation2 + $0x28] sm:$0xff] }
 0x13f   : > { %3950 = vmatmul.mubr.msk.bf16.gmra.mrb[4].mxu0 %vm518_vm4, %v2450_v50  ;;  %v1583_v15 = vor.u32 %v1582_v37, %v1579_v47  ;;  %v1588_v63 = vrot.slane %v1586_v53, 4  ;;  %vm5821_vm8 = vcmp.ne.s16.totalorder %v5186_v14, 0  ;;  %vm5822_vm14 = vcmp.ne.s16.totalorder %v5004_v56, 0 }
 0x140   : > { %v2404_v5 = vsel %vm5821_vm8, %v5480_v39, 0  ;;  %v1746_v28 = vsel %vm5822_vm14, %v1737_v27, 0  ;;  %3953 = vmatprep.mubr.msk.bf16.mxu0 %vm518_vm4, %v2459_v48  ;;  %v2476_v62 = vor.u32 %v2475_v58, %v2472_v38  ;;  %v1591_v11 = vrot.slane %v1589_v36, 5  ;;  %v5520_v27 = vld [vmem:[#allocation2 + $0x30] sm:$0xff] }
 0x141   : > { %v2479_v16 = vshrl.u32 %v2404_v5, 16  ;;  %v2482_v24 = vshll.u32 %v2404_v5, 16  ;;  %3882 = vmatmul.mubr.msk.bf16.gmra.mrb[8].mxu1 %vm518_vm4, %v1575_v34  ;;  %v1584_v61 = vsel %vm877_vm9, %v1574_v32, %v1583_v15  ;;  %v1758_v59 = vshrl.u32 %v1746_v28, 16  ;;  %v5512_v32 = vld [vmem:[#allocation2 + $0x18] sm:$0xff] }
 0x142   : > { %v1761_v18 = vshll.u32 %v1746_v28, 16  ;;  %v1766_v29 = vshrl.u32 %v5069_v33, 16  ;;  %3885 = vmatprep.mubr.msk.bf16.mxu1 %vm518_vm4, %v1584_v61  ;;  %v1592_v14 = vor.u32 %v1591_v11, %v1588_v63  ;;  %v1769_v10 = vshll.u32 %v5069_v33, 16  ;;  %v5529_v5 = vld [vmem:[#allocation2 + $0x38] sm:$0xff] }
 0x143   : > { %v2481_v51 = vrot.slane %v2479_v16, 3  ;;  %v2484_v56 = vrot.slane %v2482_v24, 4  ;;  %v1760_v41 = vrot.slane %v1758_v59, 3  ;;  %v1777_v6 = vrot.slane %v1775_v35, 3 }
 0x144   : > { %v1763_v54 = vrot.slane %v1761_v18, 4  ;;  %v1768_v49 = vrot.slane %v1766_v29, 3  ;;  %v2468_v60 = vsel %vm1126_vm3, %v2458_v40, %v2467_v57  ;;  %v1780_v52 = vrot.slane %v1778_v22, 4 }
 0x145   : > { %v2477_v30 = vsel %vm1126_vm3, %v2467_v57, %v2476_v62  ;;  %v1771_v50 = vrot.slane %v1769_v10, 4  ;;  %v1593_v23 = vsel %vm877_vm9, %v1583_v15, %v1592_v14  ;;  %v1749_v33 = vsel %vm952_vm15, %v5504_v0, 0 }
 0x146   : > { %v1764_v44 = vor.u32 %v1763_v54, %v1760_v41  ;;  %v2485_v35 = vor.u32 %v2484_v56, %v2481_v51  ;;  %v1784_v17 = vshrl.u32 %v1749_v33, 16  ;;  %v1787_v22 = vshll.u32 %v1749_v33, 16  ;;  %v4307_v41 = vld [vmem:[#allocation2 + $0x40] sm:$0xff] }
 0x147   : > { %3954 = vmatmul.mubr.msk.bf16.gmra.mrb[8].mxu0 %vm518_vm4, %v2468_v60  ;;  %v1772_v40 = vor.u32 %v1771_v50, %v1768_v49  ;;  %v2642_v48 = vrot.slane %v5501_v42, 4  ;;  %v2643_v12 = vrot.slane %v5512_v32, 4  ;;  %v1750_v13 = vsel %vm953_vm5, %v5515_v3, 0 }
 0x148   : > { %3957 = vmatprep.mubr.msk.bf16.mxu0 %vm518_vm4, %v2477_v30  ;;  %v1751_v47 = vsel %vm954_vm12, %v5520_v27, 0  ;;  %v1781_v38 = vor.u32 %v1780_v52, %v1777_v6  ;;  %v1786_v53 = vrot.slane %v1784_v17, 3  ;;  %v1789_v34 = vrot.slane %v1787_v22, 4 }
 0x149   : > { %3886 = vmatmul.mubr.msk.bf16.gmra.mrb[12].mxu1 %vm518_vm4, %v1593_v23  ;;  %v1773_v37 = vsel %vm1126_vm3, %v1764_v44, %v1772_v40  ;;  %v1793_v57 = vshrl.u32 %v1750_v13, 16  ;;  %v1796_v58 = vshll.u32 %v1750_v13, 16  ;;  %v1802_v43 = vshrl.u32 %v1751_v47, 16 }
 0x14a   : > { %3891 = vmatprep.mubr.msk.bf16.mxu1 %vm518_vm4, %v1773_v37  ;;  %v1790_v36 = vor.u32 %v1789_v34, %v1786_v53  ;;  %v1805_v15 = vshll.u32 %v1751_v47, 16  ;;  %v2486_v63 = vsel %vm1126_vm3, %v2476_v62, %v2485_v35  ;;  %v1752_v31 = vsel %vm955_vm7, %v5529_v5, 0 }
 0x14b   : > { %vm5823_vm12 = vcmask 1043456   ;;  %v1782_v11 = vsel %vm1126_vm3, %v1772_v40, %v1781_v38  ;;  %v1804_v16 = vrot.slane %v1802_v43, 3  ;;  %v1795_v61 = vrot.slane %v1793_v57, 3 }
 0x14c   : > { %v2644_v28 = vsel %vm5823_vm12, %v2642_v48, %v2643_v12  ;;  %v1807_v24 = vrot.slane %v1805_v15, 4  ;;  %v1798_v59 = vrot.slane %v1796_v58, 4  ;;  %v1811_v18 = vshrl.u32 %v1752_v31, 16  ;;  %vm5824_vm15 = vmmov %vm5823_vm12  ;;  %v2802_v58 = vld [vmem:[#allocation2 + $0x50] sm:$0x1f] }
 0x14d   : > { %v1814_v29 = vshll.u32 %v1752_v31, 16  ;;  %v2645_v62 = vrot.slane %v5504_v0, 4  ;;  %v1791_v14 = vsel %vm1126_vm3, %v1781_v38, %v1790_v36  ;;  %v1753_v54 = vsel %vm956_vm10, %v4307_v41, 0  ;;  %vm5825_vm5 = vmmov %vm5823_vm12 }
 0x14e   : > { %v1808_v45 = vor.u32 %v1807_v24, %v1804_v16  ;;  %v1813_v51 = vrot.slane %v1811_v18, 3  ;;  %v2647_v49 = vrot.slane %v5515_v3, 4  ;;  %v1799_v10 = vor.u32 %v1798_v59, %v1795_v61  ;;  %vm5827_vm10 = vmmov %vm5825_vm5 }
 0x14f   : > { %3958 = vmatmul.mubr.msk.bf16.gmra.mrb[12].mxu0 %vm518_vm4, %v2486_v63  ;;  %v1816_v56 = vrot.slane %v1814_v29, 4  ;;  %v1820_v60 = vshrl.u32 %v1753_v54, 16  ;;  %v1823_v52 = vshll.u32 %v1753_v54, 16  ;;  %v2646_v30 = vsel %vm5824_vm15, %v2643_v12, %v2645_v62  ;;  %vm5828_vm8 = vmmov %vm5825_vm5 }
 0x150   : > { %3963 = vmatprep.mubr.msk.bf16.mxu0 %vm518_vm4, %v2644_v28  ;;  %v2648_v50 = vsel %vm5825_vm5, %v2645_v62, %v2647_v49  ;;  %v1800_v23 = vsel %vm1126_vm3, %v1790_v36, %v1799_v10  ;;  %v1809_v1 = vsel %vm1126_vm3, %v1799_v10, %v1808_v45  ;;  %v2649_v40 = vrot.slane %v5520_v27, 4 }
 0x151   : > { %3892 = vmatmul.mubr.msk.bf16.vlgmr.msra.gmra.mrb[0].mxu1 %vm518_vm4, %v1782_v11  ;;  %v1817_v6 = vor.u32 %v1816_v56, %v1813_v51  ;;  %v1822_v33 = vrot.slane %v1820_v60, 3  ;;  %v1825_v35 = vrot.slane %v1823_v52, 4  ;;  %v2651_v17 = vrot.slane %v5529_v5, 4 }
 0x152   : > { %3895 = vmatprep.mubr.msk.bf16.mxu1 %vm518_vm4, %v1791_v14  ;;  %v1829_v22 = vshrl.u32 %v5209_v20, 16  ;;  %v1832_v48 = vshll.u32 %v5209_v20, 16  ;;  %vm5826_vm7 = vcmp.ne.s16.totalorder %v5017_v7, 0  ;;  %v2653_v47 = vrot.slane %v4307_v41, 4 }
 0x153   : > { %v1818_v44 = vsel %vm1126_vm3, %v1808_v45, %v1817_v6  ;;  %v1826_v12 = vor.u32 %v1825_v35, %v1822_v33  ;;  %v2803_v13 = vsel %vm5826_vm7, %v5501_v42, 0  ;;  %v2809_v37 = vsel %vm1500_vm13, %v4307_v41, 0 }
 0x154   : > { %v2652_v38 = vsel %vm5828_vm8, %v2649_v40, %v2651_v17  ;;  %v2655_v53 = vrot.slane %v5461_v4, 4  ;;  %v1831_v34 = vrot.slane %v1829_v22, 3  ;;  %v2868_v57 = vshrl.u32 %v2809_v37, 16 }
 0x155   : > { %v1834_v36 = vrot.slane %v1832_v48, 4  ;;  %vm5829_vm14 = vcmp.ne.s16.totalorder %v5061_v26, 0  ;;  %v2871_v7 = vshll.u32 %v2809_v37, 16  ;;  %v2810_v42 = vsel %vm1501_vm1, %v5461_v4, 0  ;;  %vm5830_vm1 = vmmov %vm5825_vm5 }
 0x156   : > { %v2804_v20 = vsel %vm5829_vm14, %v5512_v32, 0  ;;  %v1827_v2 = vsel %vm1126_vm3, %v1817_v6, %v1826_v12  ;;  %v2815_v43 = vshrl.u32 %v2803_v13, 16  ;;  %v2818_v15 = vshll.u32 %v2803_v13, 16  ;;  %vm5831_vm13 = vmmov %vm5830_vm1 }
 0x157   : > { %3964 = vmatmul.mubr.msk.bf16.vlgmr.msra.gmra.mrb[0].mxu0 %vm518_vm4, %v2646_v30  ;;  %v2877_v63 = vshrl.u32 %v2810_v42, 16  ;;  %v2870_v31 = vrot.slane %v2868_v57, 4  ;;  %v2873_v28 = vrot.slane %v2871_v7, 5  ;;  %v2880_v11 = vshll.u32 %v2810_v42, 16  ;;  %v4294_v42 = vld [vmem:[#allocation11] sm:$0xff]  }
 0x158   : > { %3980 = vmatpush3.bf16.msra.mxu0 %v5452_v8  ;;  %3967 = vmatprep.mubr.msk.bf16.mxu0 %vm518_vm4, %v2648_v50  ;;  %v2650_v8 = vsel %vm5827_vm10, %v2647_v49, %v2649_v40  ;;  %v2811_v26 = vsel %vm1502_vm2, %v2802_v58, 0  ;;  %v2823_v32 = vshrl.u32 %v2804_v20, 16  ;;  %v2826_v9 = vshll.u32 %v2804_v20, 16 }
 0x159   : > { %3896 = vmatmul.mubr.msk.bf16.gmra.mrb[4].mxu1 %vm518_vm4, %v1800_v23  ;;  %v2879_v4 = vrot.slane %v2877_v63, 4  ;;  %v2886_v16 = vshrl.u32 %v2811_v26, 16  ;;  %v1835_v24 = vor.u32 %v1834_v36, %v1831_v34  ;;  %v2882_v61 = vrot.slane %v2880_v11, 5  ;;  %3997 = vmatprep.subr.bf16.mxu1 %v4294_v42  ;;  %v4298_v63 = vld [vmem:[#allocation11 + $0x20] sm:$0xff]   ;;  %v4301_v11 = vld [vmem:[#allocation11 + $0x38] sm:$0xff]  }
 0x15a   : > { %3899 = vmatprep.mubr.msk.bf16.mxu1 %vm518_vm4, %v1809_v1  ;;  %v2889_v59 = vshll.u32 %v2811_v26, 16  ;;  %v2654_v18 = vsel %vm5830_vm1, %v2651_v17, %v2653_v47  ;;  %v2656_v29 = vsel %vm5831_vm13, %v2653_v47, %v2655_v53  ;;  %v2817_v14 = vrot.slane %v2815_v43, 4  ;;  %3998 = vmatpush3.bf16.msra.mxu1 %v4294_v42  ;;  %v4296_v43 = vld [vmem:[#allocation11 + $0x10] sm:$0xff]  }
 0x15b   : > { %v2888_v62 = vrot.slane %v2886_v16, 4  ;;  %v2874_v45 = vor.u32 %v2873_v28, %v2870_v31  ;;  %v2883_v21 = vor.u32 %v2882_v61, %v2879_v4  ;;  %v2820_v56 = vrot.slane %v2818_v15, 5  ;;  %v4297_v15 = vld [vmem:[#allocation11 + $0x18] sm:$0xff]   ;;  %v4299_v31 = vld [vmem:[#allocation11 + $0x28] sm:$0xff]   ;;  %v4300_v28 = vld [vmem:[#allocation11 + $0x30] sm:$0xff]  }
 0x15c   : > { %v2891_v51 = vrot.slane %v2889_v59, 5  ;;  %v2825_v41 = vrot.slane %v2823_v32, 4  ;;  %v2828_v54 = vrot.slane %v2826_v9, 5  ;;  %vm5832_vm2 = vcmp.ne.s16.totalorder %v5162_v25, 0 }
 0x15d   : > { %v2805_v49 = vsel %vm5832_vm2, %v5504_v0, 0  ;;  %v1836_v10 = vsel %vm1126_vm3, %v1826_v12, %v1835_v24  ;;  %v2806_v6 = vsel %vm1497_vm0, %v5515_v3, 0  ;;  %v2884_v60 = vsel %vm877_vm9, %v2874_v45, %v2883_v21  ;;  %vm5833_vm3 = vmmov %vm5830_vm1 }
 0x15e   : > { %v2892_v52 = vor.u32 %v2891_v51, %v2888_v62  ;;  %v2657_v30 = vrot.slane %v5480_v39, 4  ;;  %v2835_v50 = vshll.u32 %v2805_v49, 16  ;;  %v2821_v0 = vor.u32 %v2820_v56, %v2817_v14 }
 0x15f   : > { %3968 = vmatmul.mubr.msk.bf16.gmra.mrb[4].mxu0 %vm518_vm4, %v2650_v8  ;;  %v2829_v23 = vor.u32 %v2828_v54, %v2825_v41  ;;  %v2841_v1 = vshrl.u32 %v2806_v6, 16  ;;  %v2844_v55 = vshll.u32 %v2806_v6, 16  ;;  %v2807_v39 = vsel %vm1498_vm6, %v5520_v27, 0  ;;  %v5626_v54 = vld [vmem:[%s5834_s21] ss:$0 sm:$0xff] }
 0x160   : > { %3971 = vmatprep.mubr.msk.bf16.mxu0 %vm518_vm4, %v2652_v38  ;;  %v2893_v25 = vsel %vm877_vm9, %v2883_v21, %v2892_v52  ;;  %v2658_v3 = vsel %vm5833_vm3, %v2655_v53, %v2657_v30  ;;  %v2837_v35 = vrot.slane %v2835_v50, 5  ;;  %v2808_v48 = vsel %vm1499_vm11, %v5529_v5, 0 }
 0x161   : > { %3900 = vmatmul.mubr.msk.bf16.gmra.mrb[8].mxu1 %vm518_vm4, %v1818_v44  ;;  %v2832_v44 = vshrl.u32 %v2805_v49, 16  ;;  %v2830_v40 = vsel %vm877_vm9, %v2821_v0, %v2829_v23  ;;  %v2843_v17 = vrot.slane %v2841_v1, 4  ;;  %v2846_v22 = vrot.slane %v2844_v55, 5 }
 0x162   : > { %3903 = vmatprep.mubr.msk.bf16.mxu1 %vm518_vm4, %v1827_v2  ;;  %v2850_v13 = vshrl.u32 %v2807_v39, 16  ;;  %v2853_v8 = vshll.u32 %v2807_v39, 16  ;;  %v2859_v37 = vshrl.u32 %v2808_v48, 16  ;;  %v2862_v38 = vshll.u32 %v2808_v48, 16  ;;  %v4295_v2 = vld [vmem:[#allocation11 + $0x8] sm:$0xff]  }
 0x163   : > { %v2834_v33 = vrot.slane %v2832_v44, 4  ;;  %v2847_v47 = vor.u32 %v2846_v22, %v2843_v17  ;;  %3999 = vmatprep.subr.bf16.mxu1 %v4295_v2 }
 0x164   : > { %v2852_v34 = vrot.slane %v2850_v13, 4  ;;  %v2855_v57 = vrot.slane %v2853_v8, 5  ;;  %v2861_v27 = vrot.slane %v2859_v37, 4  ;;  %v2864_v58 = vrot.slane %v2862_v38, 5  ;;  %4000 = vmatpush3.bf16.msra.mxu1 %v4295_v2 }
 0x165   : > { %v2838_v12 = vor.u32 %v2837_v35, %v2834_v33  ;;  %4001 = vmatprep.subr.bf16.mxu1 %v4296_v43 }
 0x166   : > { %v2856_v46 = vor.u32 %v2855_v57, %v2852_v34  ;;  %v2865_v5 = vor.u32 %v2864_v58, %v2861_v27 }
 0x167   : > { %3972 = vmatmul.mubr.msk.bf16.gmra.mrb[8].mxu0 %vm518_vm4, %v2654_v18  ;;  %v2839_v53 = vsel %vm877_vm9, %v2829_v23, %v2838_v12  ;;  %v2848_v19 = vsel %vm877_vm9, %v2838_v12, %v2847_v47 }
 0x168   : > { %3975 = vmatprep.mubr.msk.bf16.mxu0 %vm518_vm4, %v2656_v29  ;;  %v2857_v36 = vsel %vm877_vm9, %v2847_v47, %v2856_v46  ;;  %v2866_v20 = vsel %vm877_vm9, %v2856_v46, %v2865_v5  ;;  %v2875_v7 = vsel %vm877_vm9, %v2865_v5, %v2874_v45  ;;  %4002 = vmatpush3.bf16.msra.mxu1 %v4296_v43 }
 0x169   : > { %3904 = vmatmul.mubr.msk.bf16.gmra.mrb[12].mxu1 %vm518_vm4, %v1836_v10  ;;  %4003 = vmatprep.subr.bf16.mxu1 %v4297_v15 }
 0x16c   : > { %4004 = vmatpush3.bf16.msra.mxu1 %v4297_v15 }
 0x16d   : > { %4005 = vmatprep.subr.bf16.mxu1 %v4298_v63 }
 0x16f   : > { %3976 = vmatmul.mubr.msk.bf16.gmra.mrb[12].mxu0 %vm518_vm4, %v2658_v3 }
 0x170   : > { %3981 = vmatprep.mubr.msk.bf16.mxu0 %vm518_vm4, %v2830_v40  ;;  %4006 = vmatpush3.bf16.msra.mxu1 %v4298_v63 }
 0x171   : > { %4007 = vmatprep.subr.bf16.mxu1 %v4299_v31 }
 0x174   : > { %4008 = vmatpush3.bf16.msra.mxu1 %v4299_v31 }
 0x175   : > { %4009 = vmatprep.subr.bf16.mxu1 %v4300_v28 }
 0x177   : > { %3982 = vmatmul.mubr.msk.bf16.vlgmr.msra.gmra.mrb[0].mxu0 %vm518_vm4, %v2839_v53 }
 0x178   : > { %3985 = vmatprep.mubr.msk.bf16.mxu0 %vm518_vm4, %v2848_v19  ;;  %4010 = vmatpush3.bf16.msra.mxu1 %v4300_v28 }
 0x179   : > { %4011 = vmatprep.subr.bf16.mxu1 %v4301_v11 }
 0x17c   : > { %4012 = vmatpush3.bf16.msra.mxu1 %v4301_v11 }
 0x17f   : > { %3986 = vmatmul.mubr.msk.bf16.gmra.mrb[4].mxu0 %vm518_vm4, %v2857_v36 }
 0x180   : > { %3989 = vmatprep.mubr.msk.bf16.mxu0 %vm518_vm4, %v2866_v20 }
 0x187   : > { %3990 = vmatmul.mubr.msk.bf16.gmra.mrb[8].mxu0 %vm518_vm4, %v2875_v7 }
 0x188   : > { %3993 = vmatprep.mubr.msk.bf16.mxu0 %vm518_vm4, %v2884_v60 }
 0x18f   : > { %3994 = vmatmul.mubr.msk.bf16.gmra.mrb[12].mxu0 %vm518_vm4, %v2893_v25 }
 0x224   : > { %v3893_v26 = vpop.f32.mrb[0].mxu1 }
 0x225   : > { %v1901_v32 = vpop.f32.mrb[1].mxu1 }
 0x226   : > { %v3894_v9 = vpop.f32.mrb[2].mxu1 }
 0x227   : > { %v1904_v4 = vpop.f32.mrb[3].mxu1 }
 0x22c   : > { %v3897_v16 = vpop.f32.mrb[4].mxu1 }
 0x22d   : > { %v1917_v24 = vpop.f32.mrb[5].mxu1 }
 0x22e   : > { %v3898_v61 = vpop.f32.mrb[6].mxu1 }
 0x22f   : > { %v1920_v59 = vpop.f32.mrb[7].mxu1 }
 0x234   : > { %v3901_v18 = vpop.f32.mrb[8].mxu1 }
 0x235   : > { %v1933_v29 = vpop.f32.mrb[9].mxu1 }
 0x236   : > { %v3902_v62 = vpop.f32.mrb[10].mxu1 }
 0x237   : > { %v1936_v14 = vpop.f32.mrb[11].mxu1 }
 0x23c   : > { %v3905_v45 = vpop.f32.mrb[12].mxu1 }
 0x23d   : > { %v5617_v21 = vpop.f32.mrb[13].mxu1 }
 0x23e   : > { %v5619_v51 = vpop.f32.mrb[14].mxu1 }
 0x23f   : > { %v5621_v56 = vpop.f32.mrb[15].mxu1 }
 0x24a   : > { %v3983_v41 = vpop.f32.mrb[0].mxu0 }
 0x24b   : > { %v4029_v49 = vadd.f32 %v3983_v41, %v3893_v26  ;;  %v2958_v10 = vpop.f32.mrb[1].mxu0 }
 0x24c   : > { %v4030_v6 = vadd.f32 %v2958_v10, %v1901_v32  ;;  %v3984_v60 = vpop.f32.mrb[2].mxu0 }
 0x24d   : > { %v3046_v52 = vadd.f32 %v4029_v49, %v5626_v54  ;;  %v4031_v30 = vadd.f32 %v3984_v60, %v3894_v9  ;;  %v2961_v44 = vpop.f32.mrb[3].mxu0 }
 0x24e   : > { %v3044_v50 = vadd.f32 %v4030_v6, %v5626_v54  ;;  %v4032_v25 = vadd.f32 %v2961_v44, %v1904_v4 }
 0x24f   : > { %v3047_v0 = vadd.f32 %v4031_v30, %v5626_v54  ;;  %v3062_v1 = vmax.f32 %v3046_v52, 0.0 }
 0x250   : > { %v3045_v23 = vadd.f32 %v4032_v25, %v5626_v54  ;;  %v3060_v3 = vmax.f32 %v3044_v50, 0.0 }
 0x251   : > { %v3063_v55 = vmax.f32 %v3047_v0, 0.0 }
 0x252   : > { %v3061_v33 = vmax.f32 %v3045_v23, 0.0  ;;  %v3987_v35 = vpop.f32.mrb[4].mxu0 }
 0x253   : > { %v3077_v40 = vpack.c.bf16 %v3063_v55, %v3062_v1  ;;  %v4033_v17 = vadd.f32 %v3987_v35, %v3897_v16  ;;  %v2974_v22 = vpop.f32.mrb[5].mxu0 }
 0x254   : > { %v4034_v39 = vadd.f32 %v2974_v22, %v1917_v24  ;;  %v3988_v48 = vpop.f32.mrb[6].mxu0  ;;  %v3076_v12 = vpack.c.bf16 %v3061_v33, %v3060_v3 }
 0x255   : > { %v3050_v13 = vadd.f32 %v4033_v17, %v5626_v54  ;;  %v4035_v8 = vadd.f32 %v3988_v48, %v3898_v61  ;;  %v2977_v47 = vpop.f32.mrb[7].mxu0 }
 0x256   : > { %v3048_v37 = vadd.f32 %v4034_v39, %v5626_v54  ;;  %v4036_v38 = vadd.f32 %v2977_v47, %v1920_v59  ;;  %4013 = vmatprep.mubr.bf16.mxu1 %v3076_v12 }
 0x257   : > { %v3051_v53 = vadd.f32 %v4035_v8, %v5626_v54  ;;  %4014 = vmatmul.mubr.bf16.vlgmr.msra.gmra.mrb[16].mxu1 %v3077_v40  ;;  %v3066_v57 = vmax.f32 %v3050_v13, 0.0 }
 0x258   : > { %v3049_v34 = vadd.f32 %v4036_v38, %v5626_v54  ;;  %v3064_v27 = vmax.f32 %v3048_v37, 0.0 }
 0x259   : > { %v3067_v19 = vmax.f32 %v3051_v53, 0.0 }
 0x25a   : > { %v3065_v58 = vmax.f32 %v3049_v34, 0.0  ;;  %v3991_v46 = vpop.f32.mrb[8].mxu0 }
 0x25b   : > { %v4037_v5 = vadd.f32 %v3991_v46, %v3901_v18  ;;  %v2990_v36 = vpop.f32.mrb[9].mxu0  ;;  %v3079_v20 = vpack.c.bf16 %v3067_v19, %v3066_v57 }
 0x25c   : > { %v4038_v7 = vadd.f32 %v2990_v36, %v1933_v29  ;;  %v3992_v42 = vpop.f32.mrb[10].mxu0  ;;  %v3078_v2 = vpack.c.bf16 %v3065_v58, %v3064_v27 }
 0x25d   : > { %v3054_v43 = vadd.f32 %v4037_v5, %v5626_v54  ;;  %v4039_v15 = vadd.f32 %v3992_v42, %v3902_v62  ;;  %v2993_v63 = vpop.f32.mrb[11].mxu0 }
 0x25e   : > { %v3052_v31 = vadd.f32 %v4038_v7, %v5626_v54  ;;  %v4040_v28 = vadd.f32 %v2993_v63, %v1936_v14  ;;  %4017 = vmatprep.mubr.bf16.mxu1 %v3078_v2 }
 0x25f   : > { %v3055_v11 = vadd.f32 %v4039_v15, %v5626_v54  ;;  %4018 = vmatmul.mubr.bf16.gmra.mrb[20].mxu1 %v3079_v20  ;;  %v3070_v32 = vmax.f32 %v3054_v43, 0.0 }
 0x260   : > { %v3053_v26 = vadd.f32 %v4040_v28, %v5626_v54  ;;  %v3068_v4 = vmax.f32 %v3052_v31, 0.0 }
 0x261   : > { %v3071_v9 = vmax.f32 %v3055_v11, 0.0 }
 0x262   : > { %v3069_v16 = vmax.f32 %v3053_v26, 0.0  ;;  %v3995_v24 = vpop.f32.mrb[12].mxu0 }
 0x263   : > { %v4041_v61 = vadd.f32 %v3995_v24, %v3905_v45  ;;  %v3006_v59 = vpop.f32.mrb[13].mxu0  ;;  %v3081_v18 = vpack.c.bf16 %v3071_v9, %v3070_v32 }
 0x264   : > { %v4042_v29 = vadd.f32 %v3006_v59, %v5617_v21  ;;  %v3996_v62 = vpop.f32.mrb[14].mxu0  ;;  %v3080_v41 = vpack.c.bf16 %v3069_v16, %v3068_v4 }
 0x265   : > { %v3058_v14 = vadd.f32 %v4041_v61, %v5626_v54  ;;  %v4043_v49 = vadd.f32 %v3996_v62, %v5619_v51  ;;  %v3009_v10 = vpop.f32.mrb[15].mxu0 }
 0x266   : > { %v3056_v6 = vadd.f32 %v4042_v29, %v5626_v54  ;;  %v4044_v60 = vadd.f32 %v3009_v10, %v5621_v56  ;;  %4021 = vmatprep.mubr.bf16.mxu1 %v3080_v41  ;;  %v3643_v56 = vld [vmem:[%s5835_s28] ss:$0 sm:$0xff] }
 0x267   : > { %v3059_v52 = vadd.f32 %v4043_v49, %v5626_v54  ;;  %4022 = vmatmul.mubr.bf16.gmra.mrb[24].mxu1 %v3081_v18  ;;  %v3074_v30 = vmax.f32 %v3058_v14, 0.0 }
 0x268   : > { %v3057_v45 = vadd.f32 %v4044_v60, %v5626_v54  ;;  %v3072_v21 = vmax.f32 %v3056_v6, 0.0 }
 0x269   : > { %v3075_v44 = vmax.f32 %v3059_v52, 0.0 }
 0x26a   : > { %v3073_v50 = vmax.f32 %v3057_v45, 0.0 }
 0x26b   : > { %v3083_v25 = vpack.c.bf16 %v3075_v44, %v3074_v30 }
 0x26c   : > { %v3082_v0 = vpack.c.bf16 %v3073_v50, %v3072_v21 }
 0x26e   : > { %4025 = vmatprep.mubr.bf16.mxu1 %v3082_v0 }
 0x26f   : > { %4026 = vmatmul.mubr.bf16.gmra.mrb[28].mxu1 %v3083_v25 }
 0x32a   : > { %v4015_v51 = vpop.f32.mrb[16].mxu1 }
 0x32b   : > { %v3189_v23 = vpop.f32.mrb[17].mxu1  ;;  %v3198_v55 = vadd.f32 %v4015_v51, %v3643_v56 }
 0x32c   : > { %v4016_v1 = vpop.f32.mrb[18].mxu1  ;;  %v3190_v54 = vadd.f32 %v3643_v56, %v3189_v23 }
 0x32d   : > { %v3201_v3 = vadd.f32 %v4016_v1, %v3643_v56  ;;  %v3192_v33 = vpop.f32.mrb[19].mxu1 }
 0x32e   : > { %v3193_v35 = vadd.f32 %v3643_v56, %v3192_v33 }
 0x32f   : > { %v3699_v40 = vpack.c.bf16 %v3201_v3, %v3198_v55 }
 0x330   : > { %v3694_v17 = vpack.c.bf16 %v3193_v35, %v3190_v54 }
 0x331   : > { %3731 = vst [vmem:[%s5652_s3 + $0x8] sm:$0xff] %v3699_v40  }
 0x332   : > { %3695 = vst [vmem:[%s5652_s3] sm:$0xff] %v3694_v17   ;;  %v4019_v22 = vpop.f32.mrb[20].mxu1 }
 0x333   : > { %v3205_v39 = vpop.f32.mrb[21].mxu1  ;;  %v3214_v12 = vadd.f32 %v4019_v22, %v3643_v56 }
 0x334   : > { %v4020_v48 = vpop.f32.mrb[22].mxu1  ;;  %v3206_v47 = vadd.f32 %v3643_v56, %v3205_v39 }
 0x335   : > { %v3217_v13 = vadd.f32 %v4020_v48, %v3643_v56  ;;  %v3208_v8 = vpop.f32.mrb[23].mxu1 }
 0x336   : > { %v3209_v37 = vadd.f32 %v3643_v56, %v3208_v8 }
 0x337   : > { %v3709_v38 = vpack.c.bf16 %v3217_v13, %v3214_v12 }
 0x338   : > { %v3704_v53 = vpack.c.bf16 %v3209_v37, %v3206_v47 }
 0x339   : > { %3733 = vst [vmem:[%s5652_s3 + $0x18] sm:$0xff] %v3709_v38  }
 0x33a   : > { %3732 = vst [vmem:[%s5652_s3 + $0x10] sm:$0xff] %v3704_v53   ;;  %v4023_v34 = vpop.f32.mrb[24].mxu1 }
 0x33b   : > { %v3221_v57 = vpop.f32.mrb[25].mxu1  ;;  %v3230_v27 = vadd.f32 %v4023_v34, %v3643_v56 }
 0x33c   : > { %v4024_v19 = vpop.f32.mrb[26].mxu1  ;;  %v3222_v5 = vadd.f32 %v3643_v56, %v3221_v57 }
 0x33d   : > { %v3233_v58 = vadd.f32 %v4024_v19, %v3643_v56  ;;  %v3224_v46 = vpop.f32.mrb[27].mxu1 }
 0x33e   : > { %v3225_v36 = vadd.f32 %v3643_v56, %v3224_v46 }
 0x33f   : > { %v3719_v20 = vpack.c.bf16 %v3233_v58, %v3230_v27 }
 0x340   : > { %v3714_v7 = vpack.c.bf16 %v3225_v36, %v3222_v5 }
 0x341   : > { %3735 = vst [vmem:[%s5652_s3 + $0x28] sm:$0xff] %v3719_v20  }
 0x342   : > { %3734 = vst [vmem:[%s5652_s3 + $0x20] sm:$0xff] %v3714_v7   ;;  %v4027_v42 = vpop.f32.mrb[28].mxu1 }
 0x343   : > { %v3237_v2 = vpop.f32.mrb[29].mxu1  ;;  %v3246_v15 = vadd.f32 %v4027_v42, %v3643_v56 }
 0x344   : > { %v4028_v43 = vpop.f32.mrb[30].mxu1  ;;  %v3238_v28 = vadd.f32 %v3643_v56, %v3237_v2 }
 0x345   : > { %v3249_v63 = vadd.f32 %v4028_v43, %v3643_v56  ;;  %v3240_v31 = vpop.f32.mrb[31].mxu1 }
 0x346   : > { %v3241_v11 = vadd.f32 %v3643_v56, %v3240_v31 }
 0x347   : > { %v3729_v26 = vpack.c.bf16 %v3249_v63, %v3246_v15 }
 0x348   : > { %v3724_v32 = vpack.c.bf16 %v3241_v11, %v3238_v28 }
 0x349   : > { %3737 = vst [vmem:[%s5652_s3 + $0x38] sm:$0xff] %v3729_v26  }
 0x34a   : > { %3736 = vst [vmem:[%s5652_s3 + $0x30] sm:$0xff] %v3724_v32  }
 0x34b   : > { %4467 = shalt.err (!%p4464_p7)
}
 0x34c   : > { %s4468_s13 = scalar_lea.hbm %s5668_s1, 1024  ;;  %s4472_s18 = scalar_lea.hbm %s5839_s17, 4096 }
 0x34d   : > { %p4469_p12 = scmp.ne.s32.totalorder %s5668_s1, %s4468_s13  ;;  %p4473_p9 = scmp.lt.u32.totalorder %s5668_s1, %s5839_s17 }
 0x34e   : > { %p4474_p10 = scmp.lt.u32.totalorder %s4472_s18, %s4468_s13  ;;  %p4476_p11 = scmp.lt.u32.totalorder %s4468_s13, %s5668_s1 }
 0x34f   : > { %p4470_p1 = pnand %p4469_p12, %p5840_p13 }
 0x350   : > { %p4475_p6 = por %p4474_p10, %p4473_p9 }
 0x351   : > { %p4471_p4 = pneg %p4470_p1 }
 0x352   : > { %p4477_p0 = por %p4476_p11, %p4475_p6 }
 0x354   : > { %p4478_p8 = pnand %p4477_p0, %p4471_p4 }
 0x356   : > { %4481 = shalt.err (!%p4478_p8)
}
 0x357   : > { %s4572_s3 = smov 64   ;;  %s4573_s12 = smov 4  }
 0x358   : > { %4171 = dma.vmem_to_hbm [thread:$0]  (%p5840_p13), %s5663_s20, 1024, %s5668_s1, %s3333_s16, %s4572_s3, %s4572_s3, %s4573_s12  }
 0x359 PF: > { %s5841_s27 = sld [smem:[#allocation21_spill]]  ;;  %s5842_s11 = sld [smem:[#allocation17_spill]] }
 0x35a   : > { %s5843_s4 = sld [smem:[#allocation24_spill]] }
 0x35f   : > { %p4199_p2 = scmp.ge.s32.totalorder %s5841_s27, 2  ;;  %s3363_s22 = sand.u32 1, %s5842_s11  }
 0x360   : > { %p5844_p3 = scmp.ne.s32.totalorder %s5843_s4, 0  ;;  %s3364_s26 = scalar_lea.sflag [#allocation5], %s3363_s22 }
 0x362   : > { %p4191_p5 = pnand %p4199_p2, %p5844_p3 }
 0x364   : > { %4527 = dma.done.wait (!%p4191_p5), %s3364_s26, 1024  }
 0x365   : > { %4529 = vsyncadd (!%p4191_p5), %s3364_s26, 4294966272  ;;  %s27_s8 = sadd.s32 1, %s5841_s27   ;;  %s5845_s6 = sld [smem:[#allocation18_spill]] }
 0x366   : > { %p24_p7 = scmp.ge.s32.totalorder %s27_s8, 6   ;;  %s5846_s26 = sld [smem:[#allocation27_spill]] }
 0x367   : > { %s5847_s20 = sld [smem:[#allocation25_spill]]  ;;  %s5848_s14 = sld [smem:[#allocation26_spill]] }
 0x368   : > { %s5849_s24 = smov %s4536_s25  ;;  %s5851_s27 = smov %s4552_s29 }
 0x369   : > { %s5852_s28 = smov %s4556_s30  ;;  %26 = sbr.rel (!%p24_p7) target bundleno = 16 (0x10), region = 125 }
 0x36b   : > { %s5850_s25 = smov %s5845_s6 }
 0x36d   : > { %s5853_s29 = smov %s5847_s20  ;;  %s5854_s30 = smov %s5848_s14 }
 0x370   :  { %3369 = vsyncpa [#allocation4], 1 }
 0x371   :  { %3371 = vsyncpa [#allocation4 + $0x1], 1 }
 0x372   :  { %3372 = vsyncpa [#allocation7], 1 }
 0x373   :  { %3374 = vsyncpa [#allocation7 + $0x1], 1 }
 0x374   :  { %3375 = vsyncpa [#allocation10], 1 }
 0x375   :  { %3376 = vsyncpa [#allocation5], 1 }
 0x376   :  { %3378 = vsyncpa [#allocation5 + $0x1], 1 }

</bundles_post_ra>
